<compile_context>
chip_gen: v7x
topology: tpu7x:2x2x1
jax: 0.10.0
libtpu: 0.0.40
codegen_flags: <defaults>
</compile_context>

<pallas_src>
import functools

import jax
import jax.numpy as jnp
from jax.experimental import pallas as pl
from jax.experimental.pallas import tpu as pltpu


LANE = 128                      # lane / MXU K granule (K is padded to this)
VMEM_LIMIT = 32 * 1024 * 1024   # explicit scoped-VMEM cap, safe on v5e/v6e/v7x


def _round_up(x, m):
    return ((x + m - 1) // m) * m


# ----------------------------- Pallas kernels -----------------------------

def _conv_bn_relu_kernel(p_ref, w_ref, b_ref, o_ref):
    """One M-tile of conv-as-matmul + folded-BN bias + ReLU; bf16 store."""
    acc = jnp.dot(p_ref[...], w_ref[...], preferred_element_type=jnp.float32)
    o_ref[...] = jnp.maximum(acc + b_ref[...], 0.0).astype(o_ref.dtype)


def _block_head_kernel(taps_ref, w1_ref, b1_ref, w2_ref, b2_ref, o_ref,
                       pad_ref, *, ho, wo):
    """Fused maxpool-finish + BasicBlock + global avg pool for one image.

    taps_ref : [1, 9, ho*wo, c] bf16  -- the 9 stride-2 pool taps, stacked
    w*_ref   : [9, c, c]        bf16  -- per-tap 3x3 conv weights, BN folded
    b*_ref   : [1, c]           f32   -- folded BN biases
    o_ref    : [1, 1, c]        f32   -- globally averaged features
    pad_ref  : [ho+2, wo+2, c]  bf16  -- VMEM scratch: zero-padded feature map
    """
    c = taps_ref.shape[-1]

    # --- finish the 3x3/s2 max pool: VPU max tree over the 9 stacked taps ---
    pooled = taps_ref[0, 0]
    for t in range(1, 9):
        pooled = jnp.maximum(pooled, taps_ref[0, t])          # [ho*wo, c] bf16

    # --- zero-padded (p=1) copy of the pooled map in VMEM scratch -----------
    pad_ref[...] = jnp.zeros(pad_ref.shape, pad_ref.dtype)
    for r in range(ho):
        pad_ref[1 + r, 1:1 + wo, :] = pooled[r * wo:(r + 1) * wo, :]

    def conv3x3_row(w_ref, r):
        """Output row r of a 3x3/s1/p1 conv: 9 shifted [wo, c] @ [c, c] dots."""
        acc = jnp.zeros((wo, c), jnp.float32)
        for i in range(3):
            for j in range(3):
                slab = pad_ref[r + i, j:j + wo, :]             # [wo, c] bf16
                acc = acc + jnp.dot(slab, w_ref[i * 3 + j],
                                    preferred_element_type=jnp.float32)
        return acc

    # --- block conv1 + BN1 + ReLU (virtual im2col, f32 epilogue) ------------
    y1 = [jnp.maximum(conv3x3_row(w1_ref, r) + b1_ref[...], 0.0)
          for r in range(ho)]                                  # ho x [wo, c] f32

    # overwrite the scratch interior with y1 (border stays zero)
    for r in range(ho):
        pad_ref[1 + r, 1:1 + wo, :] = y1[r].astype(pad_ref.dtype)

    # --- block conv2 + BN2 + residual + ReLU + fused global mean ------------
    total = jnp.zeros((1, c), jnp.float32)
    for r in range(ho):
        identity = pooled[r * wo:(r + 1) * wo, :].astype(jnp.float32)
        z = jnp.maximum(conv3x3_row(w2_ref, r) + b2_ref[...] + identity, 0.0)
        total = total + jnp.sum(z, axis=0, keepdims=True)
    o_ref[...] = (total * (1.0 / float(ho * wo)))[None]        # [1, 1, c]


# ----------------------------- kernel wrappers -----------------------------

def fused_conv_bn_relu(patches_bf16, w_bf16, bias_row, *, tm_max=512):
    """[M, Kp](bf16) @ [Kp, C](bf16) + bias + ReLU -> [M, C] bf16, M-tiled grid."""
    m, kp = patches_bf16.shape
    c = w_bf16.shape[1]
    tm = min(tm_max, _round_up(m, 16))          # bf16 stores want 16-row tiles
    m_pad = _round_up(m, tm)
    if m_pad != m:
        patches_bf16 = jnp.pad(patches_bf16, ((0, m_pad - m), (0, 0)))
    out = pl.pallas_call(
        _conv_bn_relu_kernel,
        out_shape=jax.ShapeDtypeStruct((m_pad, c), jnp.bfloat16),
        grid=(m_pad // tm,),
        in_specs=[
            pl.BlockSpec((tm, kp), lambda i: (i, 0)),     # patch tile (pipelined)
            pl.BlockSpec((kp, c), lambda i: (0, 0)),      # resident weight
            pl.BlockSpec((1, c), lambda i: (0, 0)),       # resident bias
        ],
        out_specs=pl.BlockSpec((tm, c), lambda i: (i, 0)),
        compiler_params=pltpu.CompilerParams(
            dimension_semantics=("parallel",),            # dual-TC on v7x
            vmem_limit_bytes=VMEM_LIMIT),
    )(patches_bf16, w_bf16, bias_row)
    return out[:m] if m_pad != m else out


def fused_block_head(taps, ho, wo, w1, b1, w2, b2):
    """maxpool-finish + BasicBlock + global avgpool, one grid step per image."""
    n, nine, hw, c = taps.shape
    return pl.pallas_call(
        functools.partial(_block_head_kernel, ho=ho, wo=wo),
        out_shape=jax.ShapeDtypeStruct((n, 1, c), jnp.float32),
        grid=(n,),
        in_specs=[
            pl.BlockSpec((1, nine, hw, c), lambda b: (b, 0, 0, 0)),
            pl.BlockSpec((nine, c, c), lambda b: (0, 0, 0)),
            pl.BlockSpec((1, c), lambda b: (0, 0)),
            pl.BlockSpec((nine, c, c), lambda b: (0, 0, 0)),
            pl.BlockSpec((1, c), lambda b: (0, 0)),
        ],
        out_specs=pl.BlockSpec((1, 1, c), lambda b: (b, 0, 0)),
        scratch_shapes=[pltpu.VMEM((ho + 2, wo + 2, c), jnp.bfloat16)],
        compiler_params=pltpu.CompilerParams(
            dimension_semantics=("parallel",),            # images across TCs
            vmem_limit_bytes=VMEM_LIMIT),
    )(taps, w1, b1, w2, b2)


# ------------------------------- JAX glue ----------------------------------

def im2col_nhwc(x_nhwc, kh, kw, stride, pad):
    """Patch extraction on NHWC. Returns ([N*Ho*Wo, kh*kw*C], Ho, Wo).

    K ordering is (kh, kw, C); the stem weight matrix uses the same ordering.
    """
    n, h, w, c = x_nhwc.shape
    xp = jnp.pad(x_nhwc, ((0, 0), (pad, pad), (pad, pad), (0, 0)))
    ho = (h + 2 * pad - kh) // stride + 1
    wo = (w + 2 * pad - kw) // stride + 1
    cols = []
    for i in range(kh):
        for j in range(kw):
            cols.append(xp[:, i:i + stride * ho:stride,
                           j:j + stride * wo:stride, :])
    p = jnp.concatenate(cols, axis=-1)          # [N, Ho, Wo, kh*kw*C]
    return p.reshape(n * ho * wo, kh * kw * c), ho, wo


def maxpool_taps(y_nhwc, kh=3, kw=3, stride=2, pad=1):
    """Stride-2 window extraction for the 3x3 max pool, stacked on one axis.

    Zero spatial padding is max-safe because the input is post-ReLU (>= 0).
    The max tree itself runs inside the fused block kernel (one stacked
    operand instead of 9 separate slab inputs).
    """
    n, h, w, c = y_nhwc.shape
    yp = jnp.pad(y_nhwc, ((0, 0), (pad, pad), (pad, pad), (0, 0)))
    ho = (h + 2 * pad - kh) // stride + 1
    wo = (w + 2 * pad - kw) // stride + 1
    taps = [yp[:, i:i + stride * ho:stride, j:j + stride * wo:stride, :]
            for i in range(kh) for j in range(kw)]
    taps = jnp.stack(taps, axis=1).reshape(n, kh * kw, ho * wo, c)
    return taps, ho, wo


def bn_fold(gamma, beta, mean, var, eps=1e-5):
    scale = gamma / jnp.sqrt(var + eps)
    bias = beta - mean * scale
    return scale, bias


def prepare_params(params):
    """One-time prep: fold BN, re-layout weights, pad K to 128, cast to bf16."""
    # Stem 7x7 conv -> [Kp, C] matmul weight (K ordering (kh, kw, ic)).
    w1 = params["conv1_w"]
    oc, ic, kh, kw = w1.shape
    s1, b1 = bn_fold(**params["bn1"])
    w1m = w1.transpose(2, 3, 1, 0).reshape(kh * kw * ic, oc) * s1[None, :]
    kp = _round_up(kh * kw * ic, LANE)
    w1m = jnp.pad(w1m, ((0, kp - kh * kw * ic), (0, 0)))

    # Block 3x3 convs -> per-tap [9, C, C] weights, BN folded.
    def block_w(w, bn):
        s, b = bn_fold(**bn)
        o2, i2, k2h, k2w = w.shape
        wt = w.transpose(2, 3, 1, 0).reshape(k2h * k2w, i2, o2) * s[None, None, :]
        return wt.astype(jnp.bfloat16), b.reshape(1, o2).astype(jnp.float32)

    wb1, bb1 = block_w(params["blk_conv1_w"], params["blk_bn1"])
    wb2, bb2 = block_w(params["blk_conv2_w"], params["blk_bn2"])

    return dict(
        stem_w=w1m.astype(jnp.bfloat16),
        stem_b=b1.reshape(1, oc).astype(jnp.float32),
        blk_w1=wb1, blk_b1=bb1, blk_w2=wb2, blk_b2=bb2,
    )


# --------------------------- parameter creation -----------------------------

def init_params(key, c_in=4, c_stem=8):
    ks = jax.random.split(key, 16)

    def conv_w(k, oc, ic, kh, kw):
        fan_in = ic * kh * kw
        return (jax.random.normal(k, (oc, ic, kh, kw), jnp.float32)
                * (2.0 / fan_in) ** 0.5)

    def bn_params(k, c):
        k1, k2, k3, k4 = jax.random.split(k, 4)
        return dict(
            gamma=1.0 + 0.1 * jax.random.normal(k1, (c,), jnp.float32),
            beta=0.1 * jax.random.normal(k2, (c,), jnp.float32),
            mean=0.1 * jax.random.normal(k3, (c,), jnp.float32),
            var=1.0 + 0.1 * jnp.abs(jax.random.normal(k4, (c,), jnp.float32)),
        )

    return dict(
        conv1_w=conv_w(ks[0], c_stem, c_in, 7, 7),
        bn1=bn_params(ks[1], c_stem),
        blk_conv1_w=conv_w(ks[2], c_stem, c_stem, 3, 3),
        blk_bn1=bn_params(ks[3], c_stem),
        blk_conv2_w=conv_w(ks[4], c_stem, c_stem, 3, 3),
        blk_bn2=bn_params(ks[5], c_stem),
    )


# ------------------------------ forward pass --------------------------------

def resnet_feat_forward(prep, x_nchw):
    n = x_nchw.shape[0]

    x = x_nchw.transpose(0, 2, 3, 1)                    # NCHW -> NHWC once

    # --- stem: conv1 7x7/s2/p3 (no bias) + BN + ReLU, M-tiled matmul grid ---
    patches, h, w = im2col_nhwc(x, 7, 7, 2, 3)          # [n*h*w, 196]
    kp = prep["stem_w"].shape[0]
    patches = jnp.pad(patches, ((0, 0), (0, kp - patches.shape[1])))
    y = fused_conv_bn_relu(patches.astype(jnp.bfloat16),
                           prep["stem_w"], prep["stem_b"])   # [n*h*w, 8] bf16
    c = y.shape[1]
    y = y.reshape(n, h, w, c)

    # --- maxpool 3x3/s2/p1 + BasicBlock + global avg pool, fused kernel ---
    taps, hp, wp = maxpool_taps(y)                       # [n, 9, hp*wp, 8] bf16
    feat = fused_block_head(taps, hp, wp,
                            prep["blk_w1"], prep["blk_b1"],
                            prep["blk_w2"], prep["blk_b2"])   # [n, 1, 8] f32

    # --- ResNetFeat: adaptive_avg_pool2d((1,1)) fused above; x.view(B, -1) ---
    return feat.reshape(n, c)


# ----------------------------------- main ------------------------------------

if __name__ == "__main__":
    key = jax.random.PRNGKey(0)
    k_param, k_x = jax.random.split(key)

    params = init_params(k_param, c_in=4, c_stem=8)
    prep = prepare_params(params)                       # one-time weight prep
    x = jax.random.normal(k_x, (2, 4, 16, 16), jnp.float32)   # NCHW, like PyTorch

    fwd = jax.jit(resnet_feat_forward)
    out = jax.block_until_ready(fwd(prep, x))

    assert out.shape == (2, 8), out.shape
    assert bool(jnp.all(jnp.isfinite(out)))
    print("KERNEL_OK")
</pallas_src>

<mosaic_0001>
module attributes {stable_mosaic.version = 11 : i64} {
  func.func @_conv_bn_relu_kernel(%arg0: i32, %arg1: memref<128x256xbf16, #tpu.memory_space<vmem>>, %arg2: memref<256x8xbf16, #tpu.memory_space<vmem>>, %arg3: memref<1x8xf32, #tpu.memory_space<vmem>>, %arg4: memref<128x8xbf16, #tpu.memory_space<vmem>>) attributes {dimension_semantics = [#tpu.dimension_semantics<parallel>], iteration_bounds = array<i64: 1>, scalar_prefetch = 0 : i64, scratch_operands = 0 : i64, tpu.core_type = #tpu.core_type<tc>, window_params = [{transform_indices = @transform_0, window_bounds = array<i64: 128, 256>}, {pipeline_mode = #tpu.pipeline_mode<synchronous>, transform_indices = @transform_1, window_bounds = array<i64: 256, 8>}, {pipeline_mode = #tpu.pipeline_mode<synchronous>, transform_indices = @transform_2, window_bounds = array<i64: 1, 8>}, {transform_indices = @transform_3, window_bounds = array<i64: 128, 8>}]} {
    %c0 = arith.constant 0 : index
    %c0_0 = arith.constant 0 : index
    %0 = vector.load %arg1[%c0, %c0_0] : memref<128x256xbf16, #tpu.memory_space<vmem>>, vector<128x256xbf16>
    %c0_1 = arith.constant 0 : index
    %c0_2 = arith.constant 0 : index
    %1 = vector.load %arg2[%c0_1, %c0_2] : memref<256x8xbf16, #tpu.memory_space<vmem>>, vector<256x8xbf16>
    %cst = arith.constant dense<0.000000e+00> : vector<128x8xf32>
    %2 = tpu.matmul %0, %1, %cst {dimension_numbers = #tpu.dot_dimension_numbers<[1], [0], [0], [1], [0, 0, 1, 1], [], []>} : vector<128x256xbf16>, vector<256x8xbf16>, vector<128x8xf32> -> vector<128x8xf32>
    %c0_3 = arith.constant 0 : index
    %c0_4 = arith.constant 0 : index
    %3 = vector.load %arg3[%c0_3, %c0_4] : memref<1x8xf32, #tpu.memory_space<vmem>>, vector<1x8xf32>
    %4 = vector.broadcast %3 : vector<1x8xf32> to vector<128x8xf32>
    %5 = arith.addf %2, %4 : vector<128x8xf32>
    %cst_5 = arith.constant 0.000000e+00 : f32
    %6 = vector.broadcast %cst_5 : f32 to vector<128x8xf32>
    %7 = arith.maximumf %5, %6 : vector<128x8xf32>
    %8 = arith.truncf %7 : vector<128x8xf32> to vector<128x8xbf16>
    %c0_6 = arith.constant 0 : index
    %c0_7 = arith.constant 0 : index
    %9 = vector.load %arg4[%c0_6, %c0_7] : memref<128x8xbf16, #tpu.memory_space<vmem>>, vector<128x8xbf16>
    tpu.vector_store %arg4[%c0_6, %c0_7], %8 {strides = array<i32>} : memref<128x8xbf16, #tpu.memory_space<vmem>>, vector<128x8xbf16>,
    return
  }
  func.func @transform_0(%arg0: i32) -> (i32, i32) {
    %c0_i32 = arith.constant 0 : i32
    %c0_i32_0 = arith.constant 0 : i32
    return %arg0, %c0_i32 : i32, i32
  }
  func.func @transform_1(%arg0: i32) -> (i32, i32) {
    %c0_i32 = arith.constant 0 : i32
    %c0_i32_0 = arith.constant 0 : i32
    %c0_i32_1 = arith.constant 0 : i32
    return %c0_i32, %c0_i32_0 : i32, i32
  }
  func.func @transform_2(%arg0: i32) -> (i32, i32) {
    %c0_i32 = arith.constant 0 : i32
    %c0_i32_0 = arith.constant 0 : i32
    %c0_i32_1 = arith.constant 0 : i32
    return %c0_i32, %c0_i32_0 : i32, i32
  }
  func.func @transform_3(%arg0: i32) -> (i32, i32) {
    %c0_i32 = arith.constant 0 : i32
    %c0_i32_0 = arith.constant 0 : i32
    return %arg0, %c0_i32 : i32, i32
  }
}

module attributes {stable_mosaic.version = 11 : i64} {
  func.func @_block_head_kernel(%arg0: i32, %arg1: memref<1x9x16x8xbf16, #tpu.memory_space<vmem>>, %arg2: memref<9x8x8xbf16, #tpu.memory_space<vmem>>, %arg3: memref<1x8xf32, #tpu.memory_space<vmem>>, %arg4: memref<9x8x8xbf16, #tpu.memory_space<vmem>>, %arg5: memref<1x8xf32, #tpu.memory_space<vmem>>, %arg6: memref<1x1x8xf32, #tpu.memory_space<vmem>>, %arg7: memref<6x6x8xbf16, #tpu.memory_space<vmem>>) attributes {dimension_semantics = [#tpu.dimension_semantics<parallel>], iteration_bounds = array<i64: 2>, scalar_prefetch = 0 : i64, scratch_operands = 1 : i64, tpu.core_type = #tpu.core_type<tc>, window_params = [{transform_indices = @transform_0, window_bounds = array<i64: 1, 9, 16, 8>}, {pipeline_mode = #tpu.pipeline_mode<synchronous>, transform_indices = @transform_1, window_bounds = array<i64: 9, 8, 8>}, {pipeline_mode = #tpu.pipeline_mode<synchronous>, transform_indices = @transform_2, window_bounds = array<i64: 1, 8>}, {pipeline_mode = #tpu.pipeline_mode<synchronous>, transform_indices = @transform_3, window_bounds = array<i64: 9, 8, 8>}, {pipeline_mode = #tpu.pipeline_mode<synchronous>, transform_indices = @transform_4, window_bounds = array<i64: 1, 8>}, {transform_indices = @transform_5, window_bounds = array<i64: 1, 1, 8>}]} {
    %c0 = arith.constant 0 : index
    %c0_0 = arith.constant 0 : index
    %c0_1 = arith.constant 0 : index
    %c0_2 = arith.constant 0 : index
    %0 = vector.load %arg1[%c0, %c0_0, %c0_1, %c0_2] : memref<1x9x16x8xbf16, #tpu.memory_space<vmem>>, vector<1x1x16x8xbf16>
    %1 = vector.shape_cast %0 : vector<1x1x16x8xbf16> to vector<16x8xbf16>
    %c0_3 = arith.constant 0 : index
    %c1 = arith.constant 1 : index
    %c0_4 = arith.constant 0 : index
    %c0_5 = arith.constant 0 : index
    %2 = vector.load %arg1[%c0_3, %c1, %c0_4, %c0_5] : memref<1x9x16x8xbf16, #tpu.memory_space<vmem>>, vector<1x1x16x8xbf16>
    %3 = vector.shape_cast %2 : vector<1x1x16x8xbf16> to vector<16x8xbf16>
    %4 = arith.maximumf %1, %3 : vector<16x8xbf16>
    %c0_6 = arith.constant 0 : index
    %c2 = arith.constant 2 : index
    %c0_7 = arith.constant 0 : index
    %c0_8 = arith.constant 0 : index
    %5 = vector.load %arg1[%c0_6, %c2, %c0_7, %c0_8] : memref<1x9x16x8xbf16, #tpu.memory_space<vmem>>, vector<1x1x16x8xbf16>
    %6 = vector.shape_cast %5 : vector<1x1x16x8xbf16> to vector<16x8xbf16>
    %7 = arith.maximumf %4, %6 : vector<16x8xbf16>
    %c0_9 = arith.constant 0 : index
    %c3 = arith.constant 3 : index
    %c0_10 = arith.constant 0 : index
    %c0_11 = arith.constant 0 : index
    %8 = vector.load %arg1[%c0_9, %c3, %c0_10, %c0_11] : memref<1x9x16x8xbf16, #tpu.memory_space<vmem>>, vector<1x1x16x8xbf16>
    %9 = vector.shape_cast %8 : vector<1x1x16x8xbf16> to vector<16x8xbf16>
    %10 = arith.maximumf %7, %9 : vector<16x8xbf16>
    %c0_12 = arith.constant 0 : index
    %c4 = arith.constant 4 : index
    %c0_13 = arith.constant 0 : index
    %c0_14 = arith.constant 0 : index
    %11 = vector.load %arg1[%c0_12, %c4, %c0_13, %c0_14] : memref<1x9x16x8xbf16, #tpu.memory_space<vmem>>, vector<1x1x16x8xbf16>
    %12 = vector.shape_cast %11 : vector<1x1x16x8xbf16> to vector<16x8xbf16>
    %13 = arith.maximumf %10, %12 : vector<16x8xbf16>
    %c0_15 = arith.constant 0 : index
    %c5 = arith.constant 5 : index
    %c0_16 = arith.constant 0 : index
    %c0_17 = arith.constant 0 : index
    %14 = vector.load %arg1[%c0_15, %c5, %c0_16, %c0_17] : memref<1x9x16x8xbf16, #tpu.memory_space<vmem>>, vector<1x1x16x8xbf16>
    %15 = vector.shape_cast %14 : vector<1x1x16x8xbf16> to vector<16x8xbf16>
    %16 = arith.maximumf %13, %15 : vector<16x8xbf16>
    %c0_18 = arith.constant 0 : index
    %c6 = arith.constant 6 : index
    %c0_19 = arith.constant 0 : index
    %c0_20 = arith.constant 0 : index
    %17 = vector.load %arg1[%c0_18, %c6, %c0_19, %c0_20] : memref<1x9x16x8xbf16, #tpu.memory_space<vmem>>, vector<1x1x16x8xbf16>
    %18 = vector.shape_cast %17 : vector<1x1x16x8xbf16> to vector<16x8xbf16>
    %19 = arith.maximumf %16, %18 : vector<16x8xbf16>
    %c0_21 = arith.constant 0 : index
    %c7 = arith.constant 7 : index
    %c0_22 = arith.constant 0 : index
    %c0_23 = arith.constant 0 : index
    %20 = vector.load %arg1[%c0_21, %c7, %c0_22, %c0_23] : memref<1x9x16x8xbf16, #tpu.memory_space<vmem>>, vector<1x1x16x8xbf16>
    %21 = vector.shape_cast %20 : vector<1x1x16x8xbf16> to vector<16x8xbf16>
    %22 = arith.maximumf %19, %21 : vector<16x8xbf16>
    %c0_24 = arith.constant 0 : index
    %c8 = arith.constant 8 : index
    %c0_25 = arith.constant 0 : index
    %c0_26 = arith.constant 0 : index
    %23 = vector.load %arg1[%c0_24, %c8, %c0_25, %c0_26] : memref<1x9x16x8xbf16, #tpu.memory_space<vmem>>, vector<1x1x16x8xbf16>
    %24 = vector.shape_cast %23 : vector<1x1x16x8xbf16> to vector<16x8xbf16>
    %25 = arith.maximumf %22, %24 : vector<16x8xbf16>
    %cst = arith.constant 0.000000e+00 : bf16
    %26 = vector.broadcast %cst : bf16 to vector<6x6x8xbf16>
    %c0_27 = arith.constant 0 : index
    %c0_28 = arith.constant 0 : index
    %c0_29 = arith.constant 0 : index
    %27 = vector.load %arg7[%c0_27, %c0_28, %c0_29] : memref<6x6x8xbf16, #tpu.memory_space<vmem>>, vector<6x6x8xbf16>
    tpu.vector_store %arg7[%c0_27, %c0_28, %c0_29], %26 {strides = array<i32>} : memref<6x6x8xbf16, #tpu.memory_space<vmem>>, vector<6x6x8xbf16>,
    %28 = vector.extract_strided_slice %25 {offsets = [0, 0], sizes = [4, 8], strides = [1, 1]} : vector<16x8xbf16> to vector<4x8xbf16>
    %c1_30 = arith.constant 1 : index
    %c1_31 = arith.constant 1 : index
    %c0_32 = arith.constant 0 : index
    %29 = vector.load %arg7[%c1_30, %c1_31, %c0_32] : memref<6x6x8xbf16, #tpu.memory_space<vmem>>, vector<1x4x8xbf16>
    %30 = vector.shape_cast %29 : vector<1x4x8xbf16> to vector<4x8xbf16>
    %31 = vector.shape_cast %28 : vector<4x8xbf16> to vector<1x4x8xbf16>
    tpu.vector_store %arg7[%c1_30, %c1_31, %c0_32], %31 {strides = array<i32>} : memref<6x6x8xbf16, #tpu.memory_space<vmem>>, vector<1x4x8xbf16>,
    %32 = vector.extract_strided_slice %25 {offsets = [4, 0], sizes = [4, 8], strides = [1, 1]} : vector<16x8xbf16> to vector<4x8xbf16>
    %c2_33 = arith.constant 2 : index
    %c1_34 = arith.constant 1 : index
    %c0_35 = arith.constant 0 : index
    %33 = vector.load %arg7[%c2_33, %c1_34, %c0_35] : memref<6x6x8xbf16, #tpu.memory_space<vmem>>, vector<1x4x8xbf16>
    %34 = vector.shape_cast %33 : vector<1x4x8xbf16> to vector<4x8xbf16>
    %35 = vector.shape_cast %32 : vector<4x8xbf16> to vector<1x4x8xbf16>
    tpu.vector_store %arg7[%c2_33, %c1_34, %c0_35], %35 {strides = array<i32>} : memref<6x6x8xbf16, #tpu.memory_space<vmem>>, vector<1x4x8xbf16>,
    %36 = vector.extract_strided_slice %25 {offsets = [8, 0], sizes = [4, 8], strides = [1, 1]} : vector<16x8xbf16> to vector<4x8xbf16>
    %c3_36 = arith.constant 3 : index
    %c1_37 = arith.constant 1 : index
    %c0_38 = arith.constant 0 : index
    %37 = vector.load %arg7[%c3_36, %c1_37, %c0_38] : memref<6x6x8xbf16, #tpu.memory_space<vmem>>, vector<1x4x8xbf16>
    %38 = vector.shape_cast %37 : vector<1x4x8xbf16> to vector<4x8xbf16>
    %39 = vector.shape_cast %36 : vector<4x8xbf16> to vector<1x4x8xbf16>
    tpu.vector_store %arg7[%c3_36, %c1_37, %c0_38], %39 {strides = array<i32>} : memref<6x6x8xbf16, #tpu.memory_space<vmem>>, vector<1x4x8xbf16>,
    %40 = vector.extract_strided_slice %25 {offsets = [12, 0], sizes = [4, 8], strides = [1, 1]} : vector<16x8xbf16> to vector<4x8xbf16>
    %c4_39 = arith.constant 4 : index
    %c1_40 = arith.constant 1 : index
    %c0_41 = arith.constant 0 : index
    %41 = vector.load %arg7[%c4_39, %c1_40, %c0_41] : memref<6x6x8xbf16, #tpu.memory_space<vmem>>, vector<1x4x8xbf16>
    %42 = vector.shape_cast %41 : vector<1x4x8xbf16> to vector<4x8xbf16>
    %43 = vector.shape_cast %40 : vector<4x8xbf16> to vector<1x4x8xbf16>
    tpu.vector_store %arg7[%c4_39, %c1_40, %c0_41], %43 {strides = array<i32>} : memref<6x6x8xbf16, #tpu.memory_space<vmem>>, vector<1x4x8xbf16>,
    %cst_42 = arith.constant 0.000000e+00 : f32
    %44 = vector.broadcast %cst_42 : f32 to vector<4x8xf32>
    %c0_43 = arith.constant 0 : index
    %c0_44 = arith.constant 0 : index
    %c0_45 = arith.constant 0 : index
    %45 = vector.load %arg7[%c0_43, %c0_44, %c0_45] : memref<6x6x8xbf16, #tpu.memory_space<vmem>>, vector<1x4x8xbf16>
    %46 = vector.shape_cast %45 : vector<1x4x8xbf16> to vector<4x8xbf16>
    %c0_46 = arith.constant 0 : index
    %c0_47 = arith.constant 0 : index
    %c0_48 = arith.constant 0 : index
    %47 = vector.load %arg2[%c0_46, %c0_47, %c0_48] : memref<9x8x8xbf16, #tpu.memory_space<vmem>>, vector<1x8x8xbf16>
    %48 = vector.shape_cast %47 : vector<1x8x8xbf16> to vector<8x8xbf16>
    %cst_49 = arith.constant dense<0.000000e+00> : vector<4x8xf32>
    %49 = tpu.matmul %46, %48, %cst_49 {dimension_numbers = #tpu.dot_dimension_numbers<[1], [0], [0], [1], [0, 0, 1, 1], [], []>} : vector<4x8xbf16>, vector<8x8xbf16>, vector<4x8xf32> -> vector<4x8xf32>
    %50 = arith.addf %44, %49 : vector<4x8xf32>
    %c0_50 = arith.constant 0 : index
    %c1_51 = arith.constant 1 : index
    %c0_52 = arith.constant 0 : index
    %51 = vector.load %arg7[%c0_50, %c1_51, %c0_52] : memref<6x6x8xbf16, #tpu.memory_space<vmem>>, vector<1x4x8xbf16>
    %52 = vector.shape_cast %51 : vector<1x4x8xbf16> to vector<4x8xbf16>
    %c1_53 = arith.constant 1 : index
    %c0_54 = arith.constant 0 : index
    %c0_55 = arith.constant 0 : index
    %53 = vector.load %arg2[%c1_53, %c0_54, %c0_55] : memref<9x8x8xbf16, #tpu.memory_space<vmem>>, vector<1x8x8xbf16>
    %54 = vector.shape_cast %53 : vector<1x8x8xbf16> to vector<8x8xbf16>
    %cst_56 = arith.constant dense<0.000000e+00> : vector<4x8xf32>
    %55 = tpu.matmul %52, %54, %cst_56 {dimension_numbers = #tpu.dot_dimension_numbers<[1], [0], [0], [1], [0, 0, 1, 1], [], []>} : vector<4x8xbf16>, vector<8x8xbf16>, vector<4x8xf32> -> vector<4x8xf32>
    %56 = arith.addf %50, %55 : vector<4x8xf32>
    %c0_57 = arith.constant 0 : index
    %c2_58 = arith.constant 2 : index
    %c0_59 = arith.constant 0 : index
    %57 = vector.load %arg7[%c0_57, %c2_58, %c0_59] : memref<6x6x8xbf16, #tpu.memory_space<vmem>>, vector<1x4x8xbf16>
    %58 = vector.shape_cast %57 : vector<1x4x8xbf16> to vector<4x8xbf16>
    %c2_60 = arith.constant 2 : index
    %c0_61 = arith.constant 0 : index
    %c0_62 = arith.constant 0 : index
    %59 = vector.load %arg2[%c2_60, %c0_61, %c0_62] : memref<9x8x8xbf16, #tpu.memory_space<vmem>>, vector<1x8x8xbf16>
    %60 = vector.shape_cast %59 : vector<1x8x8xbf16> to vector<8x8xbf16>
    %cst_63 = arith.constant dense<0.000000e+00> : vector<4x8xf32>
    %61 = tpu.matmul %58, %60, %cst_63 {dimension_numbers = #tpu.dot_dimension_numbers<[1], [0], [0], [1], [0, 0, 1, 1], [], []>} : vector<4x8xbf16>, vector<8x8xbf16>, vector<4x8xf32> -> vector<4x8xf32>
    %62 = arith.addf %56, %61 : vector<4x8xf32>
    %c1_64 = arith.constant 1 : index
    %c0_65 = arith.constant 0 : index
    %c0_66 = arith.constant 0 : index
    %63 = vector.load %arg7[%c1_64, %c0_65, %c0_66] : memref<6x6x8xbf16, #tpu.memory_space<vmem>>, vector<1x4x8xbf16>
    %64 = vector.shape_cast %63 : vector<1x4x8xbf16> to vector<4x8xbf16>
    %c3_67 = arith.constant 3 : index
    %c0_68 = arith.constant 0 : index
    %c0_69 = arith.constant 0 : index
    %65 = vector.load %arg2[%c3_67, %c0_68, %c0_69] : memref<9x8x8xbf16, #tpu.memory_space<vmem>>, vector<1x8x8xbf16>
    %66 = vector.shape_cast %65 : vector<1x8x8xbf16> to vector<8x8xbf16>
    %cst_70 = arith.constant dense<0.000000e+00> : vector<4x8xf32>
    %67 = tpu.matmul %64, %66, %cst_70 {dimension_numbers = #tpu.dot_dimension_numbers<[1], [0], [0], [1], [0, 0, 1, 1], [], []>} : vector<4x8xbf16>, vector<8x8xbf16>, vector<4x8xf32> -> vector<4x8xf32>
    %68 = arith.addf %62, %67 : vector<4x8xf32>
    %c1_71 = arith.constant 1 : index
    %c1_72 = arith.constant 1 : index
    %c0_73 = arith.constant 0 : index
    %69 = vector.load %arg7[%c1_71, %c1_72, %c0_73] : memref<6x6x8xbf16, #tpu.memory_space<vmem>>, vector<1x4x8xbf16>
    %70 = vector.shape_cast %69 : vector<1x4x8xbf16> to vector<4x8xbf16>
    %c4_74 = arith.constant 4 : index
    %c0_75 = arith.constant 0 : index
    %c0_76 = arith.constant 0 : index
    %71 = vector.load %arg2[%c4_74, %c0_75, %c0_76] : memref<9x8x8xbf16, #tpu.memory_space<vmem>>, vector<1x8x8xbf16>
    %72 = vector.shape_cast %71 : vector<1x8x8xbf16> to vector<8x8xbf16>
    %cst_77 = arith.constant dense<0.000000e+00> : vector<4x8xf32>
    %73 = tpu.matmul %70, %72, %cst_77 {dimension_numbers = #tpu.dot_dimension_numbers<[1], [0], [0], [1], [0, 0, 1, 1], [], []>} : vector<4x8xbf16>, vector<8x8xbf16>, vector<4x8xf32> -> vector<4x8xf32>
    %74 = arith.addf %68, %73 : vector<4x8xf32>
    %c1_78 = arith.constant 1 : index
    %c2_79 = arith.constant 2 : index
    %c0_80 = arith.constant 0 : index
    %75 = vector.load %arg7[%c1_78, %c2_79, %c0_80] : memref<6x6x8xbf16, #tpu.memory_space<vmem>>, vector<1x4x8xbf16>
    %76 = vector.shape_cast %75 : vector<1x4x8xbf16> to vector<4x8xbf16>
    %c5_81 = arith.constant 5 : index
    %c0_82 = arith.constant 0 : index
    %c0_83 = arith.constant 0 : index
    %77 = vector.load %arg2[%c5_81, %c0_82, %c0_83] : memref<9x8x8xbf16, #tpu.memory_space<vmem>>, vector<1x8x8xbf16>
    %78 = vector.shape_cast %77 : vector<1x8x8xbf16> to vector<8x8xbf16>
    %cst_84 = arith.constant dense<0.000000e+00> : vector<4x8xf32>
    %79 = tpu.matmul %76, %78, %cst_84 {dimension_numbers = #tpu.dot_dimension_numbers<[1], [0], [0], [1], [0, 0, 1, 1], [], []>} : vector<4x8xbf16>, vector<8x8xbf16>, vector<4x8xf32> -> vector<4x8xf32>
    %80 = arith.addf %74, %79 : vector<4x8xf32>
    %c2_85 = arith.constant 2 : index
    %c0_86 = arith.constant 0 : index
    %c0_87 = arith.constant 0 : index
    %81 = vector.load %arg7[%c2_85, %c0_86, %c0_87] : memref<6x6x8xbf16, #tpu.memory_space<vmem>>, vector<1x4x8xbf16>
    %82 = vector.shape_cast %81 : vector<1x4x8xbf16> to vector<4x8xbf16>
    %c6_88 = arith.constant 6 : index
    %c0_89 = arith.constant 0 : index
    %c0_90 = arith.constant 0 : index
    %83 = vector.load %arg2[%c6_88, %c0_89, %c0_90] : memref<9x8x8xbf16, #tpu.memory_space<vmem>>, vector<1x8x8xbf16>
    %84 = vector.shape_cast %83 : vector<1x8x8xbf16> to vector<8x8xbf16>
    %cst_91 = arith.constant dense<0.000000e+00> : vector<4x8xf32>
    %85 = tpu.matmul %82, %84, %cst_91 {dimension_numbers = #tpu.dot_dimension_numbers<[1], [0], [0], [1], [0, 0, 1, 1], [], []>} : vector<4x8xbf16>, vector<8x8xbf16>, vector<4x8xf32> -> vector<4x8xf32>
    %86 = arith.addf %80, %85 : vector<4x8xf32>
    %c2_92 = arith.constant 2 : index
    %c1_93 = arith.constant 1 : index
    %c0_94 = arith.constant 0 : index
    %87 = vector.load %arg7[%c2_92, %c1_93, %c0_94] : memref<6x6x8xbf16, #tpu.memory_space<vmem>>, vector<1x4x8xbf16>
    %88 = vector.shape_cast %87 : vector<1x4x8xbf16> to vector<4x8xbf16>
    %c7_95 = arith.constant 7 : index
    %c0_96 = arith.constant 0 : index
    %c0_97 = arith.constant 0 : index
    %89 = vector.load %arg2[%c7_95, %c0_96, %c0_97] : memref<9x8x8xbf16, #tpu.memory_space<vmem>>, vector<1x8x8xbf16>
    %90 = vector.shape_cast %89 : vector<1x8x8xbf16> to vector<8x8xbf16>
    %cst_98 = arith.constant dense<0.000000e+00> : vector<4x8xf32>
    %91 = tpu.matmul %88, %90, %cst_98 {dimension_numbers = #tpu.dot_dimension_numbers<[1], [0], [0], [1], [0, 0, 1, 1], [], []>} : vector<4x8xbf16>, vector<8x8xbf16>, vector<4x8xf32> -> vector<4x8xf32>
    %92 = arith.addf %86, %91 : vector<4x8xf32>
    %c2_99 = arith.constant 2 : index
    %c2_100 = arith.constant 2 : index
    %c0_101 = arith.constant 0 : index
    %93 = vector.load %arg7[%c2_99, %c2_100, %c0_101] : memref<6x6x8xbf16, #tpu.memory_space<vmem>>, vector<1x4x8xbf16>
    %94 = vector.shape_cast %93 : vector<1x4x8xbf16> to vector<4x8xbf16>
    %c8_102 = arith.constant 8 : index
    %c0_103 = arith.constant 0 : index
    %c0_104 = arith.constant 0 : index
    %95 = vector.load %arg2[%c8_102, %c0_103, %c0_104] : memref<9x8x8xbf16, #tpu.memory_space<vmem>>, vector<1x8x8xbf16>
    %96 = vector.shape_cast %95 : vector<1x8x8xbf16> to vector<8x8xbf16>
    %cst_105 = arith.constant dense<0.000000e+00> : vector<4x8xf32>
    %97 = tpu.matmul %94, %96, %cst_105 {dimension_numbers = #tpu.dot_dimension_numbers<[1], [0], [0], [1], [0, 0, 1, 1], [], []>} : vector<4x8xbf16>, vector<8x8xbf16>, vector<4x8xf32> -> vector<4x8xf32>
    %98 = arith.addf %92, %97 : vector<4x8xf32>
    %c0_106 = arith.constant 0 : index
    %c0_107 = arith.constant 0 : index
    %99 = vector.load %arg3[%c0_106, %c0_107] : memref<1x8xf32, #tpu.memory_space<vmem>>, vector<1x8xf32>
    %100 = vector.broadcast %99 : vector<1x8xf32> to vector<4x8xf32>
    %101 = arith.addf %98, %100 : vector<4x8xf32>
    %cst_108 = arith.constant 0.000000e+00 : f32
    %102 = vector.broadcast %cst_108 : f32 to vector<4x8xf32>
    %103 = arith.maximumf %101, %102 : vector<4x8xf32>
    %cst_109 = arith.constant 0.000000e+00 : f32
    %104 = vector.broadcast %cst_109 : f32 to vector<4x8xf32>
    %c1_110 = arith.constant 1 : index
    %c0_111 = arith.constant 0 : index
    %c0_112 = arith.constant 0 : index
    %105 = vector.load %arg7[%c1_110, %c0_111, %c0_112] : memref<6x6x8xbf16, #tpu.memory_space<vmem>>, vector<1x4x8xbf16>
    %106 = vector.shape_cast %105 : vector<1x4x8xbf16> to vector<4x8xbf16>
    %c0_113 = arith.constant 0 : index
    %c0_114 = arith.constant 0 : index
    %c0_115 = arith.constant 0 : index
    %107 = vector.load %arg2[%c0_113, %c0_114, %c0_115] : memref<9x8x8xbf16, #tpu.memory_space<vmem>>, vector<1x8x8xbf16>
    %108 = vector.shape_cast %107 : vector<1x8x8xbf16> to vector<8x8xbf16>
    %cst_116 = arith.constant dense<0.000000e+00> : vector<4x8xf32>
    %109 = tpu.matmul %106, %108, %cst_116 {dimension_numbers = #tpu.dot_dimension_numbers<[1], [0], [0], [1], [0, 0, 1, 1], [], []>} : vector<4x8xbf16>, vector<8x8xbf16>, vector<4x8xf32> -> vector<4x8xf32>
    %110 = arith.addf %104, %109 : vector<4x8xf32>
    %c1_117 = arith.constant 1 : index
    %c1_118 = arith.constant 1 : index
    %c0_119 = arith.constant 0 : index
    %111 = vector.load %arg7[%c1_117, %c1_118, %c0_119] : memref<6x6x8xbf16, #tpu.memory_space<vmem>>, vector<1x4x8xbf16>
    %112 = vector.shape_cast %111 : vector<1x4x8xbf16> to vector<4x8xbf16>
    %c1_120 = arith.constant 1 : index
    %c0_121 = arith.constant 0 : index
    %c0_122 = arith.constant 0 : index
    %113 = vector.load %arg2[%c1_120, %c0_121, %c0_122] : memref<9x8x8xbf16, #tpu.memory_space<vmem>>, vector<1x8x8xbf16>
    %114 = vector.shape_cast %113 : vector<1x8x8xbf16> to vector<8x8xbf16>
    %cst_123 = arith.constant dense<0.000000e+00> : vector<4x8xf32>
    %115 = tpu.matmul %112, %114, %cst_123 {dimension_numbers = #tpu.dot_dimension_numbers<[1], [0], [0], [1], [0, 0, 1, 1], [], []>} : vector<4x8xbf16>, vector<8x8xbf16>, vector<4x8xf32> -> vector<4x8xf32>
    %116 = arith.addf %110, %115 : vector<4x8xf32>
    %c1_124 = arith.constant 1 : index
    %c2_125 = arith.constant 2 : index
    %c0_126 = arith.constant 0 : index
    %117 = vector.load %arg7[%c1_124, %c2_125, %c0_126] : memref<6x6x8xbf16, #tpu.memory_space<vmem>>, vector<1x4x8xbf16>
    %118 = vector.shape_cast %117 : vector<1x4x8xbf16> to vector<4x8xbf16>
    %c2_127 = arith.constant 2 : index
    %c0_128 = arith.constant 0 : index
    %c0_129 = arith.constant 0 : index
    %119 = vector.load %arg2[%c2_127, %c0_128, %c0_129] : memref<9x8x8xbf16, #tpu.memory_space<vmem>>, vector<1x8x8xbf16>
    %120 = vector.shape_cast %119 : vector<1x8x8xbf16> to vector<8x8xbf16>
    %cst_130 = arith.constant dense<0.000000e+00> : vector<4x8xf32>
    %121 = tpu.matmul %118, %120, %cst_130 {dimension_numbers = #tpu.dot_dimension_numbers<[1], [0], [0], [1], [0, 0, 1, 1], [], []>} : vector<4x8xbf16>, vector<8x8xbf16>, vector<4x8xf32> -> vector<4x8xf32>
    %122 = arith.addf %116, %121 : vector<4x8xf32>
    %c2_131 = arith.constant 2 : index
    %c0_132 = arith.constant 0 : index
    %c0_133 = arith.constant 0 : index
    %123 = vector.load %arg7[%c2_131, %c0_132, %c0_133] : memref<6x6x8xbf16, #tpu.memory_space<vmem>>, vector<1x4x8xbf16>
    %124 = vector.shape_cast %123 : vector<1x4x8xbf16> to vector<4x8xbf16>
    %c3_134 = arith.constant 3 : index
    %c0_135 = arith.constant 0 : index
    %c0_136 = arith.constant 0 : index
    %125 = vector.load %arg2[%c3_134, %c0_135, %c0_136] : memref<9x8x8xbf16, #tpu.memory_space<vmem>>, vector<1x8x8xbf16>
    %126 = vector.shape_cast %125 : vector<1x8x8xbf16> to vector<8x8xbf16>
    %cst_137 = arith.constant dense<0.000000e+00> : vector<4x8xf32>
    %127 = tpu.matmul %124, %126, %cst_137 {dimension_numbers = #tpu.dot_dimension_numbers<[1], [0], [0], [1], [0, 0, 1, 1], [], []>} : vector<4x8xbf16>, vector<8x8xbf16>, vector<4x8xf32> -> vector<4x8xf32>
    %128 = arith.addf %122, %127 : vector<4x8xf32>
    %c2_138 = arith.constant 2 : index
    %c1_139 = arith.constant 1 : index
    %c0_140 = arith.constant 0 : index
    %129 = vector.load %arg7[%c2_138, %c1_139, %c0_140] : memref<6x6x8xbf16, #tpu.memory_space<vmem>>, vector<1x4x8xbf16>
    %130 = vector.shape_cast %129 : vector<1x4x8xbf16> to vector<4x8xbf16>
    %c4_141 = arith.constant 4 : index
    %c0_142 = arith.constant 0 : index
    %c0_143 = arith.constant 0 : index
    %131 = vector.load %arg2[%c4_141, %c0_142, %c0_143] : memref<9x8x8xbf16, #tpu.memory_space<vmem>>, vector<1x8x8xbf16>
    %132 = vector.shape_cast %131 : vector<1x8x8xbf16> to vector<8x8xbf16>
    %cst_144 = arith.constant dense<0.000000e+00> : vector<4x8xf32>
    %133 = tpu.matmul %130, %132, %cst_144 {dimension_numbers = #tpu.dot_dimension_numbers<[1], [0], [0], [1], [0, 0, 1, 1], [], []>} : vector<4x8xbf16>, vector<8x8xbf16>, vector<4x8xf32> -> vector<4x8xf32>
    %134 = arith.addf %128, %133 : vector<4x8xf32>
    %c2_145 = arith.constant 2 : index
    %c2_146 = arith.constant 2 : index
    %c0_147 = arith.constant 0 : index
    %135 = vector.load %arg7[%c2_145, %c2_146, %c0_147] : memref<6x6x8xbf16, #tpu.memory_space<vmem>>, vector<1x4x8xbf16>
    %136 = vector.shape_cast %135 : vector<1x4x8xbf16> to vector<4x8xbf16>
    %c5_148 = arith.constant 5 : index
    %c0_149 = arith.constant 0 : index
    %c0_150 = arith.constant 0 : index
    %137 = vector.load %arg2[%c5_148, %c0_149, %c0_150] : memref<9x8x8xbf16, #tpu.memory_space<vmem>>, vector<1x8x8xbf16>
    %138 = vector.shape_cast %137 : vector<1x8x8xbf16> to vector<8x8xbf16>
    %cst_151 = arith.constant dense<0.000000e+00> : vector<4x8xf32>
    %139 = tpu.matmul %136, %138, %cst_151 {dimension_numbers = #tpu.dot_dimension_numbers<[1], [0], [0], [1], [0, 0, 1, 1], [], []>} : vector<4x8xbf16>, vector<8x8xbf16>, vector<4x8xf32> -> vector<4x8xf32>
    %140 = arith.addf %134, %139 : vector<4x8xf32>
    %c3_152 = arith.constant 3 : index
    %c0_153 = arith.constant 0 : index
    %c0_154 = arith.constant 0 : index
    %141 = vector.load %arg7[%c3_152, %c0_153, %c0_154] : memref<6x6x8xbf16, #tpu.memory_space<vmem>>, vector<1x4x8xbf16>
    %142 = vector.shape_cast %141 : vector<1x4x8xbf16> to vector<4x8xbf16>
    %c6_155 = arith.constant 6 : index
    %c0_156 = arith.constant 0 : index
    %c0_157 = arith.constant 0 : index
    %143 = vector.load %arg2[%c6_155, %c0_156, %c0_157] : memref<9x8x8xbf16, #tpu.memory_space<vmem>>, vector<1x8x8xbf16>
    %144 = vector.shape_cast %143 : vector<1x8x8xbf16> to vector<8x8xbf16>
    %cst_158 = arith.constant dense<0.000000e+00> : vector<4x8xf32>
    %145 = tpu.matmul %142, %144, %cst_158 {dimension_numbers = #tpu.dot_dimension_numbers<[1], [0], [0], [1], [0, 0, 1, 1], [], []>} : vector<4x8xbf16>, vector<8x8xbf16>, vector<4x8xf32> -> vector<4x8xf32>
    %146 = arith.addf %140, %145 : vector<4x8xf32>
    %c3_159 = arith.constant 3 : index
    %c1_160 = arith.constant 1 : index
    %c0_161 = arith.constant 0 : index
    %147 = vector.load %arg7[%c3_159, %c1_160, %c0_161] : memref<6x6x8xbf16, #tpu.memory_space<vmem>>, vector<1x4x8xbf16>
    %148 = vector.shape_cast %147 : vector<1x4x8xbf16> to vector<4x8xbf16>
    %c7_162 = arith.constant 7 : index
    %c0_163 = arith.constant 0 : index
    %c0_164 = arith.constant 0 : index
    %149 = vector.load %arg2[%c7_162, %c0_163, %c0_164] : memref<9x8x8xbf16, #tpu.memory_space<vmem>>, vector<1x8x8xbf16>
    %150 = vector.shape_cast %149 : vector<1x8x8xbf16> to vector<8x8xbf16>
    %cst_165 = arith.constant dense<0.000000e+00> : vector<4x8xf32>
    %151 = tpu.matmul %148, %150, %cst_165 {dimension_numbers = #tpu.dot_dimension_numbers<[1], [0], [0], [1], [0, 0, 1, 1], [], []>} : vector<4x8xbf16>, vector<8x8xbf16>, vector<4x8xf32> -> vector<4x8xf32>
    %152 = arith.addf %146, %151 : vector<4x8xf32>
    %c3_166 = arith.constant 3 : index
    %c2_167 = arith.constant 2 : index
    %c0_168 = arith.constant 0 : index
    %153 = vector.load %arg7[%c3_166, %c2_167, %c0_168] : memref<6x6x8xbf16, #tpu.memory_space<vmem>>, vector<1x4x8xbf16>
    %154 = vector.shape_cast %153 : vector<1x4x8xbf16> to vector<4x8xbf16>
    %c8_169 = arith.constant 8 : index
    %c0_170 = arith.constant 0 : index
    %c0_171 = arith.constant 0 : index
    %155 = vector.load %arg2[%c8_169, %c0_170, %c0_171] : memref<9x8x8xbf16, #tpu.memory_space<vmem>>, vector<1x8x8xbf16>
    %156 = vector.shape_cast %155 : vector<1x8x8xbf16> to vector<8x8xbf16>
    %cst_172 = arith.constant dense<0.000000e+00> : vector<4x8xf32>
    %157 = tpu.matmul %154, %156, %cst_172 {dimension_numbers = #tpu.dot_dimension_numbers<[1], [0], [0], [1], [0, 0, 1, 1], [], []>} : vector<4x8xbf16>, vector<8x8xbf16>, vector<4x8xf32> -> vector<4x8xf32>
    %158 = arith.addf %152, %157 : vector<4x8xf32>
    %c0_173 = arith.constant 0 : index
    %c0_174 = arith.constant 0 : index
    %159 = vector.load %arg3[%c0_173, %c0_174] : memref<1x8xf32, #tpu.memory_space<vmem>>, vector<1x8xf32>
    %160 = vector.broadcast %159 : vector<1x8xf32> to vector<4x8xf32>
    %161 = arith.addf %158, %160 : vector<4x8xf32>
    %cst_175 = arith.constant 0.000000e+00 : f32
    %162 = vector.broadcast %cst_175 : f32 to vector<4x8xf32>
    %163 = arith.maximumf %161, %162 : vector<4x8xf32>
    %cst_176 = arith.constant 0.000000e+00 : f32
    %164 = vector.broadcast %cst_176 : f32 to vector<4x8xf32>
    %c2_177 = arith.constant 2 : index
    %c0_178 = arith.constant 0 : index
    %c0_179 = arith.constant 0 : index
    %165 = vector.load %arg7[%c2_177, %c0_178, %c0_179] : memref<6x6x8xbf16, #tpu.memory_space<vmem>>, vector<1x4x8xbf16>
    %166 = vector.shape_cast %165 : vector<1x4x8xbf16> to vector<4x8xbf16>
    %c0_180 = arith.constant 0 : index
    %c0_181 = arith.constant 0 : index
    %c0_182 = arith.constant 0 : index
    %167 = vector.load %arg2[%c0_180, %c0_181, %c0_182] : memref<9x8x8xbf16, #tpu.memory_space<vmem>>, vector<1x8x8xbf16>
    %168 = vector.shape_cast %167 : vector<1x8x8xbf16> to vector<8x8xbf16>
    %cst_183 = arith.constant dense<0.000000e+00> : vector<4x8xf32>
    %169 = tpu.matmul %166, %168, %cst_183 {dimension_numbers = #tpu.dot_dimension_numbers<[1], [0], [0], [1], [0, 0, 1, 1], [], []>} : vector<4x8xbf16>, vector<8x8xbf16>, vector<4x8xf32> -> vector<4x8xf32>
    %170 = arith.addf %164, %169 : vector<4x8xf32>
    %c2_184 = arith.constant 2 : index
    %c1_185 = arith.constant 1 : index
    %c0_186 = arith.constant 0 : index
    %171 = vector.load %arg7[%c2_184, %c1_185, %c0_186] : memref<6x6x8xbf16, #tpu.memory_space<vmem>>, vector<1x4x8xbf16>
    %172 = vector.shape_cast %171 : vector<1x4x8xbf16> to vector<4x8xbf16>
    %c1_187 = arith.constant 1 : index
    %c0_188 = arith.constant 0 : index
    %c0_189 = arith.constant 0 : index
    %173 = vector.load %arg2[%c1_187, %c0_188, %c0_189] : memref<9x8x8xbf16, #tpu.memory_space<vmem>>, vector<1x8x8xbf16>
    %174 = vector.shape_cast %173 : vector<1x8x8xbf16> to vector<8x8xbf16>
    %cst_190 = arith.constant dense<0.000000e+00> : vector<4x8xf32>
    %175 = tpu.matmul %172, %174, %cst_190 {dimension_numbers = #tpu.dot_dimension_numbers<[1], [0], [0], [1], [0, 0, 1, 1], [], []>} : vector<4x8xbf16>, vector<8x8xbf16>, vector<4x8xf32> -> vector<4x8xf32>
    %176 = arith.addf %170, %175 : vector<4x8xf32>
    %c2_191 = arith.constant 2 : index
    %c2_192 = arith.constant 2 : index
    %c0_193 = arith.constant 0 : index
    %177 = vector.load %arg7[%c2_191, %c2_192, %c0_193] : memref<6x6x8xbf16, #tpu.memory_space<vmem>>, vector<1x4x8xbf16>
    %178 = vector.shape_cast %177 : vector<1x4x8xbf16> to vector<4x8xbf16>
    %c2_194 = arith.constant 2 : index
    %c0_195 = arith.constant 0 : index
    %c0_196 = arith.constant 0 : index
    %179 = vector.load %arg2[%c2_194, %c0_195, %c0_196] : memref<9x8x8xbf16, #tpu.memory_space<vmem>>, vector<1x8x8xbf16>
    %180 = vector.shape_cast %179 : vector<1x8x8xbf16> to vector<8x8xbf16>
    %cst_197 = arith.constant dense<0.000000e+00> : vector<4x8xf32>
    %181 = tpu.matmul %178, %180, %cst_197 {dimension_numbers = #tpu.dot_dimension_numbers<[1], [0], [0], [1], [0, 0, 1, 1], [], []>} : vector<4x8xbf16>, vector<8x8xbf16>, vector<4x8xf32> -> vector<4x8xf32>
    %182 = arith.addf %176, %181 : vector<4x8xf32>
    %c3_198 = arith.constant 3 : index
    %c0_199 = arith.constant 0 : index
    %c0_200 = arith.constant 0 : index
    %183 = vector.load %arg7[%c3_198, %c0_199, %c0_200] : memref<6x6x8xbf16, #tpu.memory_space<vmem>>, vector<1x4x8xbf16>
    %184 = vector.shape_cast %183 : vector<1x4x8xbf16> to vector<4x8xbf16>
    %c3_201 = arith.constant 3 : index
    %c0_202 = arith.constant 0 : index
    %c0_203 = arith.constant 0 : index
    %185 = vector.load %arg2[%c3_201, %c0_202, %c0_203] : memref<9x8x8xbf16, #tpu.memory_space<vmem>>, vector<1x8x8xbf16>
    %186 = vector.shape_cast %185 : vector<1x8x8xbf16> to vector<8x8xbf16>
    %cst_204 = arith.constant dense<0.000000e+00> : vector<4x8xf32>
    %187 = tpu.matmul %184, %186, %cst_204 {dimension_numbers = #tpu.dot_dimension_numbers<[1], [0], [0], [1], [0, 0, 1, 1], [], []>} : vector<4x8xbf16>, vector<8x8xbf16>, vector<4x8xf32> -> vector<4x8xf32>
    %188 = arith.addf %182, %187 : vector<4x8xf32>
    %c3_205 = arith.constant 3 : index
    %c1_206 = arith.constant 1 : index
    %c0_207 = arith.constant 0 : index
    %189 = vector.load %arg7[%c3_205, %c1_206, %c0_207] : memref<6x6x8xbf16, #tpu.memory_space<vmem>>, vector<1x4x8xbf16>
    %190 = vector.shape_cast %189 : vector<1x4x8xbf16> to vector<4x8xbf16>
    %c4_208 = arith.constant 4 : index
    %c0_209 = arith.constant 0 : index
    %c0_210 = arith.constant 0 : index
    %191 = vector.load %arg2[%c4_208, %c0_209, %c0_210] : memref<9x8x8xbf16, #tpu.memory_space<vmem>>, vector<1x8x8xbf16>
    %192 = vector.shape_cast %191 : vector<1x8x8xbf16> to vector<8x8xbf16>
    %cst_211 = arith.constant dense<0.000000e+00> : vector<4x8xf32>
    %193 = tpu.matmul %190, %192, %cst_211 {dimension_numbers = #tpu.dot_dimension_numbers<[1], [0], [0], [1], [0, 0, 1, 1], [], []>} : vector<4x8xbf16>, vector<8x8xbf16>, vector<4x8xf32> -> vector<4x8xf32>
    %194 = arith.addf %188, %193 : vector<4x8xf32>
    %c3_212 = arith.constant 3 : index
    %c2_213 = arith.constant 2 : index
    %c0_214 = arith.constant 0 : index
    %195 = vector.load %arg7[%c3_212, %c2_213, %c0_214] : memref<6x6x8xbf16, #tpu.memory_space<vmem>>, vector<1x4x8xbf16>
    %196 = vector.shape_cast %195 : vector<1x4x8xbf16> to vector<4x8xbf16>
    %c5_215 = arith.constant 5 : index
    %c0_216 = arith.constant 0 : index
    %c0_217 = arith.constant 0 : index
    %197 = vector.load %arg2[%c5_215, %c0_216, %c0_217] : memref<9x8x8xbf16, #tpu.memory_space<vmem>>, vector<1x8x8xbf16>
    %198 = vector.shape_cast %197 : vector<1x8x8xbf16> to vector<8x8xbf16>
    %cst_218 = arith.constant dense<0.000000e+00> : vector<4x8xf32>
    %199 = tpu.matmul %196, %198, %cst_218 {dimension_numbers = #tpu.dot_dimension_numbers<[1], [0], [0], [1], [0, 0, 1, 1], [], []>} : vector<4x8xbf16>, vector<8x8xbf16>, vector<4x8xf32> -> vector<4x8xf32>
    %200 = arith.addf %194, %199 : vector<4x8xf32>
    %c4_219 = arith.constant 4 : index
    %c0_220 = arith.constant 0 : index
    %c0_221 = arith.constant 0 : index
    %201 = vector.load %arg7[%c4_219, %c0_220, %c0_221] : memref<6x6x8xbf16, #tpu.memory_space<vmem>>, vector<1x4x8xbf16>
    %202 = vector.shape_cast %201 : vector<1x4x8xbf16> to vector<4x8xbf16>
    %c6_222 = arith.constant 6 : index
    %c0_223 = arith.constant 0 : index
    %c0_224 = arith.constant 0 : index
    %203 = vector.load %arg2[%c6_222, %c0_223, %c0_224] : memref<9x8x8xbf16, #tpu.memory_space<vmem>>, vector<1x8x8xbf16>
    %204 = vector.shape_cast %203 : vector<1x8x8xbf16> to vector<8x8xbf16>
    %cst_225 = arith.constant dense<0.000000e+00> : vector<4x8xf32>
    %205 = tpu.matmul %202, %204, %cst_225 {dimension_numbers = #tpu.dot_dimension_numbers<[1], [0], [0], [1], [0, 0, 1, 1], [], []>} : vector<4x8xbf16>, vector<8x8xbf16>, vector<4x8xf32> -> vector<4x8xf32>
    %206 = arith.addf %200, %205 : vector<4x8xf32>
    %c4_226 = arith.constant 4 : index
    %c1_227 = arith.constant 1 : index
    %c0_228 = arith.constant 0 : index
    %207 = vector.load %arg7[%c4_226, %c1_227, %c0_228] : memref<6x6x8xbf16, #tpu.memory_space<vmem>>, vector<1x4x8xbf16>
    %208 = vector.shape_cast %207 : vector<1x4x8xbf16> to vector<4x8xbf16>
    %c7_229 = arith.constant 7 : index
    %c0_230 = arith.constant 0 : index
    %c0_231 = arith.constant 0 : index
    %209 = vector.load %arg2[%c7_229, %c0_230, %c0_231] : memref<9x8x8xbf16, #tpu.memory_space<vmem>>, vector<1x8x8xbf16>
    %210 = vector.shape_cast %209 : vector<1x8x8xbf16> to vector<8x8xbf16>
    %cst_232 = arith.constant dense<0.000000e+00> : vector<4x8xf32>
    %211 = tpu.matmul %208, %210, %cst_232 {dimension_numbers = #tpu.dot_dimension_numbers<[1], [0], [0], [1], [0, 0, 1, 1], [], []>} : vector<4x8xbf16>, vector<8x8xbf16>, vector<4x8xf32> -> vector<4x8xf32>
    %212 = arith.addf %206, %211 : vector<4x8xf32>
    %c4_233 = arith.constant 4 : index
    %c2_234 = arith.constant 2 : index
    %c0_235 = arith.constant 0 : index
    %213 = vector.load %arg7[%c4_233, %c2_234, %c0_235] : memref<6x6x8xbf16, #tpu.memory_space<vmem>>, vector<1x4x8xbf16>
    %214 = vector.shape_cast %213 : vector<1x4x8xbf16> to vector<4x8xbf16>
    %c8_236 = arith.constant 8 : index
    %c0_237 = arith.constant 0 : index
    %c0_238 = arith.constant 0 : index
    %215 = vector.load %arg2[%c8_236, %c0_237, %c0_238] : memref<9x8x8xbf16, #tpu.memory_space<vmem>>, vector<1x8x8xbf16>
    %216 = vector.shape_cast %215 : vector<1x8x8xbf16> to vector<8x8xbf16>
    %cst_239 = arith.constant dense<0.000000e+00> : vector<4x8xf32>
    %217 = tpu.matmul %214, %216, %cst_239 {dimension_numbers = #tpu.dot_dimension_numbers<[1], [0], [0], [1], [0, 0, 1, 1], [], []>} : vector<4x8xbf16>, vector<8x8xbf16>, vector<4x8xf32> -> vector<4x8xf32>
    %218 = arith.addf %212, %217 : vector<4x8xf32>
    %c0_240 = arith.constant 0 : index
    %c0_241 = arith.constant 0 : index
    %219 = vector.load %arg3[%c0_240, %c0_241] : memref<1x8xf32, #tpu.memory_space<vmem>>, vector<1x8xf32>
    %220 = vector.broadcast %219 : vector<1x8xf32> to vector<4x8xf32>
    %221 = arith.addf %218, %220 : vector<4x8xf32>
    %cst_242 = arith.constant 0.000000e+00 : f32
    %222 = vector.broadcast %cst_242 : f32 to vector<4x8xf32>
    %223 = arith.maximumf %221, %222 : vector<4x8xf32>
    %cst_243 = arith.constant 0.000000e+00 : f32
    %224 = vector.broadcast %cst_243 : f32 to vector<4x8xf32>
    %c3_244 = arith.constant 3 : index
    %c0_245 = arith.constant 0 : index
    %c0_246 = arith.constant 0 : index
    %225 = vector.load %arg7[%c3_244, %c0_245, %c0_246] : memref<6x6x8xbf16, #tpu.memory_space<vmem>>, vector<1x4x8xbf16>
    %226 = vector.shape_cast %225 : vector<1x4x8xbf16> to vector<4x8xbf16>
    %c0_247 = arith.constant 0 : index
    %c0_248 = arith.constant 0 : index
    %c0_249 = arith.constant 0 : index
    %227 = vector.load %arg2[%c0_247, %c0_248, %c0_249] : memref<9x8x8xbf16, #tpu.memory_space<vmem>>, vector<1x8x8xbf16>
    %228 = vector.shape_cast %227 : vector<1x8x8xbf16> to vector<8x8xbf16>
    %cst_250 = arith.constant dense<0.000000e+00> : vector<4x8xf32>
    %229 = tpu.matmul %226, %228, %cst_250 {dimension_numbers = #tpu.dot_dimension_numbers<[1], [0], [0], [1], [0, 0, 1, 1], [], []>} : vector<4x8xbf16>, vector<8x8xbf16>, vector<4x8xf32> -> vector<4x8xf32>
    %230 = arith.addf %224, %229 : vector<4x8xf32>
    %c3_251 = arith.constant 3 : index
    %c1_252 = arith.constant 1 : index
    %c0_253 = arith.constant 0 : index
    %231 = vector.load %arg7[%c3_251, %c1_252, %c0_253] : memref<6x6x8xbf16, #tpu.memory_space<vmem>>, vector<1x4x8xbf16>
    %232 = vector.shape_cast %231 : vector<1x4x8xbf16> to vector<4x8xbf16>
    %c1_254 = arith.constant 1 : index
    %c0_255 = arith.constant 0 : index
    %c0_256 = arith.constant 0 : index
    %233 = vector.load %arg2[%c1_254, %c0_255, %c0_256] : memref<9x8x8xbf16, #tpu.memory_space<vmem>>, vector<1x8x8xbf16>
    %234 = vector.shape_cast %233 : vector<1x8x8xbf16> to vector<8x8xbf16>
    %cst_257 = arith.constant dense<0.000000e+00> : vector<4x8xf32>
    %235 = tpu.matmul %232, %234, %cst_257 {dimension_numbers = #tpu.dot_dimension_numbers<[1], [0], [0], [1], [0, 0, 1, 1], [], []>} : vector<4x8xbf16>, vector<8x8xbf16>, vector<4x8xf32> -> vector<4x8xf32>
    %236 = arith.addf %230, %235 : vector<4x8xf32>
    %c3_258 = arith.constant 3 : index
    %c2_259 = arith.constant 2 : index
    %c0_260 = arith.constant 0 : index
    %237 = vector.load %arg7[%c3_258, %c2_259, %c0_260] : memref<6x6x8xbf16, #tpu.memory_space<vmem>>, vector<1x4x8xbf16>
    %238 = vector.shape_cast %237 : vector<1x4x8xbf16> to vector<4x8xbf16>
    %c2_261 = arith.constant 2 : index
    %c0_262 = arith.constant 0 : index
    %c0_263 = arith.constant 0 : index
    %239 = vector.load %arg2[%c2_261, %c0_262, %c0_263] : memref<9x8x8xbf16, #tpu.memory_space<vmem>>, vector<1x8x8xbf16>
    %240 = vector.shape_cast %239 : vector<1x8x8xbf16> to vector<8x8xbf16>
    %cst_264 = arith.constant dense<0.000000e+00> : vector<4x8xf32>
    %241 = tpu.matmul %238, %240, %cst_264 {dimension_numbers = #tpu.dot_dimension_numbers<[1], [0], [0], [1], [0, 0, 1, 1], [], []>} : vector<4x8xbf16>, vector<8x8xbf16>, vector<4x8xf32> -> vector<4x8xf32>
    %242 = arith.addf %236, %241 : vector<4x8xf32>
    %c4_265 = arith.constant 4 : index
    %c0_266 = arith.constant 0 : index
    %c0_267 = arith.constant 0 : index
    %243 = vector.load %arg7[%c4_265, %c0_266, %c0_267] : memref<6x6x8xbf16, #tpu.memory_space<vmem>>, vector<1x4x8xbf16>
    %244 = vector.shape_cast %243 : vector<1x4x8xbf16> to vector<4x8xbf16>
    %c3_268 = arith.constant 3 : index
    %c0_269 = arith.constant 0 : index
    %c0_270 = arith.constant 0 : index
    %245 = vector.load %arg2[%c3_268, %c0_269, %c0_270] : memref<9x8x8xbf16, #tpu.memory_space<vmem>>, vector<1x8x8xbf16>
    %246 = vector.shape_cast %245 : vector<1x8x8xbf16> to vector<8x8xbf16>
    %cst_271 = arith.constant dense<0.000000e+00> : vector<4x8xf32>
    %247 = tpu.matmul %244, %246, %cst_271 {dimension_numbers = #tpu.dot_dimension_numbers<[1], [0], [0], [1], [0, 0, 1, 1], [], []>} : vector<4x8xbf16>, vector<8x8xbf16>, vector<4x8xf32> -> vector<4x8xf32>
    %248 = arith.addf %242, %247 : vector<4x8xf32>
    %c4_272 = arith.constant 4 : index
    %c1_273 = arith.constant 1 : index
    %c0_274 = arith.constant 0 : index
    %249 = vector.load %arg7[%c4_272, %c1_273, %c0_274] : memref<6x6x8xbf16, #tpu.memory_space<vmem>>, vector<1x4x8xbf16>
    %250 = vector.shape_cast %249 : vector<1x4x8xbf16> to vector<4x8xbf16>
    %c4_275 = arith.constant 4 : index
    %c0_276 = arith.constant 0 : index
    %c0_277 = arith.constant 0 : index
    %251 = vector.load %arg2[%c4_275, %c0_276, %c0_277] : memref<9x8x8xbf16, #tpu.memory_space<vmem>>, vector<1x8x8xbf16>
    %252 = vector.shape_cast %251 : vector<1x8x8xbf16> to vector<8x8xbf16>
    %cst_278 = arith.constant dense<0.000000e+00> : vector<4x8xf32>
    %253 = tpu.matmul %250, %252, %cst_278 {dimension_numbers = #tpu.dot_dimension_numbers<[1], [0], [0], [1], [0, 0, 1, 1], [], []>} : vector<4x8xbf16>, vector<8x8xbf16>, vector<4x8xf32> -> vector<4x8xf32>
    %254 = arith.addf %248, %253 : vector<4x8xf32>
    %c4_279 = arith.constant 4 : index
    %c2_280 = arith.constant 2 : index
    %c0_281 = arith.constant 0 : index
    %255 = vector.load %arg7[%c4_279, %c2_280, %c0_281] : memref<6x6x8xbf16, #tpu.memory_space<vmem>>, vector<1x4x8xbf16>
    %256 = vector.shape_cast %255 : vector<1x4x8xbf16> to vector<4x8xbf16>
    %c5_282 = arith.constant 5 : index
    %c0_283 = arith.constant 0 : index
    %c0_284 = arith.constant 0 : index
    %257 = vector.load %arg2[%c5_282, %c0_283, %c0_284] : memref<9x8x8xbf16, #tpu.memory_space<vmem>>, vector<1x8x8xbf16>
    %258 = vector.shape_cast %257 : vector<1x8x8xbf16> to vector<8x8xbf16>
    %cst_285 = arith.constant dense<0.000000e+00> : vector<4x8xf32>
    %259 = tpu.matmul %256, %258, %cst_285 {dimension_numbers = #tpu.dot_dimension_numbers<[1], [0], [0], [1], [0, 0, 1, 1], [], []>} : vector<4x8xbf16>, vector<8x8xbf16>, vector<4x8xf32> -> vector<4x8xf32>
    %260 = arith.addf %254, %259 : vector<4x8xf32>
    %c5_286 = arith.constant 5 : index
    %c0_287 = arith.constant 0 : index
    %c0_288 = arith.constant 0 : index
    %261 = vector.load %arg7[%c5_286, %c0_287, %c0_288] : memref<6x6x8xbf16, #tpu.memory_space<vmem>>, vector<1x4x8xbf16>
    %262 = vector.shape_cast %261 : vector<1x4x8xbf16> to vector<4x8xbf16>
    %c6_289 = arith.constant 6 : index
    %c0_290 = arith.constant 0 : index
    %c0_291 = arith.constant 0 : index
    %263 = vector.load %arg2[%c6_289, %c0_290, %c0_291] : memref<9x8x8xbf16, #tpu.memory_space<vmem>>, vector<1x8x8xbf16>
    %264 = vector.shape_cast %263 : vector<1x8x8xbf16> to vector<8x8xbf16>
    %cst_292 = arith.constant dense<0.000000e+00> : vector<4x8xf32>
    %265 = tpu.matmul %262, %264, %cst_292 {dimension_numbers = #tpu.dot_dimension_numbers<[1], [0], [0], [1], [0, 0, 1, 1], [], []>} : vector<4x8xbf16>, vector<8x8xbf16>, vector<4x8xf32> -> vector<4x8xf32>
    %266 = arith.addf %260, %265 : vector<4x8xf32>
    %c5_293 = arith.constant 5 : index
    %c1_294 = arith.constant 1 : index
    %c0_295 = arith.constant 0 : index
    %267 = vector.load %arg7[%c5_293, %c1_294, %c0_295] : memref<6x6x8xbf16, #tpu.memory_space<vmem>>, vector<1x4x8xbf16>
    %268 = vector.shape_cast %267 : vector<1x4x8xbf16> to vector<4x8xbf16>
    %c7_296 = arith.constant 7 : index
    %c0_297 = arith.constant 0 : index
    %c0_298 = arith.constant 0 : index
    %269 = vector.load %arg2[%c7_296, %c0_297, %c0_298] : memref<9x8x8xbf16, #tpu.memory_space<vmem>>, vector<1x8x8xbf16>
    %270 = vector.shape_cast %269 : vector<1x8x8xbf16> to vector<8x8xbf16>
    %cst_299 = arith.constant dense<0.000000e+00> : vector<4x8xf32>
    %271 = tpu.matmul %268, %270, %cst_299 {dimension_numbers = #tpu.dot_dimension_numbers<[1], [0], [0], [1], [0, 0, 1, 1], [], []>} : vector<4x8xbf16>, vector<8x8xbf16>, vector<4x8xf32> -> vector<4x8xf32>
    %272 = arith.addf %266, %271 : vector<4x8xf32>
    %c5_300 = arith.constant 5 : index
    %c2_301 = arith.constant 2 : index
    %c0_302 = arith.constant 0 : index
    %273 = vector.load %arg7[%c5_300, %c2_301, %c0_302] : memref<6x6x8xbf16, #tpu.memory_space<vmem>>, vector<1x4x8xbf16>
    %274 = vector.shape_cast %273 : vector<1x4x8xbf16> to vector<4x8xbf16>
    %c8_303 = arith.constant 8 : index
    %c0_304 = arith.constant 0 : index
    %c0_305 = arith.constant 0 : index
    %275 = vector.load %arg2[%c8_303, %c0_304, %c0_305] : memref<9x8x8xbf16, #tpu.memory_space<vmem>>, vector<1x8x8xbf16>
    %276 = vector.shape_cast %275 : vector<1x8x8xbf16> to vector<8x8xbf16>
    %cst_306 = arith.constant dense<0.000000e+00> : vector<4x8xf32>
    %277 = tpu.matmul %274, %276, %cst_306 {dimension_numbers = #tpu.dot_dimension_numbers<[1], [0], [0], [1], [0, 0, 1, 1], [], []>} : vector<4x8xbf16>, vector<8x8xbf16>, vector<4x8xf32> -> vector<4x8xf32>
    %278 = arith.addf %272, %277 : vector<4x8xf32>
    %c0_307 = arith.constant 0 : index
    %c0_308 = arith.constant 0 : index
    %279 = vector.load %arg3[%c0_307, %c0_308] : memref<1x8xf32, #tpu.memory_space<vmem>>, vector<1x8xf32>
    %280 = vector.broadcast %279 : vector<1x8xf32> to vector<4x8xf32>
    %281 = arith.addf %278, %280 : vector<4x8xf32>
    %cst_309 = arith.constant 0.000000e+00 : f32
    %282 = vector.broadcast %cst_309 : f32 to vector<4x8xf32>
    %283 = arith.maximumf %281, %282 : vector<4x8xf32>
    %284 = arith.truncf %103 : vector<4x8xf32> to vector<4x8xbf16>
    %c1_310 = arith.constant 1 : index
    %c1_311 = arith.constant 1 : index
    %c0_312 = arith.constant 0 : index
    %285 = vector.load %arg7[%c1_310, %c1_311, %c0_312] : memref<6x6x8xbf16, #tpu.memory_space<vmem>>, vector<1x4x8xbf16>
    %286 = vector.shape_cast %285 : vector<1x4x8xbf16> to vector<4x8xbf16>
    %287 = vector.shape_cast %284 : vector<4x8xbf16> to vector<1x4x8xbf16>
    tpu.vector_store %arg7[%c1_310, %c1_311, %c0_312], %287 {strides = array<i32>} : memref<6x6x8xbf16, #tpu.memory_space<vmem>>, vector<1x4x8xbf16>,
    %288 = arith.truncf %163 : vector<4x8xf32> to vector<4x8xbf16>
    %c2_313 = arith.constant 2 : index
    %c1_314 = arith.constant 1 : index
    %c0_315 = arith.constant 0 : index
    %289 = vector.load %arg7[%c2_313, %c1_314, %c0_315] : memref<6x6x8xbf16, #tpu.memory_space<vmem>>, vector<1x4x8xbf16>
    %290 = vector.shape_cast %289 : vector<1x4x8xbf16> to vector<4x8xbf16>
    %291 = vector.shape_cast %288 : vector<4x8xbf16> to vector<1x4x8xbf16>
    tpu.vector_store %arg7[%c2_313, %c1_314, %c0_315], %291 {strides = array<i32>} : memref<6x6x8xbf16, #tpu.memory_space<vmem>>, vector<1x4x8xbf16>,
    %292 = arith.truncf %223 : vector<4x8xf32> to vector<4x8xbf16>
    %c3_316 = arith.constant 3 : index
    %c1_317 = arith.constant 1 : index
    %c0_318 = arith.constant 0 : index
    %293 = vector.load %arg7[%c3_316, %c1_317, %c0_318] : memref<6x6x8xbf16, #tpu.memory_space<vmem>>, vector<1x4x8xbf16>
    %294 = vector.shape_cast %293 : vector<1x4x8xbf16> to vector<4x8xbf16>
    %295 = vector.shape_cast %292 : vector<4x8xbf16> to vector<1x4x8xbf16>
    tpu.vector_store %arg7[%c3_316, %c1_317, %c0_318], %295 {strides = array<i32>} : memref<6x6x8xbf16, #tpu.memory_space<vmem>>, vector<1x4x8xbf16>,
    %296 = arith.truncf %283 : vector<4x8xf32> to vector<4x8xbf16>
    %c4_319 = arith.constant 4 : index
    %c1_320 = arith.constant 1 : index
    %c0_321 = arith.constant 0 : index
    %297 = vector.load %arg7[%c4_319, %c1_320, %c0_321] : memref<6x6x8xbf16, #tpu.memory_space<vmem>>, vector<1x4x8xbf16>
    %298 = vector.shape_cast %297 : vector<1x4x8xbf16> to vector<4x8xbf16>
    %299 = vector.shape_cast %296 : vector<4x8xbf16> to vector<1x4x8xbf16>
    tpu.vector_store %arg7[%c4_319, %c1_320, %c0_321], %299 {strides = array<i32>} : memref<6x6x8xbf16, #tpu.memory_space<vmem>>, vector<1x4x8xbf16>,
    %cst_322 = arith.constant 0.000000e+00 : f32
    %300 = vector.broadcast %cst_322 : f32 to vector<1x8xf32>
    %301 = vector.extract_strided_slice %25 {offsets = [0, 0], sizes = [4, 8], strides = [1, 1]} : vector<16x8xbf16> to vector<4x8xbf16>
    %302 = arith.extf %301 : vector<4x8xbf16> to vector<4x8xf32>
    %cst_323 = arith.constant 0.000000e+00 : f32
    %303 = vector.broadcast %cst_323 : f32 to vector<4x8xf32>
    %c0_324 = arith.constant 0 : index
    %c0_325 = arith.constant 0 : index
    %c0_326 = arith.constant 0 : index
    %304 = vector.load %arg7[%c0_324, %c0_325, %c0_326] : memref<6x6x8xbf16, #tpu.memory_space<vmem>>, vector<1x4x8xbf16>
    %305 = vector.shape_cast %304 : vector<1x4x8xbf16> to vector<4x8xbf16>
    %c0_327 = arith.constant 0 : index
    %c0_328 = arith.constant 0 : index
    %c0_329 = arith.constant 0 : index
    %306 = vector.load %arg4[%c0_327, %c0_328, %c0_329] : memref<9x8x8xbf16, #tpu.memory_space<vmem>>, vector<1x8x8xbf16>
    %307 = vector.shape_cast %306 : vector<1x8x8xbf16> to vector<8x8xbf16>
    %cst_330 = arith.constant dense<0.000000e+00> : vector<4x8xf32>
    %308 = tpu.matmul %305, %307, %cst_330 {dimension_numbers = #tpu.dot_dimension_numbers<[1], [0], [0], [1], [0, 0, 1, 1], [], []>} : vector<4x8xbf16>, vector<8x8xbf16>, vector<4x8xf32> -> vector<4x8xf32>
    %309 = arith.addf %303, %308 : vector<4x8xf32>
    %c0_331 = arith.constant 0 : index
    %c1_332 = arith.constant 1 : index
    %c0_333 = arith.constant 0 : index
    %310 = vector.load %arg7[%c0_331, %c1_332, %c0_333] : memref<6x6x8xbf16, #tpu.memory_space<vmem>>, vector<1x4x8xbf16>
    %311 = vector.shape_cast %310 : vector<1x4x8xbf16> to vector<4x8xbf16>
    %c1_334 = arith.constant 1 : index
    %c0_335 = arith.constant 0 : index
    %c0_336 = arith.constant 0 : index
    %312 = vector.load %arg4[%c1_334, %c0_335, %c0_336] : memref<9x8x8xbf16, #tpu.memory_space<vmem>>, vector<1x8x8xbf16>
    %313 = vector.shape_cast %312 : vector<1x8x8xbf16> to vector<8x8xbf16>
    %cst_337 = arith.constant dense<0.000000e+00> : vector<4x8xf32>
    %314 = tpu.matmul %311, %313, %cst_337 {dimension_numbers = #tpu.dot_dimension_numbers<[1], [0], [0], [1], [0, 0, 1, 1], [], []>} : vector<4x8xbf16>, vector<8x8xbf16>, vector<4x8xf32> -> vector<4x8xf32>
    %315 = arith.addf %309, %314 : vector<4x8xf32>
    %c0_338 = arith.constant 0 : index
    %c2_339 = arith.constant 2 : index
    %c0_340 = arith.constant 0 : index
    %316 = vector.load %arg7[%c0_338, %c2_339, %c0_340] : memref<6x6x8xbf16, #tpu.memory_space<vmem>>, vector<1x4x8xbf16>
    %317 = vector.shape_cast %316 : vector<1x4x8xbf16> to vector<4x8xbf16>
    %c2_341 = arith.constant 2 : index
    %c0_342 = arith.constant 0 : index
    %c0_343 = arith.constant 0 : index
    %318 = vector.load %arg4[%c2_341, %c0_342, %c0_343] : memref<9x8x8xbf16, #tpu.memory_space<vmem>>, vector<1x8x8xbf16>
    %319 = vector.shape_cast %318 : vector<1x8x8xbf16> to vector<8x8xbf16>
    %cst_344 = arith.constant dense<0.000000e+00> : vector<4x8xf32>
    %320 = tpu.matmul %317, %319, %cst_344 {dimension_numbers = #tpu.dot_dimension_numbers<[1], [0], [0], [1], [0, 0, 1, 1], [], []>} : vector<4x8xbf16>, vector<8x8xbf16>, vector<4x8xf32> -> vector<4x8xf32>
    %321 = arith.addf %315, %320 : vector<4x8xf32>
    %c1_345 = arith.constant 1 : index
    %c0_346 = arith.constant 0 : index
    %c0_347 = arith.constant 0 : index
    %322 = vector.load %arg7[%c1_345, %c0_346, %c0_347] : memref<6x6x8xbf16, #tpu.memory_space<vmem>>, vector<1x4x8xbf16>
    %323 = vector.shape_cast %322 : vector<1x4x8xbf16> to vector<4x8xbf16>
    %c3_348 = arith.constant 3 : index
    %c0_349 = arith.constant 0 : index
    %c0_350 = arith.constant 0 : index
    %324 = vector.load %arg4[%c3_348, %c0_349, %c0_350] : memref<9x8x8xbf16, #tpu.memory_space<vmem>>, vector<1x8x8xbf16>
    %325 = vector.shape_cast %324 : vector<1x8x8xbf16> to vector<8x8xbf16>
    %cst_351 = arith.constant dense<0.000000e+00> : vector<4x8xf32>
    %326 = tpu.matmul %323, %325, %cst_351 {dimension_numbers = #tpu.dot_dimension_numbers<[1], [0], [0], [1], [0, 0, 1, 1], [], []>} : vector<4x8xbf16>, vector<8x8xbf16>, vector<4x8xf32> -> vector<4x8xf32>
    %327 = arith.addf %321, %326 : vector<4x8xf32>
    %c1_352 = arith.constant 1 : index
    %c1_353 = arith.constant 1 : index
    %c0_354 = arith.constant 0 : index
    %328 = vector.load %arg7[%c1_352, %c1_353, %c0_354] : memref<6x6x8xbf16, #tpu.memory_space<vmem>>, vector<1x4x8xbf16>
    %329 = vector.shape_cast %328 : vector<1x4x8xbf16> to vector<4x8xbf16>
    %c4_355 = arith.constant 4 : index
    %c0_356 = arith.constant 0 : index
    %c0_357 = arith.constant 0 : index
    %330 = vector.load %arg4[%c4_355, %c0_356, %c0_357] : memref<9x8x8xbf16, #tpu.memory_space<vmem>>, vector<1x8x8xbf16>
    %331 = vector.shape_cast %330 : vector<1x8x8xbf16> to vector<8x8xbf16>
    %cst_358 = arith.constant dense<0.000000e+00> : vector<4x8xf32>
    %332 = tpu.matmul %329, %331, %cst_358 {dimension_numbers = #tpu.dot_dimension_numbers<[1], [0], [0], [1], [0, 0, 1, 1], [], []>} : vector<4x8xbf16>, vector<8x8xbf16>, vector<4x8xf32> -> vector<4x8xf32>
    %333 = arith.addf %327, %332 : vector<4x8xf32>
    %c1_359 = arith.constant 1 : index
    %c2_360 = arith.constant 2 : index
    %c0_361 = arith.constant 0 : index
    %334 = vector.load %arg7[%c1_359, %c2_360, %c0_361] : memref<6x6x8xbf16, #tpu.memory_space<vmem>>, vector<1x4x8xbf16>
    %335 = vector.shape_cast %334 : vector<1x4x8xbf16> to vector<4x8xbf16>
    %c5_362 = arith.constant 5 : index
    %c0_363 = arith.constant 0 : index
    %c0_364 = arith.constant 0 : index
    %336 = vector.load %arg4[%c5_362, %c0_363, %c0_364] : memref<9x8x8xbf16, #tpu.memory_space<vmem>>, vector<1x8x8xbf16>
    %337 = vector.shape_cast %336 : vector<1x8x8xbf16> to vector<8x8xbf16>
    %cst_365 = arith.constant dense<0.000000e+00> : vector<4x8xf32>
    %338 = tpu.matmul %335, %337, %cst_365 {dimension_numbers = #tpu.dot_dimension_numbers<[1], [0], [0], [1], [0, 0, 1, 1], [], []>} : vector<4x8xbf16>, vector<8x8xbf16>, vector<4x8xf32> -> vector<4x8xf32>
    %339 = arith.addf %333, %338 : vector<4x8xf32>
    %c2_366 = arith.constant 2 : index
    %c0_367 = arith.constant 0 : index
    %c0_368 = arith.constant 0 : index
    %340 = vector.load %arg7[%c2_366, %c0_367, %c0_368] : memref<6x6x8xbf16, #tpu.memory_space<vmem>>, vector<1x4x8xbf16>
    %341 = vector.shape_cast %340 : vector<1x4x8xbf16> to vector<4x8xbf16>
    %c6_369 = arith.constant 6 : index
    %c0_370 = arith.constant 0 : index
    %c0_371 = arith.constant 0 : index
    %342 = vector.load %arg4[%c6_369, %c0_370, %c0_371] : memref<9x8x8xbf16, #tpu.memory_space<vmem>>, vector<1x8x8xbf16>
    %343 = vector.shape_cast %342 : vector<1x8x8xbf16> to vector<8x8xbf16>
    %cst_372 = arith.constant dense<0.000000e+00> : vector<4x8xf32>
    %344 = tpu.matmul %341, %343, %cst_372 {dimension_numbers = #tpu.dot_dimension_numbers<[1], [0], [0], [1], [0, 0, 1, 1], [], []>} : vector<4x8xbf16>, vector<8x8xbf16>, vector<4x8xf32> -> vector<4x8xf32>
    %345 = arith.addf %339, %344 : vector<4x8xf32>
    %c2_373 = arith.constant 2 : index
    %c1_374 = arith.constant 1 : index
    %c0_375 = arith.constant 0 : index
    %346 = vector.load %arg7[%c2_373, %c1_374, %c0_375] : memref<6x6x8xbf16, #tpu.memory_space<vmem>>, vector<1x4x8xbf16>
    %347 = vector.shape_cast %346 : vector<1x4x8xbf16> to vector<4x8xbf16>
    %c7_376 = arith.constant 7 : index
    %c0_377 = arith.constant 0 : index
    %c0_378 = arith.constant 0 : index
    %348 = vector.load %arg4[%c7_376, %c0_377, %c0_378] : memref<9x8x8xbf16, #tpu.memory_space<vmem>>, vector<1x8x8xbf16>
    %349 = vector.shape_cast %348 : vector<1x8x8xbf16> to vector<8x8xbf16>
    %cst_379 = arith.constant dense<0.000000e+00> : vector<4x8xf32>
    %350 = tpu.matmul %347, %349, %cst_379 {dimension_numbers = #tpu.dot_dimension_numbers<[1], [0], [0], [1], [0, 0, 1, 1], [], []>} : vector<4x8xbf16>, vector<8x8xbf16>, vector<4x8xf32> -> vector<4x8xf32>
    %351 = arith.addf %345, %350 : vector<4x8xf32>
    %c2_380 = arith.constant 2 : index
    %c2_381 = arith.constant 2 : index
    %c0_382 = arith.constant 0 : index
    %352 = vector.load %arg7[%c2_380, %c2_381, %c0_382] : memref<6x6x8xbf16, #tpu.memory_space<vmem>>, vector<1x4x8xbf16>
    %353 = vector.shape_cast %352 : vector<1x4x8xbf16> to vector<4x8xbf16>
    %c8_383 = arith.constant 8 : index
    %c0_384 = arith.constant 0 : index
    %c0_385 = arith.constant 0 : index
    %354 = vector.load %arg4[%c8_383, %c0_384, %c0_385] : memref<9x8x8xbf16, #tpu.memory_space<vmem>>, vector<1x8x8xbf16>
    %355 = vector.shape_cast %354 : vector<1x8x8xbf16> to vector<8x8xbf16>
    %cst_386 = arith.constant dense<0.000000e+00> : vector<4x8xf32>
    %356 = tpu.matmul %353, %355, %cst_386 {dimension_numbers = #tpu.dot_dimension_numbers<[1], [0], [0], [1], [0, 0, 1, 1], [], []>} : vector<4x8xbf16>, vector<8x8xbf16>, vector<4x8xf32> -> vector<4x8xf32>
    %357 = arith.addf %351, %356 : vector<4x8xf32>
    %c0_387 = arith.constant 0 : index
    %c0_388 = arith.constant 0 : index
    %358 = vector.load %arg5[%c0_387, %c0_388] : memref<1x8xf32, #tpu.memory_space<vmem>>, vector<1x8xf32>
    %359 = vector.broadcast %358 : vector<1x8xf32> to vector<4x8xf32>
    %360 = arith.addf %357, %359 : vector<4x8xf32>
    %361 = arith.addf %360, %302 : vector<4x8xf32>
    %cst_389 = arith.constant 0.000000e+00 : f32
    %362 = vector.broadcast %cst_389 : f32 to vector<4x8xf32>
    %363 = arith.maximumf %361, %362 : vector<4x8xf32>
    %cst_390 = arith.constant dense<0.000000e+00> : vector<8xf32>
    %364 = vector.multi_reduction <add>, %363, %cst_390 [0] : vector<4x8xf32> to vector<8xf32>
    %365 = vector.shape_cast %364 : vector<8xf32> to vector<1x8xf32>
    %366 = arith.addf %300, %365 : vector<1x8xf32>
    %367 = vector.extract_strided_slice %25 {offsets = [4, 0], sizes = [4, 8], strides = [1, 1]} : vector<16x8xbf16> to vector<4x8xbf16>
    %368 = arith.extf %367 : vector<4x8xbf16> to vector<4x8xf32>
    %cst_391 = arith.constant 0.000000e+00 : f32
    %369 = vector.broadcast %cst_391 : f32 to vector<4x8xf32>
    %c1_392 = arith.constant 1 : index
    %c0_393 = arith.constant 0 : index
    %c0_394 = arith.constant 0 : index
    %370 = vector.load %arg7[%c1_392, %c0_393, %c0_394] : memref<6x6x8xbf16, #tpu.memory_space<vmem>>, vector<1x4x8xbf16>
    %371 = vector.shape_cast %370 : vector<1x4x8xbf16> to vector<4x8xbf16>
    %c0_395 = arith.constant 0 : index
    %c0_396 = arith.constant 0 : index
    %c0_397 = arith.constant 0 : index
    %372 = vector.load %arg4[%c0_395, %c0_396, %c0_397] : memref<9x8x8xbf16, #tpu.memory_space<vmem>>, vector<1x8x8xbf16>
    %373 = vector.shape_cast %372 : vector<1x8x8xbf16> to vector<8x8xbf16>
    %cst_398 = arith.constant dense<0.000000e+00> : vector<4x8xf32>
    %374 = tpu.matmul %371, %373, %cst_398 {dimension_numbers = #tpu.dot_dimension_numbers<[1], [0], [0], [1], [0, 0, 1, 1], [], []>} : vector<4x8xbf16>, vector<8x8xbf16>, vector<4x8xf32> -> vector<4x8xf32>
    %375 = arith.addf %369, %374 : vector<4x8xf32>
    %c1_399 = arith.constant 1 : index
    %c1_400 = arith.constant 1 : index
    %c0_401 = arith.constant 0 : index
    %376 = vector.load %arg7[%c1_399, %c1_400, %c0_401] : memref<6x6x8xbf16, #tpu.memory_space<vmem>>, vector<1x4x8xbf16>
    %377 = vector.shape_cast %376 : vector<1x4x8xbf16> to vector<4x8xbf16>
    %c1_402 = arith.constant 1 : index
    %c0_403 = arith.constant 0 : index
    %c0_404 = arith.constant 0 : index
    %378 = vector.load %arg4[%c1_402, %c0_403, %c0_404] : memref<9x8x8xbf16, #tpu.memory_space<vmem>>, vector<1x8x8xbf16>
    %379 = vector.shape_cast %378 : vector<1x8x8xbf16> to vector<8x8xbf16>
    %cst_405 = arith.constant dense<0.000000e+00> : vector<4x8xf32>
    %380 = tpu.matmul %377, %379, %cst_405 {dimension_numbers = #tpu.dot_dimension_numbers<[1], [0], [0], [1], [0, 0, 1, 1], [], []>} : vector<4x8xbf16>, vector<8x8xbf16>, vector<4x8xf32> -> vector<4x8xf32>
    %381 = arith.addf %375, %380 : vector<4x8xf32>
    %c1_406 = arith.constant 1 : index
    %c2_407 = arith.constant 2 : index
    %c0_408 = arith.constant 0 : index
    %382 = vector.load %arg7[%c1_406, %c2_407, %c0_408] : memref<6x6x8xbf16, #tpu.memory_space<vmem>>, vector<1x4x8xbf16>
    %383 = vector.shape_cast %382 : vector<1x4x8xbf16> to vector<4x8xbf16>
    %c2_409 = arith.constant 2 : index
    %c0_410 = arith.constant 0 : index
    %c0_411 = arith.constant 0 : index
    %384 = vector.load %arg4[%c2_409, %c0_410, %c0_411] : memref<9x8x8xbf16, #tpu.memory_space<vmem>>, vector<1x8x8xbf16>
    %385 = vector.shape_cast %384 : vector<1x8x8xbf16> to vector<8x8xbf16>
    %cst_412 = arith.constant dense<0.000000e+00> : vector<4x8xf32>
    %386 = tpu.matmul %383, %385, %cst_412 {dimension_numbers = #tpu.dot_dimension_numbers<[1], [0], [0], [1], [0, 0, 1, 1], [], []>} : vector<4x8xbf16>, vector<8x8xbf16>, vector<4x8xf32> -> vector<4x8xf32>
    %387 = arith.addf %381, %386 : vector<4x8xf32>
    %c2_413 = arith.constant 2 : index
    %c0_414 = arith.constant 0 : index
    %c0_415 = arith.constant 0 : index
    %388 = vector.load %arg7[%c2_413, %c0_414, %c0_415] : memref<6x6x8xbf16, #tpu.memory_space<vmem>>, vector<1x4x8xbf16>
    %389 = vector.shape_cast %388 : vector<1x4x8xbf16> to vector<4x8xbf16>
    %c3_416 = arith.constant 3 : index
    %c0_417 = arith.constant 0 : index
    %c0_418 = arith.constant 0 : index
    %390 = vector.load %arg4[%c3_416, %c0_417, %c0_418] : memref<9x8x8xbf16, #tpu.memory_space<vmem>>, vector<1x8x8xbf16>
    %391 = vector.shape_cast %390 : vector<1x8x8xbf16> to vector<8x8xbf16>
    %cst_419 = arith.constant dense<0.000000e+00> : vector<4x8xf32>
    %392 = tpu.matmul %389, %391, %cst_419 {dimension_numbers = #tpu.dot_dimension_numbers<[1], [0], [0], [1], [0, 0, 1, 1], [], []>} : vector<4x8xbf16>, vector<8x8xbf16>, vector<4x8xf32> -> vector<4x8xf32>
    %393 = arith.addf %387, %392 : vector<4x8xf32>
    %c2_420 = arith.constant 2 : index
    %c1_421 = arith.constant 1 : index
    %c0_422 = arith.constant 0 : index
    %394 = vector.load %arg7[%c2_420, %c1_421, %c0_422] : memref<6x6x8xbf16, #tpu.memory_space<vmem>>, vector<1x4x8xbf16>
    %395 = vector.shape_cast %394 : vector<1x4x8xbf16> to vector<4x8xbf16>
    %c4_423 = arith.constant 4 : index
    %c0_424 = arith.constant 0 : index
    %c0_425 = arith.constant 0 : index
    %396 = vector.load %arg4[%c4_423, %c0_424, %c0_425] : memref<9x8x8xbf16, #tpu.memory_space<vmem>>, vector<1x8x8xbf16>
    %397 = vector.shape_cast %396 : vector<1x8x8xbf16> to vector<8x8xbf16>
    %cst_426 = arith.constant dense<0.000000e+00> : vector<4x8xf32>
    %398 = tpu.matmul %395, %397, %cst_426 {dimension_numbers = #tpu.dot_dimension_numbers<[1], [0], [0], [1], [0, 0, 1, 1], [], []>} : vector<4x8xbf16>, vector<8x8xbf16>, vector<4x8xf32> -> vector<4x8xf32>
    %399 = arith.addf %393, %398 : vector<4x8xf32>
    %c2_427 = arith.constant 2 : index
    %c2_428 = arith.constant 2 : index
    %c0_429 = arith.constant 0 : index
    %400 = vector.load %arg7[%c2_427, %c2_428, %c0_429] : memref<6x6x8xbf16, #tpu.memory_space<vmem>>, vector<1x4x8xbf16>
    %401 = vector.shape_cast %400 : vector<1x4x8xbf16> to vector<4x8xbf16>
    %c5_430 = arith.constant 5 : index
    %c0_431 = arith.constant 0 : index
    %c0_432 = arith.constant 0 : index
    %402 = vector.load %arg4[%c5_430, %c0_431, %c0_432] : memref<9x8x8xbf16, #tpu.memory_space<vmem>>, vector<1x8x8xbf16>
    %403 = vector.shape_cast %402 : vector<1x8x8xbf16> to vector<8x8xbf16>
    %cst_433 = arith.constant dense<0.000000e+00> : vector<4x8xf32>
    %404 = tpu.matmul %401, %403, %cst_433 {dimension_numbers = #tpu.dot_dimension_numbers<[1], [0], [0], [1], [0, 0, 1, 1], [], []>} : vector<4x8xbf16>, vector<8x8xbf16>, vector<4x8xf32> -> vector<4x8xf32>
    %405 = arith.addf %399, %404 : vector<4x8xf32>
    %c3_434 = arith.constant 3 : index
    %c0_435 = arith.constant 0 : index
    %c0_436 = arith.constant 0 : index
    %406 = vector.load %arg7[%c3_434, %c0_435, %c0_436] : memref<6x6x8xbf16, #tpu.memory_space<vmem>>, vector<1x4x8xbf16>
    %407 = vector.shape_cast %406 : vector<1x4x8xbf16> to vector<4x8xbf16>
    %c6_437 = arith.constant 6 : index
    %c0_438 = arith.constant 0 : index
    %c0_439 = arith.constant 0 : index
    %408 = vector.load %arg4[%c6_437, %c0_438, %c0_439] : memref<9x8x8xbf16, #tpu.memory_space<vmem>>, vector<1x8x8xbf16>
    %409 = vector.shape_cast %408 : vector<1x8x8xbf16> to vector<8x8xbf16>
    %cst_440 = arith.constant dense<0.000000e+00> : vector<4x8xf32>
    %410 = tpu.matmul %407, %409, %cst_440 {dimension_numbers = #tpu.dot_dimension_numbers<[1], [0], [0], [1], [0, 0, 1, 1], [], []>} : vector<4x8xbf16>, vector<8x8xbf16>, vector<4x8xf32> -> vector<4x8xf32>
    %411 = arith.addf %405, %410 : vector<4x8xf32>
    %c3_441 = arith.constant 3 : index
    %c1_442 = arith.constant 1 : index
    %c0_443 = arith.constant 0 : index
    %412 = vector.load %arg7[%c3_441, %c1_442, %c0_443] : memref<6x6x8xbf16, #tpu.memory_space<vmem>>, vector<1x4x8xbf16>
    %413 = vector.shape_cast %412 : vector<1x4x8xbf16> to vector<4x8xbf16>
    %c7_444 = arith.constant 7 : index
    %c0_445 = arith.constant 0 : index
    %c0_446 = arith.constant 0 : index
    %414 = vector.load %arg4[%c7_444, %c0_445, %c0_446] : memref<9x8x8xbf16, #tpu.memory_space<vmem>>, vector<1x8x8xbf16>
    %415 = vector.shape_cast %414 : vector<1x8x8xbf16> to vector<8x8xbf16>
    %cst_447 = arith.constant dense<0.000000e+00> : vector<4x8xf32>
    %416 = tpu.matmul %413, %415, %cst_447 {dimension_numbers = #tpu.dot_dimension_numbers<[1], [0], [0], [1], [0, 0, 1, 1], [], []>} : vector<4x8xbf16>, vector<8x8xbf16>, vector<4x8xf32> -> vector<4x8xf32>
    %417 = arith.addf %411, %416 : vector<4x8xf32>
    %c3_448 = arith.constant 3 : index
    %c2_449 = arith.constant 2 : index
    %c0_450 = arith.constant 0 : index
    %418 = vector.load %arg7[%c3_448, %c2_449, %c0_450] : memref<6x6x8xbf16, #tpu.memory_space<vmem>>, vector<1x4x8xbf16>
    %419 = vector.shape_cast %418 : vector<1x4x8xbf16> to vector<4x8xbf16>
    %c8_451 = arith.constant 8 : index
    %c0_452 = arith.constant 0 : index
    %c0_453 = arith.constant 0 : index
    %420 = vector.load %arg4[%c8_451, %c0_452, %c0_453] : memref<9x8x8xbf16, #tpu.memory_space<vmem>>, vector<1x8x8xbf16>
    %421 = vector.shape_cast %420 : vector<1x8x8xbf16> to vector<8x8xbf16>
    %cst_454 = arith.constant dense<0.000000e+00> : vector<4x8xf32>
    %422 = tpu.matmul %419, %421, %cst_454 {dimension_numbers = #tpu.dot_dimension_numbers<[1], [0], [0], [1], [0, 0, 1, 1], [], []>} : vector<4x8xbf16>, vector<8x8xbf16>, vector<4x8xf32> -> vector<4x8xf32>
    %423 = arith.addf %417, %422 : vector<4x8xf32>
    %c0_455 = arith.constant 0 : index
    %c0_456 = arith.constant 0 : index
    %424 = vector.load %arg5[%c0_455, %c0_456] : memref<1x8xf32, #tpu.memory_space<vmem>>, vector<1x8xf32>
    %425 = vector.broadcast %424 : vector<1x8xf32> to vector<4x8xf32>
    %426 = arith.addf %423, %425 : vector<4x8xf32>
    %427 = arith.addf %426, %368 : vector<4x8xf32>
    %cst_457 = arith.constant 0.000000e+00 : f32
    %428 = vector.broadcast %cst_457 : f32 to vector<4x8xf32>
    %429 = arith.maximumf %427, %428 : vector<4x8xf32>
    %cst_458 = arith.constant dense<0.000000e+00> : vector<8xf32>
    %430 = vector.multi_reduction <add>, %429, %cst_458 [0] : vector<4x8xf32> to vector<8xf32>
    %431 = vector.shape_cast %430 : vector<8xf32> to vector<1x8xf32>
    %432 = arith.addf %366, %431 : vector<1x8xf32>
    %433 = vector.extract_strided_slice %25 {offsets = [8, 0], sizes = [4, 8], strides = [1, 1]} : vector<16x8xbf16> to vector<4x8xbf16>
    %434 = arith.extf %433 : vector<4x8xbf16> to vector<4x8xf32>
    %cst_459 = arith.constant 0.000000e+00 : f32
    %435 = vector.broadcast %cst_459 : f32 to vector<4x8xf32>
    %c2_460 = arith.constant 2 : index
    %c0_461 = arith.constant 0 : index
    %c0_462 = arith.constant 0 : index
    %436 = vector.load %arg7[%c2_460, %c0_461, %c0_462] : memref<6x6x8xbf16, #tpu.memory_space<vmem>>, vector<1x4x8xbf16>
    %437 = vector.shape_cast %436 : vector<1x4x8xbf16> to vector<4x8xbf16>
    %c0_463 = arith.constant 0 : index
    %c0_464 = arith.constant 0 : index
    %c0_465 = arith.constant 0 : index
    %438 = vector.load %arg4[%c0_463, %c0_464, %c0_465] : memref<9x8x8xbf16, #tpu.memory_space<vmem>>, vector<1x8x8xbf16>
    %439 = vector.shape_cast %438 : vector<1x8x8xbf16> to vector<8x8xbf16>
    %cst_466 = arith.constant dense<0.000000e+00> : vector<4x8xf32>
    %440 = tpu.matmul %437, %439, %cst_466 {dimension_numbers = #tpu.dot_dimension_numbers<[1], [0], [0], [1], [0, 0, 1, 1], [], []>} : vector<4x8xbf16>, vector<8x8xbf16>, vector<4x8xf32> -> vector<4x8xf32>
    %441 = arith.addf %435, %440 : vector<4x8xf32>
    %c2_467 = arith.constant 2 : index
    %c1_468 = arith.constant 1 : index
    %c0_469 = arith.constant 0 : index
    %442 = vector.load %arg7[%c2_467, %c1_468, %c0_469] : memref<6x6x8xbf16, #tpu.memory_space<vmem>>, vector<1x4x8xbf16>
    %443 = vector.shape_cast %442 : vector<1x4x8xbf16> to vector<4x8xbf16>
    %c1_470 = arith.constant 1 : index
    %c0_471 = arith.constant 0 : index
    %c0_472 = arith.constant 0 : index
    %444 = vector.load %arg4[%c1_470, %c0_471, %c0_472] : memref<9x8x8xbf16, #tpu.memory_space<vmem>>, vector<1x8x8xbf16>
    %445 = vector.shape_cast %444 : vector<1x8x8xbf16> to vector<8x8xbf16>
    %cst_473 = arith.constant dense<0.000000e+00> : vector<4x8xf32>
    %446 = tpu.matmul %443, %445, %cst_473 {dimension_numbers = #tpu.dot_dimension_numbers<[1], [0], [0], [1], [0, 0, 1, 1], [], []>} : vector<4x8xbf16>, vector<8x8xbf16>, vector<4x8xf32> -> vector<4x8xf32>
    %447 = arith.addf %441, %446 : vector<4x8xf32>
    %c2_474 = arith.constant 2 : index
    %c2_475 = arith.constant 2 : index
    %c0_476 = arith.constant 0 : index
    %448 = vector.load %arg7[%c2_474, %c2_475, %c0_476] : memref<6x6x8xbf16, #tpu.memory_space<vmem>>, vector<1x4x8xbf16>
    %449 = vector.shape_cast %448 : vector<1x4x8xbf16> to vector<4x8xbf16>
    %c2_477 = arith.constant 2 : index
    %c0_478 = arith.constant 0 : index
    %c0_479 = arith.constant 0 : index
    %450 = vector.load %arg4[%c2_477, %c0_478, %c0_479] : memref<9x8x8xbf16, #tpu.memory_space<vmem>>, vector<1x8x8xbf16>
    %451 = vector.shape_cast %450 : vector<1x8x8xbf16> to vector<8x8xbf16>
    %cst_480 = arith.constant dense<0.000000e+00> : vector<4x8xf32>
    %452 = tpu.matmul %449, %451, %cst_480 {dimension_numbers = #tpu.dot_dimension_numbers<[1], [0], [0], [1], [0, 0, 1, 1], [], []>} : vector<4x8xbf16>, vector<8x8xbf16>, vector<4x8xf32> -> vector<4x8xf32>
    %453 = arith.addf %447, %452 : vector<4x8xf32>
    %c3_481 = arith.constant 3 : index
    %c0_482 = arith.constant 0 : index
    %c0_483 = arith.constant 0 : index
    %454 = vector.load %arg7[%c3_481, %c0_482, %c0_483] : memref<6x6x8xbf16, #tpu.memory_space<vmem>>, vector<1x4x8xbf16>
    %455 = vector.shape_cast %454 : vector<1x4x8xbf16> to vector<4x8xbf16>
    %c3_484 = arith.constant 3 : index
    %c0_485 = arith.constant 0 : index
    %c0_486 = arith.constant 0 : index
    %456 = vector.load %arg4[%c3_484, %c0_485, %c0_486] : memref<9x8x8xbf16, #tpu.memory_space<vmem>>, vector<1x8x8xbf16>
    %457 = vector.shape_cast %456 : vector<1x8x8xbf16> to vector<8x8xbf16>
    %cst_487 = arith.constant dense<0.000000e+00> : vector<4x8xf32>
    %458 = tpu.matmul %455, %457, %cst_487 {dimension_numbers = #tpu.dot_dimension_numbers<[1], [0], [0], [1], [0, 0, 1, 1], [], []>} : vector<4x8xbf16>, vector<8x8xbf16>, vector<4x8xf32> -> vector<4x8xf32>
    %459 = arith.addf %453, %458 : vector<4x8xf32>
    %c3_488 = arith.constant 3 : index
    %c1_489 = arith.constant 1 : index
    %c0_490 = arith.constant 0 : index
    %460 = vector.load %arg7[%c3_488, %c1_489, %c0_490] : memref<6x6x8xbf16, #tpu.memory_space<vmem>>, vector<1x4x8xbf16>
    %461 = vector.shape_cast %460 : vector<1x4x8xbf16> to vector<4x8xbf16>
    %c4_491 = arith.constant 4 : index
    %c0_492 = arith.constant 0 : index
    %c0_493 = arith.constant 0 : index
    %462 = vector.load %arg4[%c4_491, %c0_492, %c0_493] : memref<9x8x8xbf16, #tpu.memory_space<vmem>>, vector<1x8x8xbf16>
    %463 = vector.shape_cast %462 : vector<1x8x8xbf16> to vector<8x8xbf16>
    %cst_494 = arith.constant dense<0.000000e+00> : vector<4x8xf32>
    %464 = tpu.matmul %461, %463, %cst_494 {dimension_numbers = #tpu.dot_dimension_numbers<[1], [0], [0], [1], [0, 0, 1, 1], [], []>} : vector<4x8xbf16>, vector<8x8xbf16>, vector<4x8xf32> -> vector<4x8xf32>
    %465 = arith.addf %459, %464 : vector<4x8xf32>
    %c3_495 = arith.constant 3 : index
    %c2_496 = arith.constant 2 : index
    %c0_497 = arith.constant 0 : index
    %466 = vector.load %arg7[%c3_495, %c2_496, %c0_497] : memref<6x6x8xbf16, #tpu.memory_space<vmem>>, vector<1x4x8xbf16>
    %467 = vector.shape_cast %466 : vector<1x4x8xbf16> to vector<4x8xbf16>
    %c5_498 = arith.constant 5 : index
    %c0_499 = arith.constant 0 : index
    %c0_500 = arith.constant 0 : index
    %468 = vector.load %arg4[%c5_498, %c0_499, %c0_500] : memref<9x8x8xbf16, #tpu.memory_space<vmem>>, vector<1x8x8xbf16>
    %469 = vector.shape_cast %468 : vector<1x8x8xbf16> to vector<8x8xbf16>
    %cst_501 = arith.constant dense<0.000000e+00> : vector<4x8xf32>
    %470 = tpu.matmul %467, %469, %cst_501 {dimension_numbers = #tpu.dot_dimension_numbers<[1], [0], [0], [1], [0, 0, 1, 1], [], []>} : vector<4x8xbf16>, vector<8x8xbf16>, vector<4x8xf32> -> vector<4x8xf32>
    %471 = arith.addf %465, %470 : vector<4x8xf32>
    %c4_502 = arith.constant 4 : index
    %c0_503 = arith.constant 0 : index
    %c0_504 = arith.constant 0 : index
    %472 = vector.load %arg7[%c4_502, %c0_503, %c0_504] : memref<6x6x8xbf16, #tpu.memory_space<vmem>>, vector<1x4x8xbf16>
    %473 = vector.shape_cast %472 : vector<1x4x8xbf16> to vector<4x8xbf16>
    %c6_505 = arith.constant 6 : index
    %c0_506 = arith.constant 0 : index
    %c0_507 = arith.constant 0 : index
    %474 = vector.load %arg4[%c6_505, %c0_506, %c0_507] : memref<9x8x8xbf16, #tpu.memory_space<vmem>>, vector<1x8x8xbf16>
    %475 = vector.shape_cast %474 : vector<1x8x8xbf16> to vector<8x8xbf16>
    %cst_508 = arith.constant dense<0.000000e+00> : vector<4x8xf32>
    %476 = tpu.matmul %473, %475, %cst_508 {dimension_numbers = #tpu.dot_dimension_numbers<[1], [0], [0], [1], [0, 0, 1, 1], [], []>} : vector<4x8xbf16>, vector<8x8xbf16>, vector<4x8xf32> -> vector<4x8xf32>
    %477 = arith.addf %471, %476 : vector<4x8xf32>
    %c4_509 = arith.constant 4 : index
    %c1_510 = arith.constant 1 : index
    %c0_511 = arith.constant 0 : index
    %478 = vector.load %arg7[%c4_509, %c1_510, %c0_511] : memref<6x6x8xbf16, #tpu.memory_space<vmem>>, vector<1x4x8xbf16>
    %479 = vector.shape_cast %478 : vector<1x4x8xbf16> to vector<4x8xbf16>
    %c7_512 = arith.constant 7 : index
    %c0_513 = arith.constant 0 : index
    %c0_514 = arith.constant 0 : index
    %480 = vector.load %arg4[%c7_512, %c0_513, %c0_514] : memref<9x8x8xbf16, #tpu.memory_space<vmem>>, vector<1x8x8xbf16>
    %481 = vector.shape_cast %480 : vector<1x8x8xbf16> to vector<8x8xbf16>
    %cst_515 = arith.constant dense<0.000000e+00> : vector<4x8xf32>
    %482 = tpu.matmul %479, %481, %cst_515 {dimension_numbers = #tpu.dot_dimension_numbers<[1], [0], [0], [1], [0, 0, 1, 1], [], []>} : vector<4x8xbf16>, vector<8x8xbf16>, vector<4x8xf32> -> vector<4x8xf32>
    %483 = arith.addf %477, %482 : vector<4x8xf32>
    %c4_516 = arith.constant 4 : index
    %c2_517 = arith.constant 2 : index
    %c0_518 = arith.constant 0 : index
    %484 = vector.load %arg7[%c4_516, %c2_517, %c0_518] : memref<6x6x8xbf16, #tpu.memory_space<vmem>>, vector<1x4x8xbf16>
    %485 = vector.shape_cast %484 : vector<1x4x8xbf16> to vector<4x8xbf16>
    %c8_519 = arith.constant 8 : index
    %c0_520 = arith.constant 0 : index
    %c0_521 = arith.constant 0 : index
    %486 = vector.load %arg4[%c8_519, %c0_520, %c0_521] : memref<9x8x8xbf16, #tpu.memory_space<vmem>>, vector<1x8x8xbf16>
    %487 = vector.shape_cast %486 : vector<1x8x8xbf16> to vector<8x8xbf16>
    %cst_522 = arith.constant dense<0.000000e+00> : vector<4x8xf32>
    %488 = tpu.matmul %485, %487, %cst_522 {dimension_numbers = #tpu.dot_dimension_numbers<[1], [0], [0], [1], [0, 0, 1, 1], [], []>} : vector<4x8xbf16>, vector<8x8xbf16>, vector<4x8xf32> -> vector<4x8xf32>
    %489 = arith.addf %483, %488 : vector<4x8xf32>
    %c0_523 = arith.constant 0 : index
    %c0_524 = arith.constant 0 : index
    %490 = vector.load %arg5[%c0_523, %c0_524] : memref<1x8xf32, #tpu.memory_space<vmem>>, vector<1x8xf32>
    %491 = vector.broadcast %490 : vector<1x8xf32> to vector<4x8xf32>
    %492 = arith.addf %489, %491 : vector<4x8xf32>
    %493 = arith.addf %492, %434 : vector<4x8xf32>
    %cst_525 = arith.constant 0.000000e+00 : f32
    %494 = vector.broadcast %cst_525 : f32 to vector<4x8xf32>
    %495 = arith.maximumf %493, %494 : vector<4x8xf32>
    %cst_526 = arith.constant dense<0.000000e+00> : vector<8xf32>
    %496 = vector.multi_reduction <add>, %495, %cst_526 [0] : vector<4x8xf32> to vector<8xf32>
    %497 = vector.shape_cast %496 : vector<8xf32> to vector<1x8xf32>
    %498 = arith.addf %432, %497 : vector<1x8xf32>
    %499 = vector.extract_strided_slice %25 {offsets = [12, 0], sizes = [4, 8], strides = [1, 1]} : vector<16x8xbf16> to vector<4x8xbf16>
    %500 = arith.extf %499 : vector<4x8xbf16> to vector<4x8xf32>
    %cst_527 = arith.constant 0.000000e+00 : f32
    %501 = vector.broadcast %cst_527 : f32 to vector<4x8xf32>
    %c3_528 = arith.constant 3 : index
    %c0_529 = arith.constant 0 : index
    %c0_530 = arith.constant 0 : index
    %502 = vector.load %arg7[%c3_528, %c0_529, %c0_530] : memref<6x6x8xbf16, #tpu.memory_space<vmem>>, vector<1x4x8xbf16>
    %503 = vector.shape_cast %502 : vector<1x4x8xbf16> to vector<4x8xbf16>
    %c0_531 = arith.constant 0 : index
    %c0_532 = arith.constant 0 : index
    %c0_533 = arith.constant 0 : index
    %504 = vector.load %arg4[%c0_531, %c0_532, %c0_533] : memref<9x8x8xbf16, #tpu.memory_space<vmem>>, vector<1x8x8xbf16>
    %505 = vector.shape_cast %504 : vector<1x8x8xbf16> to vector<8x8xbf16>
    %cst_534 = arith.constant dense<0.000000e+00> : vector<4x8xf32>
    %506 = tpu.matmul %503, %505, %cst_534 {dimension_numbers = #tpu.dot_dimension_numbers<[1], [0], [0], [1], [0, 0, 1, 1], [], []>} : vector<4x8xbf16>, vector<8x8xbf16>, vector<4x8xf32> -> vector<4x8xf32>
    %507 = arith.addf %501, %506 : vector<4x8xf32>
    %c3_535 = arith.constant 3 : index
    %c1_536 = arith.constant 1 : index
    %c0_537 = arith.constant 0 : index
    %508 = vector.load %arg7[%c3_535, %c1_536, %c0_537] : memref<6x6x8xbf16, #tpu.memory_space<vmem>>, vector<1x4x8xbf16>
    %509 = vector.shape_cast %508 : vector<1x4x8xbf16> to vector<4x8xbf16>
    %c1_538 = arith.constant 1 : index
    %c0_539 = arith.constant 0 : index
    %c0_540 = arith.constant 0 : index
    %510 = vector.load %arg4[%c1_538, %c0_539, %c0_540] : memref<9x8x8xbf16, #tpu.memory_space<vmem>>, vector<1x8x8xbf16>
    %511 = vector.shape_cast %510 : vector<1x8x8xbf16> to vector<8x8xbf16>
    %cst_541 = arith.constant dense<0.000000e+00> : vector<4x8xf32>
    %512 = tpu.matmul %509, %511, %cst_541 {dimension_numbers = #tpu.dot_dimension_numbers<[1], [0], [0], [1], [0, 0, 1, 1], [], []>} : vector<4x8xbf16>, vector<8x8xbf16>, vector<4x8xf32> -> vector<4x8xf32>
    %513 = arith.addf %507, %512 : vector<4x8xf32>
    %c3_542 = arith.constant 3 : index
    %c2_543 = arith.constant 2 : index
    %c0_544 = arith.constant 0 : index
    %514 = vector.load %arg7[%c3_542, %c2_543, %c0_544] : memref<6x6x8xbf16, #tpu.memory_space<vmem>>, vector<1x4x8xbf16>
    %515 = vector.shape_cast %514 : vector<1x4x8xbf16> to vector<4x8xbf16>
    %c2_545 = arith.constant 2 : index
    %c0_546 = arith.constant 0 : index
    %c0_547 = arith.constant 0 : index
    %516 = vector.load %arg4[%c2_545, %c0_546, %c0_547] : memref<9x8x8xbf16, #tpu.memory_space<vmem>>, vector<1x8x8xbf16>
    %517 = vector.shape_cast %516 : vector<1x8x8xbf16> to vector<8x8xbf16>
    %cst_548 = arith.constant dense<0.000000e+00> : vector<4x8xf32>
    %518 = tpu.matmul %515, %517, %cst_548 {dimension_numbers = #tpu.dot_dimension_numbers<[1], [0], [0], [1], [0, 0, 1, 1], [], []>} : vector<4x8xbf16>, vector<8x8xbf16>, vector<4x8xf32> -> vector<4x8xf32>
    %519 = arith.addf %513, %518 : vector<4x8xf32>
    %c4_549 = arith.constant 4 : index
    %c0_550 = arith.constant 0 : index
    %c0_551 = arith.constant 0 : index
    %520 = vector.load %arg7[%c4_549, %c0_550, %c0_551] : memref<6x6x8xbf16, #tpu.memory_space<vmem>>, vector<1x4x8xbf16>
    %521 = vector.shape_cast %520 : vector<1x4x8xbf16> to vector<4x8xbf16>
    %c3_552 = arith.constant 3 : index
    %c0_553 = arith.constant 0 : index
    %c0_554 = arith.constant 0 : index
    %522 = vector.load %arg4[%c3_552, %c0_553, %c0_554] : memref<9x8x8xbf16, #tpu.memory_space<vmem>>, vector<1x8x8xbf16>
    %523 = vector.shape_cast %522 : vector<1x8x8xbf16> to vector<8x8xbf16>
    %cst_555 = arith.constant dense<0.000000e+00> : vector<4x8xf32>
    %524 = tpu.matmul %521, %523, %cst_555 {dimension_numbers = #tpu.dot_dimension_numbers<[1], [0], [0], [1], [0, 0, 1, 1], [], []>} : vector<4x8xbf16>, vector<8x8xbf16>, vector<4x8xf32> -> vector<4x8xf32>
    %525 = arith.addf %519, %524 : vector<4x8xf32>
    %c4_556 = arith.constant 4 : index
    %c1_557 = arith.constant 1 : index
    %c0_558 = arith.constant 0 : index
    %526 = vector.load %arg7[%c4_556, %c1_557, %c0_558] : memref<6x6x8xbf16, #tpu.memory_space<vmem>>, vector<1x4x8xbf16>
    %527 = vector.shape_cast %526 : vector<1x4x8xbf16> to vector<4x8xbf16>
    %c4_559 = arith.constant 4 : index
    %c0_560 = arith.constant 0 : index
    %c0_561 = arith.constant 0 : index
    %528 = vector.load %arg4[%c4_559, %c0_560, %c0_561] : memref<9x8x8xbf16, #tpu.memory_space<vmem>>, vector<1x8x8xbf16>
    %529 = vector.shape_cast %528 : vector<1x8x8xbf16> to vector<8x8xbf16>
    %cst_562 = arith.constant dense<0.000000e+00> : vector<4x8xf32>
    %530 = tpu.matmul %527, %529, %cst_562 {dimension_numbers = #tpu.dot_dimension_numbers<[1], [0], [0], [1], [0, 0, 1, 1], [], []>} : vector<4x8xbf16>, vector<8x8xbf16>, vector<4x8xf32> -> vector<4x8xf32>
    %531 = arith.addf %525, %530 : vector<4x8xf32>
    %c4_563 = arith.constant 4 : index
    %c2_564 = arith.constant 2 : index
    %c0_565 = arith.constant 0 : index
    %532 = vector.load %arg7[%c4_563, %c2_564, %c0_565] : memref<6x6x8xbf16, #tpu.memory_space<vmem>>, vector<1x4x8xbf16>
    %533 = vector.shape_cast %532 : vector<1x4x8xbf16> to vector<4x8xbf16>
    %c5_566 = arith.constant 5 : index
    %c0_567 = arith.constant 0 : index
    %c0_568 = arith.constant 0 : index
    %534 = vector.load %arg4[%c5_566, %c0_567, %c0_568] : memref<9x8x8xbf16, #tpu.memory_space<vmem>>, vector<1x8x8xbf16>
    %535 = vector.shape_cast %534 : vector<1x8x8xbf16> to vector<8x8xbf16>
    %cst_569 = arith.constant dense<0.000000e+00> : vector<4x8xf32>
    %536 = tpu.matmul %533, %535, %cst_569 {dimension_numbers = #tpu.dot_dimension_numbers<[1], [0], [0], [1], [0, 0, 1, 1], [], []>} : vector<4x8xbf16>, vector<8x8xbf16>, vector<4x8xf32> -> vector<4x8xf32>
    %537 = arith.addf %531, %536 : vector<4x8xf32>
    %c5_570 = arith.constant 5 : index
    %c0_571 = arith.constant 0 : index
    %c0_572 = arith.constant 0 : index
    %538 = vector.load %arg7[%c5_570, %c0_571, %c0_572] : memref<6x6x8xbf16, #tpu.memory_space<vmem>>, vector<1x4x8xbf16>
    %539 = vector.shape_cast %538 : vector<1x4x8xbf16> to vector<4x8xbf16>
    %c6_573 = arith.constant 6 : index
    %c0_574 = arith.constant 0 : index
    %c0_575 = arith.constant 0 : index
    %540 = vector.load %arg4[%c6_573, %c0_574, %c0_575] : memref<9x8x8xbf16, #tpu.memory_space<vmem>>, vector<1x8x8xbf16>
    %541 = vector.shape_cast %540 : vector<1x8x8xbf16> to vector<8x8xbf16>
    %cst_576 = arith.constant dense<0.000000e+00> : vector<4x8xf32>
    %542 = tpu.matmul %539, %541, %cst_576 {dimension_numbers = #tpu.dot_dimension_numbers<[1], [0], [0], [1], [0, 0, 1, 1], [], []>} : vector<4x8xbf16>, vector<8x8xbf16>, vector<4x8xf32> -> vector<4x8xf32>
    %543 = arith.addf %537, %542 : vector<4x8xf32>
    %c5_577 = arith.constant 5 : index
    %c1_578 = arith.constant 1 : index
    %c0_579 = arith.constant 0 : index
    %544 = vector.load %arg7[%c5_577, %c1_578, %c0_579] : memref<6x6x8xbf16, #tpu.memory_space<vmem>>, vector<1x4x8xbf16>
    %545 = vector.shape_cast %544 : vector<1x4x8xbf16> to vector<4x8xbf16>
    %c7_580 = arith.constant 7 : index
    %c0_581 = arith.constant 0 : index
    %c0_582 = arith.constant 0 : index
    %546 = vector.load %arg4[%c7_580, %c0_581, %c0_582] : memref<9x8x8xbf16, #tpu.memory_space<vmem>>, vector<1x8x8xbf16>
    %547 = vector.shape_cast %546 : vector<1x8x8xbf16> to vector<8x8xbf16>
    %cst_583 = arith.constant dense<0.000000e+00> : vector<4x8xf32>
    %548 = tpu.matmul %545, %547, %cst_583 {dimension_numbers = #tpu.dot_dimension_numbers<[1], [0], [0], [1], [0, 0, 1, 1], [], []>} : vector<4x8xbf16>, vector<8x8xbf16>, vector<4x8xf32> -> vector<4x8xf32>
    %549 = arith.addf %543, %548 : vector<4x8xf32>
    %c5_584 = arith.constant 5 : index
    %c2_585 = arith.constant 2 : index
    %c0_586 = arith.constant 0 : index
    %550 = vector.load %arg7[%c5_584, %c2_585, %c0_586] : memref<6x6x8xbf16, #tpu.memory_space<vmem>>, vector<1x4x8xbf16>
    %551 = vector.shape_cast %550 : vector<1x4x8xbf16> to vector<4x8xbf16>
    %c8_587 = arith.constant 8 : index
    %c0_588 = arith.constant 0 : index
    %c0_589 = arith.constant 0 : index
    %552 = vector.load %arg4[%c8_587, %c0_588, %c0_589] : memref<9x8x8xbf16, #tpu.memory_space<vmem>>, vector<1x8x8xbf16>
    %553 = vector.shape_cast %552 : vector<1x8x8xbf16> to vector<8x8xbf16>
    %cst_590 = arith.constant dense<0.000000e+00> : vector<4x8xf32>
    %554 = tpu.matmul %551, %553, %cst_590 {dimension_numbers = #tpu.dot_dimension_numbers<[1], [0], [0], [1], [0, 0, 1, 1], [], []>} : vector<4x8xbf16>, vector<8x8xbf16>, vector<4x8xf32> -> vector<4x8xf32>
    %555 = arith.addf %549, %554 : vector<4x8xf32>
    %c0_591 = arith.constant 0 : index
    %c0_592 = arith.constant 0 : index
    %556 = vector.load %arg5[%c0_591, %c0_592] : memref<1x8xf32, #tpu.memory_space<vmem>>, vector<1x8xf32>
    %557 = vector.broadcast %556 : vector<1x8xf32> to vector<4x8xf32>
    %558 = arith.addf %555, %557 : vector<4x8xf32>
    %559 = arith.addf %558, %500 : vector<4x8xf32>
    %cst_593 = arith.constant 0.000000e+00 : f32
    %560 = vector.broadcast %cst_593 : f32 to vector<4x8xf32>
    %561 = arith.maximumf %559, %560 : vector<4x8xf32>
    %cst_594 = arith.constant dense<0.000000e+00> : vector<8xf32>
    %562 = vector.multi_reduction <add>, %561, %cst_594 [0] : vector<4x8xf32> to vector<8xf32>
    %563 = vector.shape_cast %562 : vector<8xf32> to vector<1x8xf32>
    %564 = arith.addf %498, %563 : vector<1x8xf32>
    %cst_595 = arith.constant 6.250000e-02 : f32
    %565 = vector.broadcast %cst_595 : f32 to vector<1x8xf32>
    %566 = arith.mulf %564, %565 : vector<1x8xf32>
    %567 = vector.shape_cast %566 : vector<1x8xf32> to vector<1x1x8xf32>
    %c0_596 = arith.constant 0 : index
    %c0_597 = arith.constant 0 : index
    %c0_598 = arith.constant 0 : index
    %568 = vector.load %arg6[%c0_596, %c0_597, %c0_598] : memref<1x1x8xf32, #tpu.memory_space<vmem>>, vector<1x1x8xf32>
    tpu.vector_store %arg6[%c0_596, %c0_597, %c0_598], %567 {strides = array<i32>} : memref<1x1x8xf32, #tpu.memory_space<vmem>>, vector<1x1x8xf32>,
    return
  }
  func.func @transform_0(%arg0: i32) -> (i32, i32, i32, i32) {
    %c0_i32 = arith.constant 0 : i32
    %c0_i32_0 = arith.constant 0 : i32
    %c0_i32_1 = arith.constant 0 : i32
    %c0_i32_2 = arith.constant 0 : i32
    return %arg0, %c0_i32, %c0_i32_0, %c0_i32_1 : i32, i32, i32, i32
  }
  func.func @transform_1(%arg0: i32) -> (i32, i32, i32) {
    %c0_i32 = arith.constant 0 : i32
    %c0_i32_0 = arith.constant 0 : i32
    %c0_i32_1 = arith.constant 0 : i32
    %c0_i32_2 = arith.constant 0 : i32
    return %c0_i32, %c0_i32_0, %c0_i32_1 : i32, i32, i32
  }
  func.func @transform_2(%arg0: i32) -> (i32, i32) {
    %c0_i32 = arith.constant 0 : i32
    %c0_i32_0 = arith.constant 0 : i32
    %c0_i32_1 = arith.constant 0 : i32
    return %c0_i32, %c0_i32_0 : i32, i32
  }
  func.func @transform_3(%arg0: i32) -> (i32, i32, i32) {
    %c0_i32 = arith.constant 0 : i32
    %c0_i32_0 = arith.constant 0 : i32
    %c0_i32_1 = arith.constant 0 : i32
    %c0_i32_2 = arith.constant 0 : i32
    return %c0_i32, %c0_i32_0, %c0_i32_1 : i32, i32, i32
  }
  func.func @transform_4(%arg0: i32) -> (i32, i32) {
    %c0_i32 = arith.constant 0 : i32
    %c0_i32_0 = arith.constant 0 : i32
    %c0_i32_1 = arith.constant 0 : i32
    return %c0_i32, %c0_i32_0 : i32, i32
  }
  func.func @transform_5(%arg0: i32) -> (i32, i32, i32) {
    %c0_i32 = arith.constant 0 : i32
    %c0_i32_0 = arith.constant 0 : i32
    %c0_i32_1 = arith.constant 0 : i32
    return %arg0, %c0_i32, %c0_i32_0 : i32, i32, i32
  }
}

</mosaic_0001>

<bundles_post_ra>
// kernel: resnet_feat_forward.2
= control target key start
LH: loop header
LB: loop body
LE: loop exit
PB: predicated region body
PF: predicated region fallthrough
CT: control target
= control target key end

     0   :  { %vm423_vm0 = vcmask 60416   ;;  %s830_s1 = inlined_call_operand.vmem [shape: bf16[256,8], index: 1, kind: input, shape index: {}]   ;;  %s831_s0 = inlined_call_operand.vmem [shape: bf16[128,256], index: 0, kind: input, shape index: {}]   ;;  %s832_s2 = inlined_call_operand.vmem [shape: f32[1,8], index: 2, kind: input, shape index: {}]   ;;  %s833_s3 = inlined_call_operand.vmem [shape: bf16[128,8], index: 3, kind: output, shape index: {}]  }
   0x1   :  { %v589_v0 = vld [vmem:[%s830_s1 + $0x40] sm:$0xff]   ;;  %v591_v2 = vld [vmem:[%s830_s1 + $0x48] sm:$0xff]   ;;  %v593_v4 = vld [vmem:[%s830_s1 + $0x50] sm:$0xff]  }
   0x2   :  { %v590_v1 = vld [vmem:[%s830_s1] sm:$0xff]   ;;  %509 = vmatprep.subr.bf16.mxu0 %v589_v0  ;;  %573 = vmatprep.subr.bf16.mxu1 %v589_v0  ;;  %v592_v3 = vld [vmem:[%s830_s1 + $0x8] sm:$0xff]   ;;  %v594_v5 = vld [vmem:[%s830_s1 + $0x10] sm:$0xff]  }
   0x3   :  { %510 = vmatpush3.bf16.msra.mxu0 %v590_v1  ;;  %581 = vmatpush3.bf16.msra.mxu1 %v590_v1  ;;  %v595_v6 = vld [vmem:[%s830_s1 + $0x58] sm:$0xff]   ;;  %v597_v8 = vld [vmem:[%s830_s1 + $0x60] sm:$0xff]   ;;  %v599_v10 = vld [vmem:[%s830_s1 + $0x68] sm:$0xff]  }
   0x4   :  { %511 = vmatprep.subr.bf16.mxu0 %v591_v2  ;;  %574 = vmatprep.subr.bf16.mxu1 %v591_v2  ;;  %v596_v7 = vld [vmem:[%s830_s1 + $0x18] sm:$0xff]   ;;  %v598_v9 = vld [vmem:[%s830_s1 + $0x20] sm:$0xff]   ;;  %v600_v13 = vld [vmem:[%s830_s1 + $0x28] sm:$0xff]  }
   0x5   :  { %v607_v11 = vld [vmem:[%s831_s0 + $0x4] ss:$8 sps:$4 sm:$0xff]   ;;  %v601_v14 = vld [vmem:[%s830_s1 + $0x70] sm:$0xff]   ;;  %v603_v16 = vld [vmem:[%s830_s1 + $0x78] sm:$0xff]  }
   0x6   :  { %v610_v12 = vld [vmem:[%s831_s0 + $0x44] ss:$8 sps:$4 sm:$0xff]   ;;  %278 = vmatprep.mubr.bf16.mxu0 %v607_v11  ;;  %v602_v15 = vld [vmem:[%s830_s1 + $0x30] sm:$0xff]   ;;  %v604_v17 = vld [vmem:[%s830_s1 + $0x38] sm:$0xff]  }
   0x7   :  { %512 = vmatpush3.bf16.msra.mxu0 %v592_v3  ;;  %582 = vmatpush3.bf16.msra.mxu1 %v592_v3  ;;  %v605_v18 = vld [vmem:[%s831_s0] ss:$8 sps:$4 sm:$0xff]   ;;  %v611_v20 = vld [vmem:[%s831_s0 + $0x14] ss:$8 sps:$4 sm:$0xff]   ;;  %v615_v22 = vld [vmem:[%s831_s0 + $0x10] ss:$8 sps:$4 sm:$0xff]  }
   0x8   :  { %513 = vmatprep.subr.bf16.mxu0 %v593_v4  ;;  %575 = vmatprep.subr.bf16.mxu1 %v593_v4  ;;  %v608_v19 = vld [vmem:[%s831_s0 + $0x40] ss:$8 sps:$4 sm:$0xff]   ;;  %v613_v21 = vld [vmem:[%s831_s0 + $0x54] ss:$8 sps:$4 sm:$0xff]   ;;  %v616_v23 = vld [vmem:[%s831_s0 + $0x50] ss:$8 sps:$4 sm:$0xff]  }
   0x9   :  { %310 = vmatprep.mubr.bf16.mxu1 %v610_v12  ;;  %v617_v24 = vld [vmem:[%s831_s0 + $0x24] ss:$8 sps:$4 sm:$0xff]   ;;  %v621_v26 = vld [vmem:[%s831_s0 + $0x20] ss:$8 sps:$4 sm:$0xff]   ;;  %v623_v28 = vld [vmem:[%s831_s0 + $0x34] ss:$8 sps:$4 sm:$0xff]  }
   0xa   :  { %v619_v25 = vld [vmem:[%s831_s0 + $0x64] ss:$8 sps:$4 sm:$0xff]   ;;  %v622_v27 = vld [vmem:[%s831_s0 + $0x60] ss:$8 sps:$4 sm:$0xff]   ;;  %v625_v29 = vld [vmem:[%s831_s0 + $0x74] ss:$8 sps:$4 sm:$0xff]  }
   0xb   :  { %514 = vmatpush3.bf16.msra.mxu0 %v594_v5  ;;  %583 = vmatpush3.bf16.msra.mxu1 %v594_v5  ;;  %v627_v30 = vld [vmem:[%s831_s0 + $0x30] ss:$8 sps:$4 sm:$0xff]   ;;  %v748_v34 = vld [vmem:[%s832_s2] ss:$0 sm:$0xff] }
   0xc   :  { %515 = vmatprep.subr.bf16.mxu0 %v595_v6  ;;  %576 = vmatprep.subr.bf16.mxu1 %v595_v6  ;;  %v628_v31 = vld [vmem:[%s831_s0 + $0x70] ss:$8 sps:$4 sm:$0xff]  }
   0xf   :  { %516 = vmatpush3.bf16.msra.mxu0 %v596_v7  ;;  %584 = vmatpush3.bf16.msra.mxu1 %v596_v7 }
  0x10   :  { %517 = vmatprep.subr.bf16.mxu0 %v597_v8  ;;  %577 = vmatprep.subr.bf16.mxu1 %v597_v8 }
  0x13   :  { %518 = vmatpush3.bf16.msra.mxu0 %v598_v9  ;;  %585 = vmatpush3.bf16.msra.mxu1 %v598_v9 }
  0x14   :  { %519 = vmatprep.subr.bf16.mxu0 %v599_v10  ;;  %578 = vmatprep.subr.bf16.mxu1 %v599_v10 }
  0x17   :  { %520 = vmatpush3.bf16.msra.mxu0 %v600_v13  ;;  %586 = vmatpush3.bf16.msra.mxu1 %v600_v13 }
  0x18   :  { %521 = vmatprep.subr.bf16.mxu0 %v601_v14  ;;  %579 = vmatprep.subr.bf16.mxu1 %v601_v14 }
  0x1b   :  { %522 = vmatpush3.bf16.msra.mxu0 %v602_v15  ;;  %587 = vmatpush3.bf16.msra.mxu1 %v602_v15 }
  0x1c   :  { %523 = vmatprep.subr.bf16.mxu0 %v603_v16  ;;  %580 = vmatprep.subr.bf16.mxu1 %v603_v16 }
  0x1f   :  { %524 = vmatpush3.bf16.msra.mxu0 %v604_v17  ;;  %588 = vmatpush3.bf16.msra.mxu1 %v604_v17 }
  0x22   :  { %279 = vmatmul.mubr.bf16.vlgmr.msra.gmra.mrb[0].mxu0 %v605_v18  ;;  %311 = vmatmul.mubr.bf16.vlgmr.msra.gmra.mrb[0].mxu1 %v608_v19 }
  0x23   :  { %286 = vmatprep.mubr.bf16.mxu0 %v611_v20  ;;  %318 = vmatprep.mubr.bf16.mxu1 %v613_v21 }
  0x2a   :  { %287 = vmatmul.mubr.bf16.gmra.mrb[4].mxu0 %v615_v22  ;;  %319 = vmatmul.mubr.bf16.gmra.mrb[4].mxu1 %v616_v23 }
  0x2b   :  { %294 = vmatprep.mubr.bf16.mxu0 %v617_v24  ;;  %326 = vmatprep.mubr.bf16.mxu1 %v619_v25 }
  0x32   :  { %295 = vmatmul.mubr.bf16.gmra.mrb[8].mxu0 %v621_v26  ;;  %327 = vmatmul.mubr.bf16.gmra.mrb[8].mxu1 %v622_v27 }
  0x33   :  { %302 = vmatprep.mubr.bf16.mxu0 %v623_v28  ;;  %334 = vmatprep.mubr.bf16.mxu1 %v625_v29 }
  0x3a   :  { %303 = vmatmul.mubr.bf16.gmra.mrb[12].mxu0 %v627_v30  ;;  %335 = vmatmul.mubr.bf16.gmra.mrb[12].mxu1 %v628_v31 }
  0xf5   :  { %v525_v32 = vpop.f32.mrb[0].mxu0  ;;  %v549_v33 = vpop.f32.mrb[0].mxu1 }
  0xf6   :  { %v526_v35 = vpop.f32.mrb[1].mxu0  ;;  %v550_v36 = vpop.f32.mrb[1].mxu1 }
  0xf7   :  { %v527_v37 = vadd.f32 %v526_v35, %v525_v32  ;;  %v551_v38 = vadd.f32 %v550_v36, %v549_v33  ;;  %v528_v39 = vpop.f32.mrb[2].mxu0  ;;  %v552_v40 = vpop.f32.mrb[2].mxu1 }
  0xf8   :  { %v529_v41 = vpop.f32.mrb[3].mxu0  ;;  %v553_v42 = vpop.f32.mrb[3].mxu1 }
  0xf9   :  { %v281_v43 = vadd.f32 %v527_v37, %v748_v34  ;;  %v313_v44 = vadd.f32 %v551_v38, %v748_v34  ;;  %v530_v45 = vadd.f32 %v529_v41, %v528_v39  ;;  %v554_v46 = vadd.f32 %v553_v42, %v552_v40 }
  0xfb   :  { %v343_v47 = vmax.f32 %v281_v43, 0.0  ;;  %v351_v48 = vmax.f32 %v313_v44, 0.0  ;;  %v284_v49 = vadd.f32 %v530_v45, %v748_v34  ;;  %v316_v50 = vadd.f32 %v554_v46, %v748_v34 }
  0xfd   :  { %v493_v51 = vpack.c.bf16 %v343_v47, %v343_v47  ;;  %v501_v52 = vpack.c.bf16 %v351_v48, %v351_v48  ;;  %v344_v53 = vmax.f32 %v284_v49, 0.0  ;;  %v352_v54 = vmax.f32 %v316_v50, 0.0  ;;  %v531_v55 = vpop.f32.mrb[4].mxu0  ;;  %v555_v56 = vpop.f32.mrb[4].mxu1 }
  0xfe   :  { %v532_v57 = vpop.f32.mrb[5].mxu0  ;;  %v556_v58 = vpop.f32.mrb[5].mxu1 }
  0xff   :  { %424 = vst.msk [vmem:[%s833_s3] sm:$0xf] %vm423_vm0, %v493_v51  ;;  %432 = vst.msk [vmem:[%s833_s3 + $0x20] sm:$0xf] %vm423_vm0, %v501_v52  ;;  %v494_v59 = vpack.c.bf16 %v344_v53, %v344_v53  ;;  %v502_v60 = vpack.c.bf16 %v352_v54, %v352_v54  ;;  %v533_v61 = vadd.f32 %v532_v57, %v531_v55  ;;  %v534_v63 = vpop.f32.mrb[6].mxu0  ;;  %v558_v0 = vpop.f32.mrb[6].mxu1 }
 0x100   :  { %v557_v62 = vadd.f32 %v556_v58, %v555_v56  ;;  %v535_v1 = vpop.f32.mrb[7].mxu0  ;;  %v559_v2 = vpop.f32.mrb[7].mxu1 }
 0x101   :  { %425 = vst.msk [vmem:[%s833_s3 + $0x4] sm:$0xf] %vm423_vm0, %v494_v59  ;;  %433 = vst.msk [vmem:[%s833_s3 + $0x24] sm:$0xf] %vm423_vm0, %v502_v60  ;;  %v289_v3 = vadd.f32 %v533_v61, %v748_v34  ;;  %v536_v5 = vadd.f32 %v535_v1, %v534_v63  ;;  %v560_v6 = vadd.f32 %v559_v2, %v558_v0 }
 0x102   :  { %v321_v4 = vadd.f32 %v557_v62, %v748_v34 }
 0x103   :  { %v345_v7 = vmax.f32 %v289_v3, 0.0  ;;  %v292_v9 = vadd.f32 %v536_v5, %v748_v34  ;;  %v324_v10 = vadd.f32 %v560_v6, %v748_v34 }
 0x104   :  { %v353_v8 = vmax.f32 %v321_v4, 0.0 }
 0x105   :  { %v495_v11 = vpack.c.bf16 %v345_v7, %v345_v7  ;;  %v346_v13 = vmax.f32 %v292_v9, 0.0  ;;  %v354_v14 = vmax.f32 %v324_v10, 0.0  ;;  %v537_v15 = vpop.f32.mrb[8].mxu0  ;;  %v561_v16 = vpop.f32.mrb[8].mxu1 }
 0x106   :  { %v503_v12 = vpack.c.bf16 %v353_v8, %v353_v8  ;;  %v538_v17 = vpop.f32.mrb[9].mxu0  ;;  %v562_v18 = vpop.f32.mrb[9].mxu1 }
 0x107   :  { %426 = vst.msk [vmem:[%s833_s3 + $0x8] sm:$0xf] %vm423_vm0, %v495_v11  ;;  %v496_v19 = vpack.c.bf16 %v346_v13, %v346_v13  ;;  %v504_v20 = vpack.c.bf16 %v354_v14, %v354_v14  ;;  %v539_v21 = vadd.f32 %v538_v17, %v537_v15  ;;  %v563_v22 = vadd.f32 %v562_v18, %v561_v16  ;;  %v540_v23 = vpop.f32.mrb[10].mxu0  ;;  %v564_v24 = vpop.f32.mrb[10].mxu1 }
 0x108   :  { %434 = vst.msk [vmem:[%s833_s3 + $0x28] sm:$0xf] %vm423_vm0, %v503_v12  ;;  %v541_v25 = vpop.f32.mrb[11].mxu0  ;;  %v565_v26 = vpop.f32.mrb[11].mxu1 }
 0x109   :  { %427 = vst.msk [vmem:[%s833_s3 + $0xc] sm:$0xf] %vm423_vm0, %v496_v19  ;;  %435 = vst.msk [vmem:[%s833_s3 + $0x2c] sm:$0xf] %vm423_vm0, %v504_v20  ;;  %v297_v27 = vadd.f32 %v539_v21, %v748_v34  ;;  %v329_v28 = vadd.f32 %v563_v22, %v748_v34  ;;  %v542_v29 = vadd.f32 %v541_v25, %v540_v23 }
 0x10a   :  { %v566_v30 = vadd.f32 %v565_v26, %v564_v24 }
 0x10b   :  { %v347_v31 = vmax.f32 %v297_v27, 0.0  ;;  %v355_v32 = vmax.f32 %v329_v28, 0.0  ;;  %v300_v33 = vadd.f32 %v542_v29, %v748_v34 }
 0x10c   :  { %v332_v35 = vadd.f32 %v566_v30, %v748_v34 }
 0x10d   :  { %v497_v36 = vpack.c.bf16 %v347_v31, %v347_v31  ;;  %v505_v37 = vpack.c.bf16 %v355_v32, %v355_v32  ;;  %v348_v38 = vmax.f32 %v300_v33, 0.0  ;;  %v543_v40 = vpop.f32.mrb[12].mxu0  ;;  %v567_v41 = vpop.f32.mrb[12].mxu1 }
 0x10e   :  { %v356_v39 = vmax.f32 %v332_v35, 0.0  ;;  %v544_v42 = vpop.f32.mrb[13].mxu0  ;;  %v568_v43 = vpop.f32.mrb[13].mxu1 }
 0x10f   :  { %428 = vst.msk [vmem:[%s833_s3 + $0x10] sm:$0xf] %vm423_vm0, %v497_v36  ;;  %436 = vst.msk [vmem:[%s833_s3 + $0x30] sm:$0xf] %vm423_vm0, %v505_v37  ;;  %v498_v44 = vpack.c.bf16 %v348_v38, %v348_v38  ;;  %v545_v46 = vadd.f32 %v544_v42, %v543_v40  ;;  %v569_v47 = vadd.f32 %v568_v43, %v567_v41  ;;  %v546_v48 = vpop.f32.mrb[14].mxu0  ;;  %v570_v49 = vpop.f32.mrb[14].mxu1 }
 0x110   :  { %v506_v45 = vpack.c.bf16 %v356_v39, %v356_v39  ;;  %v547_v50 = vpop.f32.mrb[15].mxu0  ;;  %v571_v51 = vpop.f32.mrb[15].mxu1 }
 0x111   :  { %429 = vst.msk [vmem:[%s833_s3 + $0x14] sm:$0xf] %vm423_vm0, %v498_v44  ;;  %v305_v52 = vadd.f32 %v545_v46, %v748_v34  ;;  %v337_v53 = vadd.f32 %v569_v47, %v748_v34  ;;  %v548_v54 = vadd.f32 %v547_v50, %v546_v48  ;;  %v572_v55 = vadd.f32 %v571_v51, %v570_v49 }
 0x112   :  { %437 = vst.msk [vmem:[%s833_s3 + $0x34] sm:$0xf] %vm423_vm0, %v506_v45 }
 0x113   :  { %v349_v56 = vmax.f32 %v305_v52, 0.0  ;;  %v357_v57 = vmax.f32 %v337_v53, 0.0  ;;  %v308_v58 = vadd.f32 %v548_v54, %v748_v34  ;;  %v340_v59 = vadd.f32 %v572_v55, %v748_v34 }
 0x115   :  { %v499_v60 = vpack.c.bf16 %v349_v56, %v349_v56  ;;  %v507_v61 = vpack.c.bf16 %v357_v57, %v357_v57  ;;  %v350_v62 = vmax.f32 %v308_v58, 0.0  ;;  %v358_v63 = vmax.f32 %v340_v59, 0.0 }
 0x117   :  { %430 = vst.msk [vmem:[%s833_s3 + $0x18] sm:$0xf] %vm423_vm0, %v499_v60  ;;  %438 = vst.msk [vmem:[%s833_s3 + $0x38] sm:$0xf] %vm423_vm0, %v507_v61  ;;  %v500_v0 = vpack.c.bf16 %v350_v62, %v350_v62  ;;  %v508_v1 = vpack.c.bf16 %v358_v63, %v358_v63 }
 0x119   :  { %431 = vst.msk [vmem:[%s833_s3 + $0x1c] sm:$0xf] %vm423_vm0, %v500_v0  ;;  %439 = vst.msk [vmem:[%s833_s3 + $0x3c] sm:$0xf] %vm423_vm0, %v508_v1 }

// kernel: resnet_feat_forward.3
= control target key start
LH: loop header
LB: loop body
LE: loop exit
PB: predicated region body
PF: predicated region fallthrough
CT: control target
= control target key end

     0   :  { %10 = vsyncpa [#allocation4], 0  ;;  %s5453_s0 = inlined_call_operand.vmem [shape: bf16[2,9,16,8], index: 0, kind: input, shape index: {}]   ;;  %s5454_s1 = inlined_call_operand.vmem [shape: bf16[9,8,8], index: 1, kind: input, shape index: {}]   ;;  %s5455_s2 = inlined_call_operand.vmem [shape: f32[1,8], index: 2, kind: input, shape index: {}]   ;;  %s5456_s3 = inlined_call_operand.vmem [shape: bf16[9,8,8], index: 3, kind: input, shape index: {}]   ;;  %s5457_s4 = inlined_call_operand.vmem [shape: f32[1,8], index: 4, kind: input, shape index: {}]   ;;  %s5458_s5 = inlined_call_operand.hbm [shape: f32[2,1,8], index: 5, kind: output, shape index: {}]  }
   0x1   :  { %12 = vsyncpa [#allocation4 + $0x1], 0  ;;  %s4748_s18 = smov 0   ;;  %s4750_s19 = smov 0  }
   0x2   :  { %s4752_s20 = smov 0   ;;  %s4754_s21 = smov 0  }
   0x3 LB: > { %s4769_s22 = sadd.s32 4294967295, %s4712_s21   ;;  %s3861_s23 = sadd.s32 4294967294, %s4712_s21   ;;  %s4712_s21 = sphi %s4754_s21, %s5466_s21   ;;  %s4708_s20 = sphi %s4752_s20, %s5465_s20   ;;  %s4704_s19 = sphi %s4750_s19, %s5464_s19   ;;  %s4700_s18 = sphi %s4748_s18, %s5463_s18  }
   0x4   : > { %s4773_s24 = sadd.s32 1, %s4712_s21   ;;  %s135_s25 = sadd.s32 1, %s4708_s20 }
   0x5   : > { %s132_s26 = ssub.s32 %s4712_s21, %s4773_s24  ;;  %p145_p0 = scmp.ne.s32.totalorder %s4708_s20, %s4704_s19 }
   0x6   : > { %p133_p1 = scmp.eq.s32.totalorder %s132_s26, 0  ;;  %p146_p2 = scmp.eq.s32.totalorder %s4769_s22, 1 }
   0x7   : > { %p151_p3 = scmp.ne.s32.totalorder %s4704_s19, %s4700_s18  ;;  %p152_p4 = scmp.eq.s32.totalorder %s3861_s23, 1 }
   0x8   : > { %s4784_s27 = scalar_select %p133_p1, %s4708_s20, %s135_s25  }
   0x9   : > { %p4786_p5 = por %p146_p2, %p145_p0  ;;  %p4790_p6 = por %p152_p4, %p151_p3 }
   0xa   : > { %p3864_p7 = scmp.ge.s32.totalorder %s4712_s21, 1  ;;  %p190_p8 = scmp.lt.s32.totalorder %s4712_s21, 3 }
   0xc   : > { %p191_p9 = pnand %p3864_p7, %p190_p8 }
   0xd   : > { %v3882_v0 = vld [vmem:[%s5454_s1 + $0x4] sm:$0xf] (!%p191_p9)  ;;  %vm336_vm0 = vcmask (!%p191_p9), 1043456   ;;  %vm265_vm1 = vcmask (!%p191_p9), 59392   ;;  %v4714_v1 = vmov (!%p191_p9), 0.0   ;;  %vm4715_vm2 = vmmov (!%p191_p9), 0  }
   0xe   : > { %194 = sbr.rel (%p191_p9) target bundleno = 722 (0x2d2), region = 40  ;;  %4151 = vmatprep.subr.bf16.mxu0 (!%p191_p9), %v4714_v1  ;;  %v4801_v2 = vsel (!%p191_p9), %vm336_vm0, %v3882_v0, 0  ;;  %4153 = vmatprep.mubr.msk.bf16.mxu0 (!%p191_p9), %vm4715_vm2, %v4714_v1  ;;  %v318_v3 = vld [vmem:[%s5454_s1] sm:$0xf] (!%p191_p9)  ;;  %p217_p10 = scmp.lt.s32.totalorder (!%p191_p9), %s4769_s22, 1  ;;  %v4716_v4 = vmov (!%p191_p9), 0  }
   0xf   : > { %4152 = vmatpush3.bf16.msra.mxu0 (!%p191_p9), %v4801_v2  ;;  %266 = vst.msk [vmem:[#allocation2] sm:$0x7] (!%p191_p9), %vm265_vm1, %v4716_v4  ;;  %267 = vst.msk [vmem:[#allocation2 + $0x4] sm:$0x7] (!%p191_p9), %vm265_vm1, %v4716_v4  ;;  %4157 = vmatprep.subr.bf16.mxu1 (!%p191_p9), %v4714_v1  ;;  %v4818_v5 = vsel (!%p191_p9), %vm336_vm0, %v318_v3, 0  ;;  %vm332_vm3 = vcmask (!%p191_p9), 64512  }
  0x10   : > { %268 = vst.msk [vmem:[#allocation2 + $0x8] sm:$0x7] (!%p191_p9), %vm265_vm1, %v4716_v4  ;;  %269 = vst.msk [vmem:[#allocation2 + $0xc] sm:$0x7] (!%p191_p9), %vm265_vm1, %v4716_v4  ;;  %4158 = vmatpush3.bf16.msra.mxu1 (!%p191_p9), %v4818_v5  ;;  %4159 = vmatprep.mubr.msk.bf16.mxu1 (!%p191_p9), %vm4715_vm2, %v4714_v1  ;;  %v3889_v6 = vld [vmem:[%s5454_s1 + $0xc] sm:$0xf] (!%p191_p9) }
  0x11   : > { %270 = vst.msk [vmem:[#allocation2 + $0x10] sm:$0x7] (!%p191_p9), %vm265_vm1, %v4716_v4  ;;  %271 = vst.msk [vmem:[#allocation2 + $0x14] sm:$0x7] (!%p191_p9), %vm265_vm1, %v4716_v4  ;;  %4163 = vmatprep.subr.bf16.mxu0 (!%p191_p9), %v4714_v1  ;;  %4169 = vmatprep.subr.bf16.mxu1 (!%p191_p9), %v4714_v1  ;;  %v4838_v11 = vsel (!%p191_p9), %vm336_vm0, %v3889_v6, 0  ;;  %vm2562_vm6 = vcmask (!%p191_p9), 60416  }
  0x12   : > { %v3886_v18 = vld [vmem:[%s5454_s1 + $0x8] sm:$0xf] (!%p191_p9)  ;;  %v3891_v39 = vld [vmem:[%s5454_s1 + $0x10] sm:$0xf] (!%p191_p9)  ;;  %vm282_vm4 = vsmask.f32 (!%p191_p9), 2306 }
  0x13   : > { %v4853_v25 = vsel (!%p191_p9), %vm336_vm0, %v3886_v18, 0  ;;  %v4874_v46 = vsel (!%p191_p9), %vm336_vm0, %v3891_v39, 0  ;;  %vm4887_vm5 = vmand (!%p191_p9), %vm265_vm1, %vm282_vm4  ;;  %v3902_v39 = vld [vmem:[%s5454_s1 + $0x20] sm:$0xf] (!%p191_p9)  ;;  %s215_s23 = sand.u32 (!%p191_p9), 1, %s4704_s19   ;;  %s4000_s25 = sshll.u32 (!%p191_p9), %s4769_s22, 4 }
  0x14   : > { %s216_s26 = scalar_lea.vmem (!%p191_p9), [#allocation3], %s215_s23  ;;  %vm3791_vm7 = vcmask (!%p191_p9), 57344   ;;  %s5411_s8 = scalar_lea.hbm (!%p191_p9), %s5458_s5, %s4000_s25 }
  0x15   : > { %s218_s9 = scalar_select %p217_p10, %s4769_s22, 1 }
  0x16   : > { %v4626_v10 = vld [vmem:[#allocation2] ss:$0 sps:$4 sm:$0x77]   ;;  %v284_v58 = vld [vmem:[#allocation2 + $0x4] sm:$0x7]  ;;  %s3806_s30 = sshll.u32 %s216_s26, 4  ;;  %s5413_s30 = int_to_ptr.vmem [resolvable:$true] %s3806_s30 }
  0x17   : > { %s4583_s10 = smul.u32 72, %s218_s9  ;;  %v317_v13 = vld [vmem:[#allocation2] sm:$0x3]  ;;  %v326_v15 = vshrl.u32 %v4626_v10, 16  ;;  %v328_v16 = vshll.u32 %v4626_v10, 16  ;;  %s3794_s9 = scalar_lea.sflag [#allocation4], %s215_s23 }
  0x18   : > { %4160 = vmatmul.mubr.msk.bf16.vlgmr.msra.gmra.mrb[0].mxu1 %vm332_vm3, %v317_v13  ;;  %v4627_v29 = vld [vmem:[#allocation2] ss:$0 sps:$4 sm:$0x66]   ;;  %v293_v62 = vld [vmem:[#allocation2 + $0x8] sm:$0x7]  ;;  %s4717_s22 = smov [#allocation3]  }
  0x19   : > { %s4832_s15 = scalar_lea.vmem %s5453_s0, %s4583_s10  ;;  %4170 = vmatpush3.bf16.msra.mxu1 %v4838_v11  ;;  %4171 = vmatprep.mubr.msk.bf16.mxu1 %vm4715_vm2, %v4714_v1  ;;  %v330_v20 = vrot.slane %v328_v16, 1  ;;  %v432_v41 = vrot.slane %v4627_v29, 1  ;;  %v305_v13 = vld [vmem:[#allocation2 + $0xc] sm:$0x7]  ;;  %v314_v16 = vld [vmem:[#allocation2 + $0x10] sm:$0x7] }
  0x1a   : > { %v223_v7 = vld [vmem:[%s4832_s15] sm:$0xf]  ;;  %v3866_v8 = vld [vmem:[%s4832_s15 + $0x8] sm:$0xf]  ;;  %v3868_v9 = vld [vmem:[%s4832_s15 + $0x10] sm:$0xf]  ;;  %4181 = vmatprep.subr.bf16.mxu1 %v4714_v1 }
  0x1b   : > { %v228_v12 = vmax.bf16 %v3866_v8, %v223_v7  ;;  %v3870_v14 = vld [vmem:[%s4832_s15 + $0x18] sm:$0xf]  ;;  %v3872_v19 = vld [vmem:[%s4832_s15 + $0x20] sm:$0xf]  ;;  %v3874_v22 = vld [vmem:[%s4832_s15 + $0x28] sm:$0xf]  ;;  %v331_v24 = vor.u32 %v330_v20, %v326_v15 }
  0x1c   : > { %v224_v23 = vld [vmem:[%s4832_s15 + $0x4] sm:$0xf]  ;;  %v3867_v27 = vld [vmem:[%s4832_s15 + $0xc] sm:$0xf]  ;;  %v3869_v28 = vld [vmem:[%s4832_s15 + $0x14] sm:$0xf] }
  0x1d   : > { %v233_v17 = vmax.bf16 %v3868_v9, %v228_v12  ;;  %v3876_v30 = vld [vmem:[%s4832_s15 + $0x30] sm:$0xf]  ;;  %v229_v31 = vmax.bf16 %v3867_v27, %v224_v23  ;;  %4154 = vmatmul.mubr.msk.bf16.vlgmr.msra.gmra.mrb[0].mxu0 %vm332_vm3, %v331_v24  ;;  %v3878_v33 = vld [vmem:[%s4832_s15 + $0x38] sm:$0xf]  ;;  %v3871_v34 = vld [vmem:[%s4832_s15 + $0x1c] sm:$0xf] }
  0x1e   : > { %4164 = vmatpush3.bf16.msra.mxu0 %v4853_v25  ;;  %4165 = vmatprep.mubr.msk.bf16.mxu0 %vm4715_vm2, %v4714_v1  ;;  %v3873_v36 = vld [vmem:[%s4832_s15 + $0x24] sm:$0xf]  ;;  %v3880_v38 = vld [vmem:[%s4832_s15 + $0x40] sm:$0xf]  ;;  %v3875_v43 = vld [vmem:[%s4832_s15 + $0x2c] sm:$0xf] }
  0x1f   : > { %v238_v21 = vmax.bf16 %v3870_v14, %v233_v17  ;;  %v234_v35 = vmax.bf16 %v3869_v28, %v229_v31  ;;  %4175 = vmatprep.subr.bf16.mxu0 %v4714_v1  ;;  %v3877_v47 = vld [vmem:[%s4832_s15 + $0x34] sm:$0xf]  ;;  %v3879_v51 = vld [vmem:[%s4832_s15 + $0x3c] sm:$0xf]  ;;  %v3881_v56 = vld [vmem:[%s4832_s15 + $0x44] sm:$0xf] }
  0x20   : > { %v3894_v12 = vld [vmem:[%s5454_s1 + $0x14] sm:$0xf]  ;;  %v3897_v29 = vld [vmem:[%s5454_s1 + $0x18] sm:$0xf]  ;;  %s4650_s10 = scalar_lea.vmem %s5413_s30, 16  ;;  %s4654_s11 = sshll.u32 %s4717_s22, 4  ;;  %s4655_s11 = int_to_ptr.vmem [resolvable:$false] %s4654_s11 }
  0x21   : > { %v243_v26 = vmax.bf16 %v3872_v19, %v238_v21  ;;  %v239_v40 = vmax.bf16 %v3871_v34, %v234_v35  ;;  %v4903_v17 = vsel %vm336_vm0, %v3894_v12, 0  ;;  %v4925_v35 = vsel %vm336_vm0, %v3897_v29, 0  ;;  %p4651_p11 = scmp.ne.s32.totalorder %s5413_s30, %s4650_s10  ;;  %s4656_s12 = scalar_lea.vmem %s4655_s11, 32 }
  0x22   : > { %p4657_p0 = scmp.lt.s32.totalorder %s5413_s30, %s4655_s11  ;;  %p4658_p1 = scmp.lt.s32.totalorder %s4656_s12, %s4650_s10 }
  0x23   : > { %v248_v32 = vmax.bf16 %v3874_v22, %v243_v26  ;;  %v244_v44 = vmax.bf16 %v3873_v36, %v239_v40  ;;  %p4652_p12 = pnand %p4651_p11, %p4786_p5 }
  0x24   : > { %p4659_p2 = por %p4658_p1, %p4657_p0 }
  0x25   : > { %v253_v37 = vmax.bf16 %v3876_v30, %v248_v32  ;;  %v249_v48 = vmax.bf16 %v3875_v43, %v244_v44  ;;  %4166 = vmatmul.mubr.msk.bf16.vlgmr.msra.gmra.mrb[4].mxu0 %vm332_vm3, %v432_v41  ;;  %v3899_v30 = vld [vmem:[%s5454_s1 + $0x1c] sm:$0xf]  ;;  %p4653_p13 = pneg %p4652_p12 }
  0x26   : > { %4176 = vmatpush3.bf16.msra.mxu0 %v4874_v46  ;;  %4177 = vmatprep.mubr.msk.bf16.mxu0 %vm4715_vm2, %v4714_v1  ;;  %v4928_v36 = vsel %vm336_vm0, %v3899_v30, 0 }
  0x27   : > { %v258_v42 = vmax.bf16 %v3878_v33, %v253_v37  ;;  %v254_v52 = vmax.bf16 %v3877_v47, %v249_v48  ;;  %4187 = vmatprep.subr.bf16.mxu0 %v4714_v1  ;;  %p4660_p3 = pnand %p4659_p2, %p4653_p13 }
  0x29   : > { %v4871_v45 = vmax.bf16 %v3880_v38, %v258_v42  ;;  %v259_v59 = vmax.bf16 %v3879_v51, %v254_v52  ;;  %v4944_v42 = vsel %vm336_vm0, %v3902_v39, 0 }
  0x2b   : > { %v273_v49 = vshrl.u32 %v4871_v45, 16  ;;  %v276_v50 = vshll.u32 %v4871_v45, 16  ;;  %v4891_v63 = vmax.bf16 %v3881_v56, %v259_v59 }
  0x2d   : > { %v275_v53 = vrot.slane %v273_v49, 7  ;;  %v287_v54 = vrot.slane %v273_v49, 5  ;;  %v288_v55 = vrot.slane %v276_v50, 6  ;;  %v297_v4 = vshrl.u32 %v4891_v63, 16 }
  0x2e   : > { %v300_v6 = vshll.u32 %v4891_v63, 16 }
  0x2f   : > { %v278_v60 = vor.u32 %v276_v50, %v275_v53  ;;  %v289_v61 = vor.u32 %v288_v55, %v287_v54  ;;  %v299_v8 = vrot.slane %v297_v4, 7  ;;  %v308_v9 = vrot.slane %v297_v4, 5  ;;  %v4638_v4 = vld [vmem:[#allocation2] ss:$0 sps:$4 sm:$0x77]  }
  0x30   : > { %v309_v10 = vrot.slane %v300_v6, 6 }
  0x31   : > { %v285_v0 = vsel %vm4887_vm5, %v278_v60, %v284_v58  ;;  %v290_v3 = vrot.slane %v289_v61, 4  ;;  %v302_v14 = vor.u32 %v300_v6, %v299_v8  ;;  %v3943_v6 = vld [vmem:[%s5456_s3 + $0x4] sm:$0xf] }
  0x32   : > { %286 = vst [vmem:[#allocation2 + $0x4] sm:$0x7] %v285_v0  ;;  %v310_v15 = vor.u32 %v309_v10, %v308_v9  ;;  %v2064_v9 = vld [vmem:[%s5456_s3] sm:$0xf]  ;;  %v2074_v10 = vshll.u32 %v4638_v4, 16  ;;  %v5098_v12 = vsel %vm336_vm0, %v3943_v6, 0 }
  0x33   : > { %v294_v7 = vsel %vm4887_vm5, %v290_v3, %v293_v62  ;;  %v306_v18 = vsel %vm4887_vm5, %v302_v14, %v305_v13  ;;  %v5101_v13 = vsel %vm336_vm0, %v2064_v9, 0  ;;  %v2072_v14 = vshrl.u32 %v4638_v4, 16  ;;  %v5149_v6 = vld [vmem:[%s5455_s2] ss:$0 sm:$0xff] }
  0x34   : > { %295 = vst [vmem:[#allocation2 + $0x8] sm:$0x7] %v294_v7  ;;  %v311_v19 = vrot.slane %v310_v15, 4  ;;  %307 = vst [vmem:[#allocation2 + $0xc] sm:$0x7] %v306_v18  ;;  %v2076_v15 = vrot.slane %v2074_v10, 1 }
  0x35   : > { %v3950_v18 = vld [vmem:[%s5456_s3 + $0xc] sm:$0xf] }
  0x36   : > { %v315_v24 = vsel %vm4887_vm5, %v311_v19, %v314_v16  ;;  %v3947_v16 = vld [vmem:[%s5456_s3 + $0x8] sm:$0xf]  ;;  %v2063_v19 = vld [vmem:[#allocation2] sm:$0x3] }
  0x37   : > { %316 = vst [vmem:[#allocation2 + $0x10] sm:$0x7] %v315_v24  ;;  %v3952_v24 = vld [vmem:[%s5456_s3 + $0x10] sm:$0xf] }
  0x39   : > { %v480_v20 = vld [vmem:[#allocation2 + $0x4] sm:$0x3] }
  0x3a   : > { %v4907_v21 = vld [vmem:[#allocation2 + $0x4] sm:$0x7]  ;;  %4172 = vmatmul.mubr.msk.bf16.vlgmr.msra.gmra.mrb[4].mxu1 %vm332_vm3, %v480_v20 }
  0x3b   : > { %v3892_v22 = vcombine.low %v4907_v21, %v4907_v21  ;;  %v4629_v23 = vld [vmem:[#allocation2 + $0x4] ss:$0 sps:$4 sm:$0x66]   ;;  %4182 = vmatpush3.bf16.msra.mxu1 %v4903_v17  ;;  %4183 = vmatprep.mubr.msk.bf16.mxu1 %vm4715_vm2, %v4714_v1  ;;  %v4630_v28 = vld [vmem:[#allocation2 + $0x8] ss:$0 sps:$4 sm:$0x77]  }
  0x3c   : > { %4193 = vmatprep.subr.bf16.mxu1 %v4714_v1  ;;  %v596_v32 = vrot.slane %v4629_v23, 1  ;;  %v703_v33 = vshll.u32 %v4630_v28, 16  ;;  %v701_v37 = vshrl.u32 %v4630_v28, 16  ;;  %v644_v41 = vld [vmem:[#allocation2 + $0x8] sm:$0x3] }
  0x3d   : > { %v537_v26 = vshrl.u32 %v3892_v22, 16  ;;  %v539_v27 = vshll.u32 %v3892_v22, 16  ;;  %v4631_v43 = vld [vmem:[#allocation2 + $0x8] ss:$0 sps:$4 sm:$0x66]   ;;  %v5123_v22 = vsel %vm336_vm0, %v3950_v18, 0 }
  0x3e   : > { %v705_v38 = vrot.slane %v703_v33, 1  ;;  %v760_v44 = vrot.slane %v4631_v43, 1  ;;  %v4632_v47 = vld [vmem:[#allocation2 + $0xc] ss:$0 sps:$4 sm:$0x77]  }
  0x3f   : > { %v541_v31 = vrot.slane %v539_v27, 1  ;;  %v1113_v48 = vshll.u32 %v4632_v47, 16  ;;  %v4986_v49 = vld [vmem:[#allocation2 + $0xc] sm:$0x3]  ;;  %v1111_v50 = vshrl.u32 %v4632_v47, 16  ;;  %v5139_v27 = vsel %vm336_vm0, %v3952_v24, 0 }
  0x40   : > { %v706_v40 = vor.u32 %v705_v38, %v701_v37  ;;  %v4633_v52 = vld [vmem:[#allocation2 + $0xc] ss:$0 sps:$4 sm:$0x66]   ;;  %v4634_v55 = vld [vmem:[#allocation2 + $0x10] ss:$0 sps:$4 sm:$0x77]  }
  0x41   : > { %v542_v34 = vor.u32 %v541_v31, %v537_v26  ;;  %v1115_v51 = vrot.slane %v1113_v48, 1  ;;  %v1165_v54 = vrot.slane %v4633_v52, 1  ;;  %v1508_v56 = vshll.u32 %v4634_v55, 16  ;;  %v1456_v61 = vld [vmem:[#allocation2 + $0x10] sm:$0x3] }
  0x42   : > { %4184 = vmatmul.mubr.msk.bf16.vlgmr.msra.gmra.mrb[8].mxu1 %vm332_vm3, %v596_v32  ;;  %v1506_v58 = vshrl.u32 %v4634_v55, 16  ;;  %v4635_v62 = vld [vmem:[#allocation2 + $0x10] ss:$0 sps:$4 sm:$0x66]  }
  0x43   : > { %4178 = vmatmul.mubr.msk.bf16.vlgmr.msra.gmra.mrb[8].mxu0 %vm332_vm3, %v542_v34  ;;  %4194 = vmatpush3.bf16.msra.mxu1 %v4928_v36  ;;  %v1116_v53 = vor.u32 %v1115_v51, %v1111_v50  ;;  %v1510_v59 = vrot.slane %v1508_v56, 1  ;;  %v1560_v0 = vrot.slane %v4635_v62, 1  ;;  %v4639_v23 = vld [vmem:[#allocation2] ss:$0 sps:$4 sm:$0x66]  }
  0x44   : > { %4188 = vmatpush3.bf16.msra.mxu0 %v4925_v35  ;;  %4189 = vmatprep.mubr.msk.bf16.mxu0 %vm4715_vm2, %v4714_v1  ;;  %v2176_v26 = vrot.slane %v4639_v23, 1 }
  0x45   : > { %4195 = vmatprep.mubr.msk.bf16.mxu1 %vm4715_vm2, %v4714_v1  ;;  %4199 = vmatprep.subr.bf16.mxu0 %v4714_v1  ;;  %v1511_v60 = vor.u32 %v1510_v59, %v1506_v58 }
  0x46   : > { %4205 = vmatprep.subr.bf16.mxu1 %v4714_v1 }
  0x4a   : > { %4196 = vmatmul.mubr.msk.bf16.vlgmr.msra.gmra.mrb[12].mxu1 %vm332_vm3, %v706_v40 }
  0x4b   : > { %4190 = vmatmul.mubr.msk.bf16.vlgmr.msra.gmra.mrb[12].mxu0 %vm332_vm3, %v644_v41  ;;  %4206 = vmatpush3.bf16.msra.mxu1 %v4801_v2 }
  0x4c   : > { %4200 = vmatpush3.bf16.msra.mxu0 %v4944_v42  ;;  %4201 = vmatprep.mubr.msk.bf16.mxu0 %vm4715_vm2, %v4714_v1 }
  0x4d   : > { %4207 = vmatprep.mubr.msk.bf16.mxu1 %vm4715_vm2, %v4714_v1  ;;  %4211 = vmatprep.subr.bf16.mxu0 %v4714_v1 }
  0x4e   : > { %4217 = vmatprep.subr.bf16.mxu1 %v4714_v1 }
  0x52   : > { %4208 = vmatmul.mubr.msk.bf16.vlgmr.msra.gmra.mrb[16].mxu1 %vm332_vm3, %v542_v34 }
  0x53   : > { %4202 = vmatmul.mubr.msk.bf16.vlgmr.msra.gmra.mrb[16].mxu0 %vm332_vm3, %v760_v44  ;;  %4218 = vmatpush3.bf16.msra.mxu1 %v4853_v25 }
  0x54   : > { %4212 = vmatpush3.bf16.msra.mxu0 %v4818_v5  ;;  %4213 = vmatprep.mubr.msk.bf16.mxu0 %vm4715_vm2, %v4714_v1 }
  0x55   : > { %4219 = vmatprep.mubr.msk.bf16.mxu1 %vm4715_vm2, %v4714_v1  ;;  %4223 = vmatprep.subr.bf16.mxu0 %v4714_v1 }
  0x56   : > { %4229 = vmatprep.subr.bf16.mxu1 %v4714_v1 }
  0x5a   : > { %4220 = vmatmul.mubr.msk.bf16.vlgmr.msra.gmra.mrb[20].mxu1 %vm332_vm3, %v596_v32 }
  0x5b   : > { %4214 = vmatmul.mubr.msk.bf16.vlgmr.msra.gmra.mrb[20].mxu0 %vm332_vm3, %v480_v20  ;;  %4230 = vmatpush3.bf16.msra.mxu1 %v4874_v46  ;;  %v5120_v20 = vsel %vm336_vm0, %v3947_v16, 0 }
  0x5c   : > { %4224 = vmatpush3.bf16.msra.mxu0 %v4838_v11  ;;  %4225 = vmatprep.mubr.msk.bf16.mxu0 %vm4715_vm2, %v4714_v1 }
  0x5d   : > { %4231 = vmatprep.mubr.msk.bf16.mxu1 %vm4715_vm2, %v4714_v1  ;;  %4235 = vmatprep.subr.bf16.mxu0 %v4714_v1 }
  0x5e   : > { %4241 = vmatprep.subr.bf16.mxu1 %v4714_v1 }
  0x62   : > { %4232 = vmatmul.mubr.msk.bf16.vlgmr.msra.gmra.mrb[24].mxu1 %vm332_vm3, %v706_v40 }
  0x63   : > { %4226 = vmatmul.mubr.msk.bf16.vlgmr.msra.gmra.mrb[24].mxu0 %vm332_vm3, %v644_v41  ;;  %4242 = vmatpush3.bf16.msra.mxu1 %v4925_v35 }
  0x64   : > { %4236 = vmatpush3.bf16.msra.mxu0 %v4903_v17  ;;  %4237 = vmatprep.mubr.msk.bf16.mxu0 %vm4715_vm2, %v4714_v1 }
  0x65   : > { %4243 = vmatprep.mubr.msk.bf16.mxu1 %vm4715_vm2, %v4714_v1  ;;  %4247 = vmatprep.subr.bf16.mxu0 %v4714_v1 }
  0x66   : > { %4253 = vmatprep.subr.bf16.mxu1 %v4714_v1 }
  0x6a   : > { %4244 = vmatmul.mubr.msk.bf16.vlgmr.msra.gmra.mrb[28].mxu1 %vm332_vm3, %v4986_v49 }
  0x6b   : > { %4238 = vmatmul.mubr.msk.bf16.vlgmr.msra.gmra.mrb[28].mxu0 %vm332_vm3, %v760_v44  ;;  %4254 = vmatpush3.bf16.msra.mxu1 %v4944_v42 }
  0x6c   : > { %4248 = vmatpush3.bf16.msra.mxu0 %v4928_v36  ;;  %4249 = vmatprep.mubr.msk.bf16.mxu0 %vm4715_vm2, %v4714_v1 }
  0x6d   : > { %4255 = vmatprep.mubr.msk.bf16.mxu1 %vm4715_vm2, %v4714_v1  ;;  %4259 = vmatprep.subr.bf16.mxu0 %v4714_v1 }
  0x6e   : > { %4265 = vmatprep.subr.bf16.mxu1 %v4714_v1 }
  0x72   : > { %4256 = vmatmul.mubr.msk.bf16.vlgmr.msra.gmra.mrb[32].mxu1 %vm332_vm3, %v1165_v54 }
  0x73   : > { %4250 = vmatmul.mubr.msk.bf16.vlgmr.msra.gmra.mrb[32].mxu0 %vm332_vm3, %v1116_v53  ;;  %4266 = vmatpush3.bf16.msra.mxu1 %v4818_v5 }
  0x74   : > { %4260 = vmatpush3.bf16.msra.mxu0 %v4801_v2  ;;  %4261 = vmatprep.mubr.msk.bf16.mxu0 %vm4715_vm2, %v4714_v1 }
  0x75   : > { %4267 = vmatprep.mubr.msk.bf16.mxu1 %vm4715_vm2, %v4714_v1  ;;  %4271 = vmatprep.subr.bf16.mxu0 %v4714_v1 }
  0x76   : > { %4277 = vmatprep.subr.bf16.mxu1 %v4714_v1 }
  0x7a   : > { %4268 = vmatmul.mubr.msk.bf16.vlgmr.msra.gmra.mrb[36].mxu1 %vm332_vm3, %v644_v41 }
  0x7b   : > { %4262 = vmatmul.mubr.msk.bf16.vlgmr.msra.gmra.mrb[36].mxu0 %vm332_vm3, %v706_v40  ;;  %4278 = vmatpush3.bf16.msra.mxu1 %v4838_v11 }
  0x7c   : > { %4272 = vmatpush3.bf16.msra.mxu0 %v4853_v25  ;;  %4273 = vmatprep.mubr.msk.bf16.mxu0 %vm4715_vm2, %v4714_v1 }
  0x7d   : > { %4279 = vmatprep.mubr.msk.bf16.mxu1 %vm4715_vm2, %v4714_v1  ;;  %4283 = vmatprep.subr.bf16.mxu0 %v4714_v1 }
  0x7e   : > { %4289 = vmatprep.subr.bf16.mxu1 %v4714_v1 }
  0x82   : > { %4280 = vmatmul.mubr.msk.bf16.vlgmr.msra.gmra.mrb[40].mxu1 %vm332_vm3, %v4986_v49 }
  0x83   : > { %4274 = vmatmul.mubr.msk.bf16.vlgmr.msra.gmra.mrb[40].mxu0 %vm332_vm3, %v760_v44  ;;  %4290 = vmatpush3.bf16.msra.mxu1 %v4903_v17 }
  0x84   : > { %4284 = vmatpush3.bf16.msra.mxu0 %v4874_v46  ;;  %4285 = vmatprep.mubr.msk.bf16.mxu0 %vm4715_vm2, %v4714_v1 }
  0x85   : > { %4291 = vmatprep.mubr.msk.bf16.mxu1 %vm4715_vm2, %v4714_v1  ;;  %4295 = vmatprep.subr.bf16.mxu0 %v4714_v1 }
  0x86   : > { %4301 = vmatprep.subr.bf16.mxu1 %v4714_v1 }
  0x8a   : > { %4292 = vmatmul.mubr.msk.bf16.vlgmr.msra.gmra.mrb[44].mxu1 %vm332_vm3, %v1165_v54 }
  0x8b   : > { %4286 = vmatmul.mubr.msk.bf16.vlgmr.msra.gmra.mrb[44].mxu0 %vm332_vm3, %v1116_v53  ;;  %4302 = vmatpush3.bf16.msra.mxu1 %v4928_v36 }
  0x8c   : > { %4296 = vmatpush3.bf16.msra.mxu0 %v4925_v35  ;;  %4297 = vmatprep.mubr.msk.bf16.mxu0 %vm4715_vm2, %v4714_v1 }
  0x8d   : > { %4303 = vmatprep.mubr.msk.bf16.mxu1 %vm4715_vm2, %v4714_v1  ;;  %4307 = vmatprep.subr.bf16.mxu0 %v4714_v1 }
  0x8e   : > { %4313 = vmatprep.subr.bf16.mxu1 %v4714_v1 }
  0x92   : > { %4304 = vmatmul.mubr.msk.bf16.vlgmr.msra.gmra.mrb[48].mxu1 %vm332_vm3, %v1511_v60 }
  0x93   : > { %4298 = vmatmul.mubr.msk.bf16.vlgmr.msra.gmra.mrb[48].mxu0 %vm332_vm3, %v1456_v61  ;;  %4314 = vmatpush3.bf16.msra.mxu1 %v4801_v2  ;;  %v4636_v2 = vld [vmem:[#allocation2 + $0x14] ss:$0 sps:$4 sm:$0x77]  }
  0x94   : > { %4308 = vmatpush3.bf16.msra.mxu0 %v4944_v42  ;;  %4309 = vmatprep.mubr.msk.bf16.mxu0 %vm4715_vm2, %v4714_v1 }
  0x95   : > { %4315 = vmatprep.mubr.msk.bf16.mxu1 %vm4715_vm2, %v4714_v1  ;;  %4319 = vmatprep.subr.bf16.mxu0 %v4714_v1 }
  0x96   : > { %4325 = vmatprep.subr.bf16.mxu1 %v4714_v1 }
  0x9a   : > { %4316 = vmatmul.mubr.msk.bf16.vlgmr.msra.gmra.mrb[52].mxu1 %vm332_vm3, %v1116_v53 }
  0x9b   : > { %4310 = vmatmul.mubr.msk.bf16.vlgmr.msra.gmra.mrb[52].mxu0 %vm332_vm3, %v1560_v0  ;;  %4326 = vmatpush3.bf16.msra.mxu1 %v4853_v25  ;;  %v4637_v25 = vld [vmem:[#allocation2 + $0x14] ss:$0 sps:$4 sm:$0x66]  }
  0x9c   : > { %4320 = vmatpush3.bf16.msra.mxu0 %v4818_v5  ;;  %4321 = vmatprep.mubr.msk.bf16.mxu0 %vm4715_vm2, %v4714_v1  ;;  %v1904_v5 = vshll.u32 %v4636_v2, 16  ;;  %v1956_v8 = vrot.slane %v4637_v25, 1 }
  0x9d   : > { %4327 = vmatprep.mubr.msk.bf16.mxu1 %vm4715_vm2, %v4714_v1  ;;  %4331 = vmatprep.subr.bf16.mxu0 %v4714_v1 }
  0x9e   : > { %4337 = vmatprep.subr.bf16.mxu1 %v4714_v1  ;;  %v1906_v3 = vrot.slane %v1904_v5, 1 }
  0xa2   : > { %4328 = vmatmul.mubr.msk.bf16.vlgmr.msra.gmra.mrb[56].mxu1 %vm332_vm3, %v1165_v54 }
  0xa3   : > { %4322 = vmatmul.mubr.msk.bf16.vlgmr.msra.gmra.mrb[56].mxu0 %vm332_vm3, %v4986_v49  ;;  %4338 = vmatpush3.bf16.msra.mxu1 %v4874_v46  ;;  %v1902_v46 = vshrl.u32 %v4636_v2, 16 }
  0xa4   : > { %4332 = vmatpush3.bf16.msra.mxu0 %v4838_v11  ;;  %4333 = vmatprep.mubr.msk.bf16.mxu0 %vm4715_vm2, %v4714_v1  ;;  %v1852_v11 = vld [vmem:[#allocation2 + $0x14] sm:$0x3] }
  0xa5   : > { %4339 = vmatprep.mubr.msk.bf16.mxu1 %vm4715_vm2, %v4714_v1  ;;  %4343 = vmatprep.subr.bf16.mxu0 %v4714_v1  ;;  %v1907_v7 = vor.u32 %v1906_v3, %v1902_v46 }
  0xa6   : > { %4349 = vmatprep.subr.bf16.mxu1 %v4714_v1 }
  0xaa   : > { %4340 = vmatmul.mubr.msk.bf16.vlgmr.msra.gmra.mrb[60].mxu1 %vm332_vm3, %v1511_v60 }
  0xab   : > { %4334 = vmatmul.mubr.msk.bf16.vlgmr.msra.gmra.mrb[60].mxu0 %vm332_vm3, %v1456_v61  ;;  %4350 = vmatpush3.bf16.msra.mxu1 %v4925_v35 }
  0xac   : > { %4344 = vmatpush3.bf16.msra.mxu0 %v4903_v17  ;;  %4345 = vmatprep.mubr.msk.bf16.mxu0 %vm4715_vm2, %v4714_v1  ;;  %v2077_v17 = vor.u32 %v2076_v15, %v2072_v14 }
  0xad   : > { %4351 = vmatprep.mubr.msk.bf16.mxu1 %vm4715_vm2, %v4714_v1  ;;  %4355 = vmatprep.subr.bf16.mxu0 %v4714_v1 }
  0xae   : > { %4361 = vmatprep.subr.bf16.mxu1 %v4714_v1 }
  0xb2   : > { %4352 = vmatmul.mubr.msk.bf16.vlgmr.msra.gmra.mrb[64].mxu1 %vm332_vm3, %v1852_v11 }
  0xb3   : > { %4346 = vmatmul.mubr.msk.bf16.vlgmr.msra.gmra.mrb[64].mxu0 %vm332_vm3, %v1560_v0  ;;  %4362 = vmatpush3.bf16.msra.mxu1 %v4944_v42 }
  0xb4   : > { %4356 = vmatpush3.bf16.msra.mxu0 %v4928_v36  ;;  %4357 = vmatprep.mubr.msk.bf16.mxu0 %vm4715_vm2, %v4714_v1 }
  0xb5   : > { %4363 = vmatprep.mubr.msk.bf16.mxu1 %vm4715_vm2, %v4714_v1  ;;  %4367 = vmatprep.subr.bf16.mxu0 %v4714_v1 }
  0xb6   : > { %4373 = vmatprep.subr.bf16.mxu1 %v4714_v1 }
  0xba   : > { %4364 = vmatmul.mubr.msk.bf16.vlgmr.msra.gmra.mrb[68].mxu1 %vm332_vm3, %v1956_v8 }
  0xbb   : > { %4358 = vmatmul.mubr.msk.bf16.vlgmr.msra.gmra.mrb[68].mxu0 %vm332_vm3, %v1907_v7  ;;  %4374 = vmatpush3.bf16.msra.mxu1 %v5101_v13 }
  0xbc   : > { %4368 = vmatpush3.bf16.msra.mxu0 %v5098_v12  ;;  %4369 = vmatprep.mubr.msk.bf16.mxu0 %vm4715_vm2, %v4714_v1 }
  0xbd   : > { %4375 = vmatprep.mubr.msk.bf16.mxu1 %vm4715_vm2, %v4714_v1  ;;  %4379 = vmatprep.subr.bf16.mxu0 %v4714_v1 }
  0xbe   : > { %4385 = vmatprep.subr.bf16.mxu1 %v4714_v1 }
  0xc2   : > { %4376 = vmatmul.mubr.msk.bf16.vlgmr.msra.gmra.mrb[72].mxu1 %vm332_vm3, %v2063_v19 }
  0xc3   : > { %4370 = vmatmul.mubr.msk.bf16.vlgmr.msra.gmra.mrb[72].mxu0 %vm332_vm3, %v2077_v17  ;;  %4386 = vmatpush3.bf16.msra.mxu1 %v5123_v22 }
  0xc4   : > { %4380 = vmatpush3.bf16.msra.mxu0 %v5120_v20  ;;  %4381 = vmatprep.mubr.msk.bf16.mxu0 %vm4715_vm2, %v4714_v1 }
  0xc5   : > { %4387 = vmatprep.mubr.msk.bf16.mxu1 %vm4715_vm2, %v4714_v1  ;;  %4391 = vmatprep.subr.bf16.mxu0 %v4714_v1 }
  0xc6   : > { %4397 = vmatprep.subr.bf16.mxu1 %v4714_v1 }
  0xcb   : > { %4382 = vmatmul.mubr.msk.bf16.vlgmr.msra.gmra.mrb[76].mxu0 %vm332_vm3, %v2176_v26 }
  0xcc   : > { %4392 = vmatpush3.bf16.msra.mxu0 %v5139_v27  ;;  %4393 = vmatprep.mubr.msk.bf16.mxu0 %vm4715_vm2, %v4714_v1 }
  0xcd   : > { %4403 = vmatprep.subr.bf16.mxu0 %v4714_v1 }
  0xeb   : > { %v420_v28 = vpop.f32.mrb[0].mxu1 }
  0xec   : > { %v4161_v29 = vpop.f32.mrb[1].mxu1 }
  0xed   : > { %v423_v30 = vpop.f32.mrb[2].mxu1 }
  0xee   : > { %v4162_v31 = vpop.f32.mrb[3].mxu1 }
  0xf0   : > { %v374_v32 = vpop.f32.mrb[0].mxu0 }
  0xf1   : > { %v4155_v33 = vpop.f32.mrb[1].mxu0  ;;  %v421_v34 = vadd.f32 %v420_v28, %v374_v32 }
  0xf2   : > { %v377_v35 = vpop.f32.mrb[2].mxu0 }
  0xf3   : > { %v4156_v36 = vpop.f32.mrb[3].mxu0 }
  0xf8   : > { %v473_v37 = vpop.f32.mrb[4].mxu0 }
  0xf9   : > { %v479_v38 = vadd.f32 %v473_v37, %v421_v34  ;;  %v4167_v39 = vpop.f32.mrb[5].mxu0 }
  0xfa   : > { %v476_v40 = vpop.f32.mrb[6].mxu0 }
  0xfb   : > { %v4168_v41 = vpop.f32.mrb[7].mxu0 }
 0x10d   : > { %v523_v42 = vpop.f32.mrb[4].mxu1 }
 0x10e   : > { %v529_v43 = vadd.f32 %v523_v42, %v479_v38  ;;  %v4173_v44 = vpop.f32.mrb[5].mxu1 }
 0x10f   : > { %v526_v47 = vpop.f32.mrb[6].mxu1 }
 0x110   : > { %v4174_v48 = vpop.f32.mrb[7].mxu1 }
 0x115   : > { %v637_v50 = vpop.f32.mrb[8].mxu1 }
 0x116   : > { %v583_v49 = vpop.f32.mrb[8].mxu0  ;;  %v4185_v53 = vpop.f32.mrb[9].mxu1 }
 0x117   : > { %v589_v51 = vadd.f32 %v583_v49, %v529_v43  ;;  %v4179_v52 = vpop.f32.mrb[9].mxu0  ;;  %v640_v55 = vpop.f32.mrb[10].mxu1  ;;  %v3955_v53 = vld [vmem:[%s5456_s3 + $0x14] sm:$0xf] }
 0x118   : > { %v586_v54 = vpop.f32.mrb[10].mxu0  ;;  %v4186_v59 = vpop.f32.mrb[11].mxu1 }
 0x119   : > { %v643_v56 = vadd.f32 %v637_v50, %v589_v51  ;;  %v4180_v58 = vpop.f32.mrb[11].mxu0  ;;  %v5159_v54 = vsel %vm336_vm0, %v3955_v53, 0 }
 0x11d   : > { %v747_v61 = vpop.f32.mrb[12].mxu1 }
 0x11e   : > { %v687_v60 = vpop.f32.mrb[12].mxu0  ;;  %v4197_v2 = vpop.f32.mrb[13].mxu1 }
 0x11f   : > { %v693_v62 = vadd.f32 %v687_v60, %v643_v56  ;;  %v4191_v0 = vpop.f32.mrb[13].mxu0  ;;  %v750_v11 = vpop.f32.mrb[14].mxu1 }
 0x120   : > { %v690_v5 = vpop.f32.mrb[14].mxu0  ;;  %v4198_v3 = vpop.f32.mrb[15].mxu1 }
 0x121   : > { %v753_v25 = vadd.f32 %v747_v61, %v693_v62  ;;  %v4192_v46 = vpop.f32.mrb[15].mxu0  ;;  %v3958_v3 = vld [vmem:[%s5456_s3 + $0x18] sm:$0xf] }
 0x125   : > { %v851_v7 = vpop.f32.mrb[16].mxu1 }
 0x126   : > { %v801_v4 = vpop.f32.mrb[16].mxu0  ;;  %v4209_v10 = vpop.f32.mrb[17].mxu1 }
 0x127   : > { %v807_v8 = vadd.f32 %v801_v4, %v753_v25  ;;  %v4203_v9 = vpop.f32.mrb[17].mxu0  ;;  %v854_v15 = vpop.f32.mrb[18].mxu1 }
 0x128   : > { %v804_v14 = vpop.f32.mrb[18].mxu0  ;;  %v4210_v18 = vpop.f32.mrb[19].mxu1 }
 0x129   : > { %v815_v16 = vadd.f32 %v5149_v6, %v807_v8  ;;  %v4204_v17 = vpop.f32.mrb[19].mxu0  ;;  %v3960_v8 = vld [vmem:[%s5456_s3 + $0x1c] sm:$0xf]  ;;  %v5181_v14 = vsel %vm336_vm0, %v3958_v3, 0 }
 0x12a   : > { %v5184_v15 = vsel %vm336_vm0, %v3960_v8, 0 }
 0x12b   : > { %v816_v19 = vmax.f32 %v815_v16, 0.0 }
 0x12d   : > { %v4003_v23 = vpack.c.bf16 %v816_v19, %v816_v19  ;;  %v931_v26 = vpop.f32.mrb[20].mxu1 }
 0x12e   : > { %v891_v24 = vpop.f32.mrb[20].mxu0  ;;  %v4221_v31 = vpop.f32.mrb[21].mxu1 }
 0x12f   : > { %v2008_v28 = vshrl.u32 %v4003_v23, 16  ;;  %v892_v29 = vadd.f32 %v891_v24, %v851_v7  ;;  %v4215_v30 = vpop.f32.mrb[21].mxu0  ;;  %v934_v33 = vpop.f32.mrb[22].mxu1  ;;  %v2011_v35 = vshll.u32 %v4003_v23, 16 }
 0x130   : > { %v894_v32 = vpop.f32.mrb[22].mxu0  ;;  %v4222_v38 = vpop.f32.mrb[23].mxu1 }
 0x131   : > { %v2010_v34 = vrot.slane %v2008_v28, 7  ;;  %v937_v36 = vadd.f32 %v931_v26, %v892_v29  ;;  %v4216_v37 = vpop.f32.mrb[23].mxu0 }
 0x133   : > { %v2013_v39 = vor.u32 %v2011_v35, %v2010_v34 }
 0x135   : > { %v2015_v40 = vsel %vm4887_vm5, %v2013_v39, %v4907_v21  ;;  %v1013_v42 = vpop.f32.mrb[24].mxu1 }
 0x136   : > { %2016 = vst [vmem:[#allocation2 + $0x4] sm:$0x7] %v2015_v40  ;;  %v972_v41 = vpop.f32.mrb[24].mxu0  ;;  %v4233_v47 = vpop.f32.mrb[25].mxu1 }
 0x137   : > { %v978_v43 = vadd.f32 %v972_v41, %v937_v36  ;;  %v4227_v44 = vpop.f32.mrb[25].mxu0  ;;  %v1016_v49 = vpop.f32.mrb[26].mxu1 }
 0x138   : > { %v975_v48 = vpop.f32.mrb[26].mxu0  ;;  %v4234_v52 = vpop.f32.mrb[27].mxu1 }
 0x139   : > { %v1019_v50 = vadd.f32 %v1013_v42, %v978_v43  ;;  %v4228_v51 = vpop.f32.mrb[27].mxu0  ;;  %v2029_v48 = vld [vmem:[#allocation2 + $0x8] sm:$0x7] }
 0x13d   : > { %v5161_v55 = vld [vmem:[#allocation2 + $0x4] sm:$0x3]  ;;  %v1099_v56 = vpop.f32.mrb[28].mxu1 }
 0x13e   : > { %v1054_v21 = vpop.f32.mrb[28].mxu0  ;;  %4388 = vmatmul.mubr.msk.bf16.vlgmr.msra.gmra.mrb[76].mxu1 %vm332_vm3, %v5161_v55  ;;  %v4640_v58 = vld [vmem:[#allocation2 + $0x4] ss:$0 sps:$4 sm:$0x77]   ;;  %v4245_v61 = vpop.f32.mrb[29].mxu1 }
 0x13f   : > { %v1060_v59 = vadd.f32 %v1054_v21, %v1019_v50  ;;  %v4239_v60 = vpop.f32.mrb[29].mxu0  ;;  %4398 = vmatpush3.bf16.msra.mxu1 %v5159_v54  ;;  %4399 = vmatprep.mubr.msk.bf16.mxu1 %vm4715_vm2, %v4714_v1  ;;  %v1102_v0 = vpop.f32.mrb[30].mxu1  ;;  %v2283_v2 = vshll.u32 %v4640_v58, 16  ;;  %v5168_v5 = vld [vmem:[#allocation2 + $0x4] ss:$0 sps:$4 sm:$0x66]  }
 0x140   : > { %v1057_v62 = vpop.f32.mrb[30].mxu0  ;;  %4409 = vmatprep.subr.bf16.mxu1 %v4714_v1  ;;  %v4246_v46 = vpop.f32.mrb[31].mxu1  ;;  %v2281_v4 = vshrl.u32 %v4640_v58, 16  ;;  %v2340_v10 = vrot.slane %v5168_v5, 1  ;;  %v3963_v0 = vld [vmem:[%s5456_s3 + $0x20] sm:$0xf] }
 0x141   : > { %v1105_v11 = vadd.f32 %v1099_v56, %v1060_v59  ;;  %v4240_v25 = vpop.f32.mrb[31].mxu0  ;;  %v2285_v7 = vrot.slane %v2283_v2, 1 }
 0x142   : > { %v5206_v25 = vsel %vm336_vm0, %v3963_v0, 0 }
 0x143   : > { %v5177_v9 = vor.u32 %v2285_v7, %v2281_v4 }
 0x145   : > { %v1203_v17 = vpop.f32.mrb[32].mxu1  ;;  %4394 = vmatmul.mubr.msk.bf16.vlgmr.msra.gmra.mrb[80].mxu0 %vm332_vm3, %v5177_v9 }
 0x146   : > { %v1154_v16 = vpop.f32.mrb[32].mxu0  ;;  %4400 = vmatmul.mubr.msk.bf16.vlgmr.msra.gmra.mrb[80].mxu1 %vm332_vm3, %v2340_v10  ;;  %v4257_v23 = vpop.f32.mrb[33].mxu1  ;;  %4404 = vmatpush3.bf16.msra.mxu0 %v5181_v14 }
 0x147   : > { %v1160_v18 = vadd.f32 %v1154_v16, %v1105_v11  ;;  %v4251_v19 = vpop.f32.mrb[33].mxu0  ;;  %4405 = vmatprep.mubr.msk.bf16.mxu0 %vm4715_vm2, %v4714_v1  ;;  %v1206_v26 = vpop.f32.mrb[34].mxu1  ;;  %4410 = vmatpush3.bf16.msra.mxu1 %v5184_v15 }
 0x148   : > { %v1157_v24 = vpop.f32.mrb[34].mxu0  ;;  %4415 = vmatprep.subr.bf16.mxu0 %v4714_v1  ;;  %v4258_v30 = vpop.f32.mrb[35].mxu1  ;;  %4411 = vmatprep.mubr.msk.bf16.mxu1 %vm4715_vm2, %v4714_v1 }
 0x149   : > { %v1209_v28 = vadd.f32 %v1203_v17, %v1160_v18  ;;  %v4252_v29 = vpop.f32.mrb[35].mxu0  ;;  %4421 = vmatprep.subr.bf16.mxu1 %v4714_v1 }
 0x14b   : > { %v1210_v31 = vadd.f32 %v5149_v6, %v1209_v28 }
 0x14d   : > { %v1211_v32 = vmax.f32 %v1210_v31, 0.0  ;;  %v1286_v34 = vpop.f32.mrb[36].mxu1 }
 0x14e   : > { %v1246_v33 = vpop.f32.mrb[36].mxu0  ;;  %v4269_v38 = vpop.f32.mrb[37].mxu1 }
 0x14f   : > { %v4004_v35 = vpack.c.bf16 %v1211_v32, %v1211_v32  ;;  %v1287_v36 = vadd.f32 %v1286_v34, %v1246_v33  ;;  %v4263_v37 = vpop.f32.mrb[37].mxu0  ;;  %v1289_v40 = vpop.f32.mrb[38].mxu1 }
 0x150   : > { %v1249_v39 = vpop.f32.mrb[38].mxu0  ;;  %v4270_v43 = vpop.f32.mrb[39].mxu1 }
 0x151   : > { %v2022_v41 = vshrl.u32 %v4004_v35, 16  ;;  %v4264_v42 = vpop.f32.mrb[39].mxu0  ;;  %v2025_v47 = vshll.u32 %v4004_v35, 16 }
 0x153   : > { %v2024_v44 = vrot.slane %v2022_v41, 7 }
 0x155   : > { %v2027_v49 = vor.u32 %v2025_v47, %v2024_v44  ;;  %v1367_v51 = vpop.f32.mrb[40].mxu1 }
 0x156   : > { %v1326_v50 = vpop.f32.mrb[40].mxu0  ;;  %v4281_v56 = vpop.f32.mrb[41].mxu1 }
 0x157   : > { %v2030_v52 = vsel %vm4887_vm5, %v2027_v49, %v2029_v48  ;;  %v1332_v53 = vadd.f32 %v1326_v50, %v1287_v36  ;;  %v4275_v21 = vpop.f32.mrb[41].mxu0  ;;  %v1370_v59 = vpop.f32.mrb[42].mxu1 }
 0x158   : > { %2031 = vst [vmem:[#allocation2 + $0x8] sm:$0x7] %v2030_v52  ;;  %v1329_v58 = vpop.f32.mrb[42].mxu0  ;;  %v4282_v62 = vpop.f32.mrb[43].mxu1 }
 0x159   : > { %v1373_v60 = vadd.f32 %v1367_v51, %v1332_v53  ;;  %v4276_v61 = vpop.f32.mrb[43].mxu0 }
 0x15d   : > { %v1449_v11 = vpop.f32.mrb[44].mxu1 }
 0x15e   : > { %v1408_v2 = vpop.f32.mrb[44].mxu0  ;;  %v4293_v4 = vpop.f32.mrb[45].mxu1 }
 0x15f   : > { %v1414_v46 = vadd.f32 %v1408_v2, %v1373_v60  ;;  %v4287_v3 = vpop.f32.mrb[45].mxu0  ;;  %v5208_v7 = vld [vmem:[#allocation2 + $0x8] sm:$0x3]  ;;  %v1452_v16 = vpop.f32.mrb[46].mxu1 }
 0x160   : > { %v1411_v8 = vpop.f32.mrb[46].mxu0  ;;  %4406 = vmatmul.mubr.msk.bf16.vlgmr.msra.gmra.mrb[84].mxu0 %vm332_vm3, %v5208_v7  ;;  %v4642_v17 = vld [vmem:[#allocation2 + $0x8] ss:$0 sps:$4 sm:$0x77]   ;;  %v4294_v23 = vpop.f32.mrb[47].mxu1 }
 0x161   : > { %v1455_v18 = vadd.f32 %v1449_v11, %v1414_v46  ;;  %v4288_v19 = vpop.f32.mrb[47].mxu0  ;;  %4416 = vmatpush3.bf16.msra.mxu0 %v5206_v25  ;;  %4417 = vmatprep.mubr.msk.bf16.mxu0 %vm4715_vm2, %v4714_v1  ;;  %v2447_v24 = vshll.u32 %v4642_v17, 16  ;;  %v4643_v26 = vld [vmem:[#allocation2 + $0x8] ss:$0 sps:$4 sm:$0x66]   ;;  %v2445_v28 = vshrl.u32 %v4642_v17, 16 }
 0x162   : > { %4427 = vmatprep.subr.bf16.mxu0 %v4714_v1  ;;  %v5218_v33 = vrot.slane %v4643_v26, 1  ;;  %v2044_v8 = vld [vmem:[#allocation2 + $0xc] sm:$0x7] }
 0x163   : > { %v2449_v29 = vrot.slane %v2447_v24, 1 }
 0x165   : > { %v1549_v31 = vpop.f32.mrb[48].mxu1  ;;  %v5216_v32 = vor.u32 %v2449_v29, %v2445_v28 }
 0x166   : > { %v1494_v30 = vpop.f32.mrb[48].mxu0  ;;  %v4305_v36 = vpop.f32.mrb[49].mxu1 }
 0x167   : > { %v1500_v34 = vadd.f32 %v1494_v30, %v1455_v18  ;;  %v4299_v35 = vpop.f32.mrb[49].mxu0  ;;  %v1552_v38 = vpop.f32.mrb[50].mxu1  ;;  %4412 = vmatmul.mubr.msk.bf16.vlgmr.msra.gmra.mrb[84].mxu1 %vm332_vm3, %v5216_v32 }
 0x168   : > { %v1497_v37 = vpop.f32.mrb[50].mxu0  ;;  %4418 = vmatmul.mubr.msk.bf16.vlgmr.msra.gmra.mrb[88].mxu0 %vm332_vm3, %v5218_v33  ;;  %4422 = vmatpush3.bf16.msra.mxu1 %v5098_v12  ;;  %v4306_v41 = vpop.f32.mrb[51].mxu1 }
 0x169   : > { %v1555_v39 = vadd.f32 %v1549_v31, %v1500_v34  ;;  %v4300_v40 = vpop.f32.mrb[51].mxu0  ;;  %4428 = vmatpush3.bf16.msra.mxu0 %v5101_v13  ;;  %4423 = vmatprep.mubr.msk.bf16.mxu1 %vm4715_vm2, %v4714_v1 }
 0x16a   : > { %4429 = vmatprep.mubr.msk.bf16.mxu0 %vm4715_vm2, %v4714_v1  ;;  %4433 = vmatprep.subr.bf16.mxu1 %v4714_v1 }
 0x16b   : > { %4439 = vmatprep.subr.bf16.mxu0 %v4714_v1 }
 0x16d   : > { %v1641_v43 = vpop.f32.mrb[52].mxu1 }
 0x16e   : > { %v1598_v42 = vpop.f32.mrb[52].mxu0  ;;  %v4317_v48 = vpop.f32.mrb[53].mxu1 }
 0x16f   : > { %v1604_v44 = vadd.f32 %v1598_v42, %v1555_v39  ;;  %v4311_v47 = vpop.f32.mrb[53].mxu0  ;;  %v1644_v50 = vpop.f32.mrb[54].mxu1  ;;  %4424 = vmatmul.mubr.msk.bf16.vlgmr.msra.gmra.mrb[88].mxu1 %vm332_vm3, %v5177_v9 }
 0x170   : > { %v1601_v49 = vpop.f32.mrb[54].mxu0  ;;  %4430 = vmatmul.mubr.msk.bf16.vlgmr.msra.gmra.mrb[92].mxu0 %vm332_vm3, %v5161_v55  ;;  %4434 = vmatpush3.bf16.msra.mxu1 %v5120_v20  ;;  %v4318_v53 = vpop.f32.mrb[55].mxu1 }
 0x171   : > { %v1605_v51 = vadd.f32 %v5149_v6, %v1604_v44  ;;  %v4312_v52 = vpop.f32.mrb[55].mxu0  ;;  %4440 = vmatpush3.bf16.msra.mxu0 %v5123_v22  ;;  %4435 = vmatprep.mubr.msk.bf16.mxu1 %vm4715_vm2, %v4714_v1 }
 0x172   : > { %4441 = vmatprep.mubr.msk.bf16.mxu0 %vm4715_vm2, %v4714_v1  ;;  %4445 = vmatprep.subr.bf16.mxu1 %v4714_v1 }
 0x173   : > { %v1606_v21 = vmax.f32 %v1605_v51, 0.0  ;;  %4451 = vmatprep.subr.bf16.mxu0 %v4714_v1 }
 0x175   : > { %v4005_v55 = vpack.c.bf16 %v1606_v21, %v1606_v21  ;;  %v1721_v56 = vpop.f32.mrb[56].mxu1 }
 0x176   : > { %v1681_v9 = vpop.f32.mrb[56].mxu0  ;;  %v4329_v61 = vpop.f32.mrb[57].mxu1 }
 0x177   : > { %v2037_v58 = vshrl.u32 %v4005_v55, 16  ;;  %v1682_v59 = vadd.f32 %v1681_v9, %v1641_v43  ;;  %v4323_v60 = vpop.f32.mrb[57].mxu0  ;;  %v1724_v0 = vpop.f32.mrb[58].mxu1  ;;  %4436 = vmatmul.mubr.msk.bf16.vlgmr.msra.gmra.mrb[92].mxu1 %vm332_vm3, %v2340_v10  ;;  %v2040_v11 = vshll.u32 %v4005_v55, 16 }
 0x178   : > { %v1684_v62 = vpop.f32.mrb[58].mxu0  ;;  %4442 = vmatmul.mubr.msk.bf16.vlgmr.msra.gmra.mrb[96].mxu0 %vm332_vm3, %v5208_v7  ;;  %4446 = vmatpush3.bf16.msra.mxu1 %v5139_v27  ;;  %v4330_v4 = vpop.f32.mrb[59].mxu1 }
 0x179   : > { %v2039_v2 = vrot.slane %v2037_v58, 7  ;;  %v1727_v46 = vadd.f32 %v1721_v56, %v1682_v59  ;;  %v4324_v3 = vpop.f32.mrb[59].mxu0  ;;  %4452 = vmatpush3.bf16.msra.mxu0 %v5159_v54  ;;  %4447 = vmatprep.mubr.msk.bf16.mxu1 %vm4715_vm2, %v4714_v1 }
 0x17a   : > { %4453 = vmatprep.mubr.msk.bf16.mxu0 %vm4715_vm2, %v4714_v1  ;;  %4457 = vmatprep.subr.bf16.mxu1 %v4714_v1 }
 0x17b   : > { %v2042_v5 = vor.u32 %v2040_v11, %v2039_v2  ;;  %4463 = vmatprep.subr.bf16.mxu0 %v4714_v1 }
 0x17d   : > { %v2045_v10 = vsel %vm4887_vm5, %v2042_v5, %v2044_v8  ;;  %v1803_v17 = vpop.f32.mrb[60].mxu1 }
 0x17e   : > { %2046 = vst [vmem:[#allocation2 + $0xc] sm:$0x7] %v2045_v10  ;;  %v1762_v16 = vpop.f32.mrb[60].mxu0  ;;  %v4341_v23 = vpop.f32.mrb[61].mxu1 }
 0x17f   : > { %v1768_v18 = vadd.f32 %v1762_v16, %v1727_v46  ;;  %v4335_v19 = vpop.f32.mrb[61].mxu0  ;;  %v1806_v26 = vpop.f32.mrb[62].mxu1  ;;  %4448 = vmatmul.mubr.msk.bf16.vlgmr.msra.gmra.mrb[96].mxu1 %vm332_vm3, %v5216_v32  ;;  %v2059_v23 = vld [vmem:[#allocation2 + $0x10] sm:$0x7] }
 0x180   : > { %v1765_v24 = vpop.f32.mrb[62].mxu0  ;;  %4454 = vmatmul.mubr.msk.bf16.vlgmr.msra.gmra.mrb[100].mxu0 %vm332_vm3, %v5218_v33  ;;  %4458 = vmatpush3.bf16.msra.mxu1 %v5181_v14  ;;  %v4342_v30 = vpop.f32.mrb[63].mxu1 }
 0x181   : > { %v1809_v28 = vadd.f32 %v1803_v17, %v1768_v18  ;;  %v4336_v29 = vpop.f32.mrb[63].mxu0  ;;  %4464 = vmatpush3.bf16.msra.mxu0 %v5184_v15  ;;  %4459 = vmatprep.mubr.msk.bf16.mxu1 %vm4715_vm2, %v4714_v1 }
 0x182   : > { %4469 = vmatprep.subr.bf16.mxu1 %v4714_v1  ;;  %4465 = vmatprep.mubr.msk.bf16.mxu0 %vm4715_vm2, %v4714_v1 }
 0x183   : > { %4475 = vmatprep.subr.bf16.mxu0 %v4714_v1 }
 0x185   : > { %v5272_v31 = vld [vmem:[#allocation2 + $0xc] sm:$0x3]  ;;  %v1890_v35 = vpop.f32.mrb[64].mxu1 }
 0x186   : > { %v1844_v34 = vpop.f32.mrb[64].mxu0  ;;  %v4644_v36 = vld [vmem:[#allocation2 + $0xc] ss:$0 sps:$4 sm:$0x77]   ;;  %v4353_v39 = vpop.f32.mrb[65].mxu1 }
 0x187   : > { %v1850_v37 = vadd.f32 %v1844_v34, %v1809_v28  ;;  %v4347_v38 = vpop.f32.mrb[65].mxu0  ;;  %v1893_v41 = vpop.f32.mrb[66].mxu1  ;;  %4460 = vmatmul.mubr.msk.bf16.vlgmr.msra.gmra.mrb[100].mxu1 %vm332_vm3, %v5272_v31  ;;  %v2867_v42 = vshll.u32 %v4644_v36, 16  ;;  %v2865_v48 = vshrl.u32 %v4644_v36, 16 }
 0x188   : > { %v1847_v40 = vpop.f32.mrb[66].mxu0  ;;  %4470 = vmatpush3.bf16.msra.mxu1 %v5206_v25  ;;  %v4354_v47 = vpop.f32.mrb[67].mxu1  ;;  %4471 = vmatprep.mubr.msk.bf16.mxu1 %vm4715_vm2, %v4714_v1  ;;  %v4645_v50 = vld [vmem:[#allocation2 + $0xc] ss:$0 sps:$4 sm:$0x66]  }
 0x189   : > { %v1896_v43 = vadd.f32 %v1890_v35, %v1850_v37  ;;  %v4348_v44 = vpop.f32.mrb[67].mxu0  ;;  %v2869_v49 = vrot.slane %v2867_v42, 1  ;;  %4481 = vmatprep.subr.bf16.mxu1 %v4714_v1  ;;  %v5284_v21 = vrot.slane %v4645_v50, 1 }
 0x18b   : > { %v5280_v51 = vor.u32 %v2869_v49, %v2865_v48 }
 0x18d   : > { %v1994_v53 = vpop.f32.mrb[68].mxu1  ;;  %4466 = vmatmul.mubr.msk.bf16.vlgmr.msra.gmra.mrb[104].mxu0 %vm332_vm3, %v5280_v51 }
 0x18e   : > { %v1945_v52 = vpop.f32.mrb[68].mxu0  ;;  %4476 = vmatpush3.bf16.msra.mxu0 %v5098_v12  ;;  %v4365_v56 = vpop.f32.mrb[69].mxu1  ;;  %4477 = vmatprep.mubr.msk.bf16.mxu0 %vm4715_vm2, %v4714_v1 }
 0x18f   : > { %v1951_v55 = vadd.f32 %v1945_v52, %v1896_v43  ;;  %v4359_v9 = vpop.f32.mrb[69].mxu0  ;;  %v1997_v59 = vpop.f32.mrb[70].mxu1  ;;  %4472 = vmatmul.mubr.msk.bf16.vlgmr.msra.gmra.mrb[104].mxu1 %vm332_vm3, %v5284_v21  ;;  %4487 = vmatprep.subr.bf16.mxu0 %v4714_v1 }
 0x190   : > { %v1948_v58 = vpop.f32.mrb[70].mxu0  ;;  %4482 = vmatpush3.bf16.msra.mxu1 %v5101_v13  ;;  %v4366_v62 = vpop.f32.mrb[71].mxu1  ;;  %4483 = vmatprep.mubr.msk.bf16.mxu1 %vm4715_vm2, %v4714_v1 }
 0x191   : > { %v2000_v60 = vadd.f32 %v1994_v53, %v1951_v55  ;;  %v4360_v61 = vpop.f32.mrb[71].mxu0  ;;  %4493 = vmatprep.subr.bf16.mxu1 %v4714_v1 }
 0x193   : > { %v2001_v0 = vadd.f32 %v5149_v6, %v2000_v60 }
 0x195   : > { %v2002_v2 = vmax.f32 %v2001_v0, 0.0  ;;  %4478 = vmatmul.mubr.msk.bf16.vlgmr.msra.gmra.mrb[108].mxu0 %vm332_vm3, %v5216_v32  ;;  %v2164_v46 = vpop.f32.mrb[72].mxu1 }
 0x196   : > { %v2118_v11 = vpop.f32.mrb[72].mxu0  ;;  %4488 = vmatpush3.bf16.msra.mxu0 %v5120_v20  ;;  %4489 = vmatprep.mubr.msk.bf16.mxu0 %vm4715_vm2, %v4714_v1  ;;  %v4377_v5 = vpop.f32.mrb[73].mxu1 }
 0x197   : > { %v4006_v3 = vpack.c.bf16 %v2002_v2, %v2002_v2  ;;  %v4371_v4 = vpop.f32.mrb[73].mxu0  ;;  %v2165_v8 = vadd.f32 %v2164_v46, %v2118_v11  ;;  %4484 = vmatmul.mubr.msk.bf16.vlgmr.msra.gmra.mrb[108].mxu1 %vm332_vm3, %v5208_v7  ;;  %4499 = vmatprep.subr.bf16.mxu0 %v4714_v1  ;;  %v2167_v10 = vpop.f32.mrb[74].mxu1 }
 0x198   : > { %v2121_v6 = vpop.f32.mrb[74].mxu0  ;;  %4494 = vmatpush3.bf16.msra.mxu1 %v5123_v22  ;;  %4495 = vmatprep.mubr.msk.bf16.mxu1 %vm4715_vm2, %v4714_v1  ;;  %v4378_v17 = vpop.f32.mrb[75].mxu1 }
 0x199   : > { %v2052_v16 = vshrl.u32 %v4006_v3, 16  ;;  %v4372_v32 = vpop.f32.mrb[75].mxu0  ;;  %4505 = vmatprep.subr.bf16.mxu1 %v4714_v1  ;;  %v2055_v19 = vshll.u32 %v4006_v3, 16 }
 0x19b   : > { %v2054_v18 = vrot.slane %v2052_v16, 7 }
 0x19d   : > { %v2057_v24 = vor.u32 %v2055_v19, %v2054_v18  ;;  %4490 = vmatmul.mubr.msk.bf16.vlgmr.msra.gmra.mrb[112].mxu0 %vm332_vm3, %v5218_v33 }
 0x19e   : > { %v2217_v7 = vpop.f32.mrb[76].mxu0  ;;  %4500 = vmatpush3.bf16.msra.mxu0 %v5139_v27  ;;  %4501 = vmatprep.mubr.msk.bf16.mxu0 %vm4715_vm2, %v4714_v1 }
 0x19f   : > { %v2060_v26 = vsel %vm4887_vm5, %v2057_v24, %v2059_v23  ;;  %v5316_v28 = vadd.f32 %v2217_v7, %v2165_v8  ;;  %v4383_v29 = vpop.f32.mrb[77].mxu0  ;;  %4496 = vmatmul.mubr.msk.bf16.vlgmr.msra.gmra.mrb[112].mxu1 %vm332_vm3, %v5272_v31  ;;  %4511 = vmatprep.subr.bf16.mxu0 %v4714_v1 }
 0x1a0   : > { %2061 = vst [vmem:[#allocation2 + $0x10] sm:$0x7] %v2060_v26  ;;  %v2220_v30 = vpop.f32.mrb[78].mxu0  ;;  %4506 = vmatpush3.bf16.msra.mxu1 %v5159_v54  ;;  %4507 = vmatprep.mubr.msk.bf16.mxu1 %vm4715_vm2, %v4714_v1 }
 0x1a1   : > { %v4384_v57 = vpop.f32.mrb[79].mxu0  ;;  %4517 = vmatprep.subr.bf16.mxu1 %v4714_v1 }
 0x1a5   : > { %4502 = vmatmul.mubr.msk.bf16.vlgmr.msra.gmra.mrb[116].mxu0 %vm332_vm3, %v5280_v51 }
 0x1a6   : > { %4512 = vmatpush3.bf16.msra.mxu0 %v5181_v14  ;;  %4513 = vmatprep.mubr.msk.bf16.mxu0 %vm4715_vm2, %v4714_v1 }
 0x1a7   : > { %4508 = vmatmul.mubr.msk.bf16.vlgmr.msra.gmra.mrb[116].mxu1 %vm332_vm3, %v5284_v21  ;;  %4523 = vmatprep.subr.bf16.mxu0 %v4714_v1  ;;  %v4646_v33 = vld [vmem:[#allocation2 + $0x10] ss:$0 sps:$4 sm:$0x77]  }
 0x1a8   : > { %4518 = vmatpush3.bf16.msra.mxu1 %v5184_v15  ;;  %4519 = vmatprep.mubr.msk.bf16.mxu1 %vm4715_vm2, %v4714_v1  ;;  %v3275_v34 = vshll.u32 %v4646_v33, 16  ;;  %v3273_v35 = vshrl.u32 %v4646_v33, 16  ;;  %v3223_v37 = vld [vmem:[#allocation2 + $0x10] sm:$0x3] }
 0x1a9   : > { %4529 = vmatprep.subr.bf16.mxu1 %v4714_v1  ;;  %v4647_v39 = vld [vmem:[#allocation2 + $0x10] ss:$0 sps:$4 sm:$0x66]  }
 0x1aa   : > { %v3277_v36 = vrot.slane %v3275_v34, 1  ;;  %v3327_v40 = vrot.slane %v4647_v39, 1  ;;  %v2062_v39 = vunpack.c.l.bf16 %v4871_v45 }
 0x1ac   : > { %v3278_v38 = vor.u32 %v3277_v36, %v3273_v35  ;;  %v5394_v36 = vld [vmem:[%s5457_s4] ss:$0 sm:$0xff] }
 0x1ad   : > { %4514 = vmatmul.mubr.msk.bf16.vlgmr.msra.gmra.mrb[120].mxu0 %vm332_vm3, %v3223_v37 }
 0x1ae   : > { %4524 = vmatpush3.bf16.msra.mxu0 %v5206_v25  ;;  %4525 = vmatprep.mubr.msk.bf16.mxu0 %vm4715_vm2, %v4714_v1 }
 0x1af   : > { %4520 = vmatmul.mubr.msk.bf16.vlgmr.msra.gmra.mrb[120].mxu1 %vm332_vm3, %v3278_v38  ;;  %4535 = vmatprep.subr.bf16.mxu0 %v4714_v1 }
 0x1b0   : > { %4530 = vmatpush3.bf16.msra.mxu1 %v5098_v12  ;;  %4531 = vmatprep.mubr.msk.bf16.mxu1 %vm4715_vm2, %v4714_v1  ;;  %v4648_v12 = vld [vmem:[#allocation2 + $0x14] ss:$0 sps:$4 sm:$0x77]  }
 0x1b1   : > { %4541 = vmatprep.subr.bf16.mxu1 %v4714_v1 }
 0x1b5   : > { %4526 = vmatmul.mubr.msk.bf16.vlgmr.msra.gmra.mrb[124].mxu0 %vm332_vm3, %v3327_v40 }
 0x1b6   : > { %4536 = vmatpush3.bf16.msra.mxu0 %v5101_v13  ;;  %4537 = vmatprep.mubr.msk.bf16.mxu0 %vm4715_vm2, %v4714_v1  ;;  %v3679_v13 = vshll.u32 %v4648_v12, 16 }
 0x1b7   : > { %4532 = vmatmul.mubr.msk.bf16.vlgmr.msra.gmra.mrb[124].mxu1 %vm332_vm3, %v5280_v51  ;;  %4547 = vmatprep.subr.bf16.mxu0 %v4714_v1 }
 0x1b8   : > { %4542 = vmatpush3.bf16.msra.mxu1 %v5120_v20  ;;  %4543 = vmatprep.mubr.msk.bf16.mxu1 %vm4715_vm2, %v4714_v1  ;;  %v3627_v20 = vld [vmem:[#allocation2 + $0x14] sm:$0x3] }
 0x1b9   : > { %4553 = vmatprep.subr.bf16.mxu1 %v4714_v1 }
 0x1bd   : > { %4538 = vmatmul.mubr.msk.bf16.vlgmr.msra.gmra.mrb[128].mxu0 %vm332_vm3, %v5272_v31 }
 0x1be   : > { %4548 = vmatpush3.bf16.msra.mxu0 %v5123_v22  ;;  %4549 = vmatprep.mubr.msk.bf16.mxu0 %vm4715_vm2, %v4714_v1  ;;  %v3677_v22 = vshrl.u32 %v4648_v12, 16 }
 0x1bf   : > { %4544 = vmatmul.mubr.msk.bf16.vlgmr.msra.gmra.mrb[128].mxu1 %vm332_vm3, %v5284_v21  ;;  %4559 = vmatprep.subr.bf16.mxu0 %v4714_v1 }
 0x1c0   : > { %4554 = vmatpush3.bf16.msra.mxu1 %v5139_v27  ;;  %4555 = vmatprep.mubr.msk.bf16.mxu1 %vm4715_vm2, %v4714_v1  ;;  %v3681_v27 = vrot.slane %v3679_v13, 1 }
 0x1c1   : > { %4565 = vmatprep.subr.bf16.mxu1 %v4714_v1 }
 0x1c5   : > { %4550 = vmatmul.mubr.msk.bf16.vlgmr.msra.gmra.mrb[132].mxu0 %vm332_vm3, %v3223_v37 }
 0x1c6   : > { %4560 = vmatpush3.bf16.msra.mxu0 %v5159_v54  ;;  %4561 = vmatprep.mubr.msk.bf16.mxu0 %vm4715_vm2, %v4714_v1  ;;  %v4649_v54 = vld [vmem:[#allocation2 + $0x14] ss:$0 sps:$4 sm:$0x66]  }
 0x1c7   : > { %4556 = vmatmul.mubr.msk.bf16.vlgmr.msra.gmra.mrb[132].mxu1 %vm332_vm3, %v3278_v38  ;;  %4571 = vmatprep.subr.bf16.mxu0 %v4714_v1  ;;  %v3731_v31 = vrot.slane %v4649_v54, 1 }
 0x1c8   : > { %4566 = vmatpush3.bf16.msra.mxu1 %v5181_v14  ;;  %4567 = vmatprep.mubr.msk.bf16.mxu1 %vm4715_vm2, %v4714_v1  ;;  %v3682_v14 = vor.u32 %v3681_v27, %v3677_v22 }
 0x1c9   : > { %4577 = vmatprep.subr.bf16.mxu1 %v4714_v1 }
 0x1cd   : > { %4562 = vmatmul.mubr.msk.bf16.vlgmr.msra.gmra.mrb[136].mxu0 %vm332_vm3, %v3327_v40 }
 0x1ce   : > { %4572 = vmatpush3.bf16.msra.mxu0 %v5184_v15  ;;  %4573 = vmatprep.mubr.msk.bf16.mxu0 %vm4715_vm2, %v4714_v1 }
 0x1cf   : > { %4568 = vmatmul.mubr.msk.bf16.vlgmr.msra.gmra.mrb[136].mxu1 %vm332_vm3, %v3627_v20 }
 0x1d0   : > { %4578 = vmatpush3.bf16.msra.mxu1 %v5206_v25  ;;  %4579 = vmatprep.mubr.msk.bf16.mxu1 %vm4715_vm2, %v4714_v1 }
 0x1d5   : > { %4574 = vmatmul.mubr.msk.bf16.vlgmr.msra.gmra.mrb[140].mxu0 %vm332_vm3, %v3682_v14 }
 0x1d7   : > { %4580 = vmatmul.mubr.msk.bf16.vlgmr.msra.gmra.mrb[140].mxu1 %vm332_vm3, %v3731_v31 }
 0x211   : > { %v2267_v41 = vpop.f32.mrb[76].mxu1 }
 0x212   : > { %v2273_v15 = vadd.f32 %v2267_v41, %v5316_v28  ;;  %v4389_v42 = vpop.f32.mrb[77].mxu1 }
 0x213   : > { %v2270_v43 = vpop.f32.mrb[78].mxu1 }
 0x214   : > { %v4390_v44 = vpop.f32.mrb[79].mxu1 }
 0x218   : > { %v2327_v47 = vpop.f32.mrb[80].mxu0 }
 0x219   : > { %v2381_v48 = vpop.f32.mrb[80].mxu1  ;;  %v2333_v49 = vadd.f32 %v2327_v47, %v2273_v15  ;;  %v4395_v50 = vpop.f32.mrb[81].mxu0 }
 0x21a   : > { %v4401_v25 = vpop.f32.mrb[81].mxu1  ;;  %v2330_v51 = vpop.f32.mrb[82].mxu0 }
 0x21b   : > { %v2384_v52 = vpop.f32.mrb[82].mxu1  ;;  %v2387_v1 = vadd.f32 %v2381_v48, %v2333_v49  ;;  %v4396_v53 = vpop.f32.mrb[83].mxu0 }
 0x21c   : > { %v4402_v21 = vpop.f32.mrb[83].mxu1 }
 0x21d   : > { %v2966_v21 = vrot.slane %v2062_v39, 4 }
 0x233   : > { %v2431_v55 = vpop.f32.mrb[84].mxu0 }
 0x234   : > { %v2437_v9 = vadd.f32 %v2431_v55, %v2387_v1  ;;  %v4407_v56 = vpop.f32.mrb[85].mxu0 }
 0x235   : > { %v2434_v58 = vpop.f32.mrb[86].mxu0 }
 0x236   : > { %v4408_v59 = vpop.f32.mrb[87].mxu0 }
 0x23a   : > { %v2491_v60 = vpop.f32.mrb[84].mxu1 }
 0x23b   : > { %v2545_v61 = vpop.f32.mrb[88].mxu0  ;;  %v2497_v62 = vadd.f32 %v2491_v60, %v2437_v9  ;;  %v4413_v0 = vpop.f32.mrb[85].mxu1 }
 0x23c   : > { %v4419_v2 = vpop.f32.mrb[89].mxu0  ;;  %v2494_v11 = vpop.f32.mrb[86].mxu1 }
 0x23d   : > { %v2548_v46 = vpop.f32.mrb[90].mxu0  ;;  %v2551_v3 = vadd.f32 %v2545_v61, %v2497_v62  ;;  %v4414_v4 = vpop.f32.mrb[87].mxu1 }
 0x23e   : > { %v4420_v8 = vpop.f32.mrb[91].mxu0 }
 0x23f   : > { %v2559_v40 = vadd.f32 %v5394_v36, %v2551_v3 }
 0x241   : > { %v2560_v41 = vadd.f32 %v2559_v40, %v2062_v39 }
 0x242   : > { %v2605_v5 = vpop.f32.mrb[88].mxu1 }
 0x243   : > { %v2645_v6 = vpop.f32.mrb[92].mxu0  ;;  %v4425_v16 = vpop.f32.mrb[89].mxu1  ;;  %v2561_v42 = vmax.f32 %v2560_v41, 0.0 }
 0x244   : > { %v2646_v10 = vadd.f32 %v2645_v6, %v2605_v5  ;;  %v4431_v32 = vpop.f32.mrb[93].mxu0  ;;  %v2608_v17 = vpop.f32.mrb[90].mxu1 }
 0x245   : > { %v2648_v18 = vpop.f32.mrb[94].mxu0  ;;  %v4426_v19 = vpop.f32.mrb[91].mxu1  ;;  %v2563_v45 = vsel %vm2562_vm6, %v2561_v42, 0.0 }
 0x246   : > { %v4432_v23 = vpop.f32.mrb[95].mxu0  ;;  %v2564_v51 = vrot.slane %v2563_v45, 4 }
 0x248   : > { %v2565_v60 = vadd.f32 %v2564_v51, %v2563_v45 }
 0x24a   : > { %v2685_v24 = vpop.f32.mrb[92].mxu1  ;;  %v2566_v11 = vrot.slane %v2565_v60, 2 }
 0x24b   : > { %v2726_v7 = vpop.f32.mrb[96].mxu0  ;;  %v2691_v26 = vadd.f32 %v2685_v24, %v2646_v10  ;;  %v4437_v28 = vpop.f32.mrb[93].mxu1 }
 0x24c   : > { %v4443_v29 = vpop.f32.mrb[97].mxu0  ;;  %v2688_v30 = vpop.f32.mrb[94].mxu1  ;;  %v2567_v17 = vadd.f32 %v2566_v11, %v2565_v60 }
 0x24d   : > { %v2729_v57 = vpop.f32.mrb[98].mxu0  ;;  %v2732_v33 = vadd.f32 %v2726_v7, %v2691_v26  ;;  %v4438_v34 = vpop.f32.mrb[95].mxu1 }
 0x24e   : > { %v4444_v35 = vpop.f32.mrb[99].mxu0  ;;  %v2568_v26 = vrot.slane %v2567_v17, 1 }
 0x250   : > { %v2569_v39 = vadd.f32 %v2568_v26, %v2567_v17 }
 0x252   : > { %v2767_v37 = vpop.f32.mrb[96].mxu1 }
 0x253   : > { %v2808_v38 = vpop.f32.mrb[100].mxu0  ;;  %v2773_v12 = vadd.f32 %v2767_v37, %v2732_v33  ;;  %v4449_v13 = vpop.f32.mrb[97].mxu1 }
 0x254   : > { %v4455_v20 = vpop.f32.mrb[101].mxu0  ;;  %v2770_v22 = vpop.f32.mrb[98].mxu1 }
 0x255   : > { %v2811_v27 = vpop.f32.mrb[102].mxu0  ;;  %v2814_v54 = vadd.f32 %v2808_v38, %v2773_v12  ;;  %v4450_v14 = vpop.f32.mrb[99].mxu1 }
 0x256   : > { %v4456_v31 = vpop.f32.mrb[103].mxu0 }
 0x25a   : > { %v2853_v15 = vpop.f32.mrb[100].mxu1 }
 0x25b   : > { %v2859_v43 = vadd.f32 %v2853_v15, %v2814_v54  ;;  %v4461_v44 = vpop.f32.mrb[101].mxu1 }
 0x25c   : > { %v2856_v47 = vpop.f32.mrb[102].mxu1 }
 0x25d   : > { %v4462_v48 = vpop.f32.mrb[103].mxu1 }
 0x260   : > { %v2908_v49 = vpop.f32.mrb[104].mxu0 }
 0x261   : > { %v2914_v50 = vadd.f32 %v2908_v49, %v2859_v43  ;;  %v4467_v25 = vpop.f32.mrb[105].mxu0 }
 0x262   : > { %v2911_v52 = vpop.f32.mrb[106].mxu0  ;;  %v2957_v1 = vpop.f32.mrb[104].mxu1 }
 0x263   : > { %v2963_v53 = vadd.f32 %v2957_v1, %v2914_v50  ;;  %v4468_v55 = vpop.f32.mrb[107].mxu0  ;;  %v4473_v9 = vpop.f32.mrb[105].mxu1 }
 0x264   : > { %v2960_v56 = vpop.f32.mrb[106].mxu1 }
 0x265   : > { %v2964_v58 = vadd.f32 %v5394_v36, %v2963_v53  ;;  %v4474_v59 = vpop.f32.mrb[107].mxu1  ;;  %v2978_v53 = vunpack.c.l.bf16 %v4891_v63 }
 0x267   : > { %v2968_v61 = vadd.f32 %v2966_v21, %v2964_v58 }
 0x268   : > { %v3013_v62 = vpop.f32.mrb[108].mxu0 }
 0x269   : > { %v2969_v0 = vmax.f32 %v2968_v61, 0.0  ;;  %v4479_v2 = vpop.f32.mrb[109].mxu0 }
 0x26a   : > { %v3016_v46 = vpop.f32.mrb[110].mxu0  ;;  %v3053_v3 = vpop.f32.mrb[108].mxu1 }
 0x26b   : > { %v2970_v4 = vsel %vm2562_vm6, %v2969_v0, 0.0  ;;  %v3054_v8 = vadd.f32 %v3053_v3, %v3013_v62  ;;  %v4480_v5 = vpop.f32.mrb[111].mxu0  ;;  %v4485_v6 = vpop.f32.mrb[109].mxu1 }
 0x26c   : > { %v2971_v10 = vrot.slane %v2970_v4, 4  ;;  %v3056_v16 = vpop.f32.mrb[110].mxu1 }
 0x26d   : > { %v4486_v32 = vpop.f32.mrb[111].mxu1 }
 0x26e   : > { %v2972_v18 = vadd.f32 %v2971_v10, %v2970_v4 }
 0x270   : > { %v2973_v19 = vrot.slane %v2972_v18, 2  ;;  %v3093_v23 = vpop.f32.mrb[112].mxu0 }
 0x271   : > { %v3099_v24 = vadd.f32 %v3093_v23, %v3054_v8  ;;  %v4491_v7 = vpop.f32.mrb[113].mxu0 }
 0x272   : > { %v2974_v28 = vadd.f32 %v2973_v19, %v2972_v18  ;;  %v3096_v29 = vpop.f32.mrb[114].mxu0  ;;  %v3134_v30 = vpop.f32.mrb[112].mxu1 }
 0x273   : > { %v3140_v57 = vadd.f32 %v3134_v30, %v3099_v24  ;;  %v4492_v33 = vpop.f32.mrb[115].mxu0  ;;  %v4497_v34 = vpop.f32.mrb[113].mxu1 }
 0x274   : > { %v2975_v35 = vrot.slane %v2974_v28, 1  ;;  %v3137_v37 = vpop.f32.mrb[114].mxu1 }
 0x275   : > { %v4498_v38 = vpop.f32.mrb[115].mxu1 }
 0x276   : > { %v2976_v40 = vadd.f32 %v2975_v35, %v2974_v28 }
 0x278   : > { %v3175_v12 = vpop.f32.mrb[116].mxu0  ;;  %v2977_v13 = vadd.f32 %v2976_v40, %v2569_v39 }
 0x279   : > { %v3181_v20 = vadd.f32 %v3175_v12, %v3140_v57  ;;  %v4503_v22 = vpop.f32.mrb[117].mxu0 }
 0x27a   : > { %v3178_v27 = vpop.f32.mrb[118].mxu0  ;;  %v3216_v54 = vpop.f32.mrb[116].mxu1 }
 0x27b   : > { %v3222_v14 = vadd.f32 %v3216_v54, %v3181_v20  ;;  %v4504_v31 = vpop.f32.mrb[119].mxu0  ;;  %v4509_v41 = vpop.f32.mrb[117].mxu1 }
 0x27c   : > { %v3219_v15 = vpop.f32.mrb[118].mxu1 }
 0x27d   : > { %v4510_v42 = vpop.f32.mrb[119].mxu1 }
 0x280   : > { %v3261_v43 = vpop.f32.mrb[120].mxu0 }
 0x281   : > { %v3267_v44 = vadd.f32 %v3261_v43, %v3222_v14  ;;  %v4515_v47 = vpop.f32.mrb[121].mxu0 }
 0x282   : > { %v3264_v48 = vpop.f32.mrb[122].mxu0  ;;  %v3316_v45 = vpop.f32.mrb[120].mxu1 }
 0x283   : > { %v3322_v49 = vadd.f32 %v3316_v45, %v3267_v44  ;;  %v4516_v50 = vpop.f32.mrb[123].mxu0  ;;  %v4521_v25 = vpop.f32.mrb[121].mxu1 }
 0x284   : > { %v3319_v51 = vpop.f32.mrb[122].mxu1 }
 0x285   : > { %v4522_v52 = vpop.f32.mrb[123].mxu1 }
 0x288   : > { %v3365_v1 = vpop.f32.mrb[124].mxu0 }
 0x289   : > { %v3371_v21 = vadd.f32 %v3365_v1, %v3322_v49  ;;  %v4527_v55 = vpop.f32.mrb[125].mxu0  ;;  %v3778_v49 = vrot.slane %v2978_v53, 4 }
 0x28a   : > { %v3368_v9 = vpop.f32.mrb[126].mxu0  ;;  %v3417_v56 = vpop.f32.mrb[124].mxu1 }
 0x28b   : > { %v3372_v58 = vadd.f32 %v5394_v36, %v3371_v21  ;;  %v4528_v59 = vpop.f32.mrb[127].mxu0  ;;  %v4533_v60 = vpop.f32.mrb[125].mxu1 }
 0x28c   : > { %v3420_v61 = vpop.f32.mrb[126].mxu1 }
 0x28d   : > { %v3373_v62 = vadd.f32 %v3372_v58, %v2978_v53  ;;  %v4534_v0 = vpop.f32.mrb[127].mxu1 }
 0x28f   : > { %v3374_v2 = vmax.f32 %v3373_v62, 0.0 }
 0x290   : > { %v3457_v11 = vpop.f32.mrb[128].mxu0 }
 0x291   : > { %v3375_v46 = vsel %vm2562_vm6, %v3374_v2, 0.0  ;;  %v3458_v3 = vadd.f32 %v3457_v11, %v3417_v56  ;;  %v4539_v4 = vpop.f32.mrb[129].mxu0 }
 0x292   : > { %v3376_v8 = vrot.slane %v3375_v46, 4  ;;  %v3460_v5 = vpop.f32.mrb[130].mxu0  ;;  %v3497_v63 = vpop.f32.mrb[128].mxu1 }
 0x293   : > { %v3503_v6 = vadd.f32 %v3497_v63, %v3458_v3  ;;  %v4540_v10 = vpop.f32.mrb[131].mxu0  ;;  %v4545_v16 = vpop.f32.mrb[129].mxu1 }
 0x294   : > { %v3377_v32 = vadd.f32 %v3376_v8, %v3375_v46  ;;  %v3500_v17 = vpop.f32.mrb[130].mxu1 }
 0x295   : > { %v4546_v18 = vpop.f32.mrb[131].mxu1 }
 0x296   : > { %v3378_v19 = vrot.slane %v3377_v32, 2 }
 0x298   : > { %v3379_v23 = vadd.f32 %v3378_v19, %v3377_v32  ;;  %v3538_v24 = vpop.f32.mrb[132].mxu0 }
 0x299   : > { %v3544_v7 = vadd.f32 %v3538_v24, %v3503_v6  ;;  %v4551_v26 = vpop.f32.mrb[133].mxu0 }
 0x29a   : > { %v3380_v28 = vrot.slane %v3379_v23, 1  ;;  %v3541_v29 = vpop.f32.mrb[134].mxu0  ;;  %v3579_v30 = vpop.f32.mrb[132].mxu1 }
 0x29b   : > { %v3585_v57 = vadd.f32 %v3579_v30, %v3544_v7  ;;  %v4552_v33 = vpop.f32.mrb[135].mxu0  ;;  %v4557_v34 = vpop.f32.mrb[133].mxu1 }
 0x29c   : > { %v3381_v35 = vadd.f32 %v3380_v28, %v3379_v23  ;;  %v3582_v37 = vpop.f32.mrb[134].mxu1 }
 0x29d   : > { %v4558_v38 = vpop.f32.mrb[135].mxu1 }
 0x29e   : > { %v3382_v39 = vadd.f32 %v3381_v35, %v2977_v13 }
 0x2a0   : > { %v3620_v40 = vpop.f32.mrb[136].mxu0 }
 0x2a1   : > { %v3626_v12 = vadd.f32 %v3620_v40, %v3585_v57  ;;  %v4563_v20 = vpop.f32.mrb[137].mxu0 }
 0x2a2   : > { %v3623_v22 = vpop.f32.mrb[138].mxu0  ;;  %v3665_v27 = vpop.f32.mrb[136].mxu1 }
 0x2a3   : > { %v3671_v54 = vadd.f32 %v3665_v27, %v3626_v12  ;;  %v4564_v14 = vpop.f32.mrb[139].mxu0  ;;  %v4569_v31 = vpop.f32.mrb[137].mxu1 }
 0x2a4   : > { %v3668_v41 = vpop.f32.mrb[138].mxu1 }
 0x2a5   : > { %v4570_v15 = vpop.f32.mrb[139].mxu1 }
 0x2a8   : > { %v3720_v42 = vpop.f32.mrb[140].mxu0 }
 0x2a9   : > { %v3726_v43 = vadd.f32 %v3720_v42, %v3671_v54  ;;  %v4575_v44 = vpop.f32.mrb[141].mxu0 }
 0x2aa   : > { %v3723_v47 = vpop.f32.mrb[142].mxu0  ;;  %v3769_v48 = vpop.f32.mrb[140].mxu1 }
 0x2ab   : > { %v3775_v45 = vadd.f32 %v3769_v48, %v3726_v43  ;;  %v4576_v13 = vpop.f32.mrb[143].mxu0  ;;  %v4581_v50 = vpop.f32.mrb[141].mxu1 }
 0x2ac   : > { %v3772_v25 = vpop.f32.mrb[142].mxu1 }
 0x2ad   : > { %v3776_v51 = vadd.f32 %v5394_v36, %v3775_v45  ;;  %v4582_v52 = vpop.f32.mrb[143].mxu1 }
 0x2af   : > { %v3780_v1 = vadd.f32 %v3778_v49, %v3776_v51 }
 0x2b1   : > { %v3781_v21 = vmax.f32 %v3780_v1, 0.0 }
 0x2b3   : > { %v3782_v55 = vsel %vm2562_vm6, %v3781_v21, 0.0 }
 0x2b4   : > { %v3783_v9 = vrot.slane %v3782_v55, 4 }
 0x2b6   : > { %v3784_v56 = vadd.f32 %v3783_v9, %v3782_v55 }
 0x2b8   : > { %v3785_v58 = vrot.slane %v3784_v56, 2 }
 0x2ba   : > { %v3786_v59 = vadd.f32 %v3785_v58, %v3784_v56 }
 0x2bc   : > { %v3787_v60 = vrot.slane %v3786_v59, 1 }
 0x2be   : > { %v3788_v61 = vadd.f32 %v3787_v60, %v3786_v59 }
 0x2c0   : > { %v3789_v53 = vadd.f32 %v3788_v61, %v3382_v39 }
 0x2c2   : > { %v3790_v62 = vmul.f32 0.0625, %v3789_v53 }
 0x2c4   : > { %3792 = vst.msk [vmem:[%s216_s26] sm:$0x1] %vm3791_vm7, %v3790_v62 }
 0x2c5   : > { %4663 = shalt.err (!%p4660_p3)
}
 0x2c6   : > { %s4664_s13 = scalar_lea.hbm %s5411_s8, 16  ;;  %s4668_s16 = scalar_lea.hbm %s5458_s5, 32 }
 0x2c7   : > { %p4665_p4 = scmp.ne.s32.totalorder %s5411_s8, %s4664_s13  ;;  %p4669_p9 = scmp.lt.u32.totalorder %s5411_s8, %s5458_s5 }
 0x2c8   : > { %p4670_p10 = scmp.lt.u32.totalorder %s4668_s16, %s4664_s13  ;;  %p4672_p12 = scmp.lt.u32.totalorder %s4664_s13, %s5411_s8 }
 0x2c9   : > { %p4666_p7 = pnand %p4665_p4, %p4786_p5 }
 0x2ca   : > { %p4671_p11 = por %p4670_p10, %p4669_p9 }
 0x2cb   : > { %p4667_p8 = pneg %p4666_p7 }
 0x2cc   : > { %p4673_p13 = por %p4672_p12, %p4671_p11 }
 0x2ce   : > { %p4674_p0 = pnand %p4673_p13, %p4667_p8 }
 0x2d0   : > { %4677 = shalt.err (!%p4674_p0)
}
 0x2d1   : > { %4584 = dma.vmem_to_hbm [thread:$0]  (%p4786_p5), %s5413_s30, 16, %s5411_s8, %s3794_s9  }
 0x2d2 PF: > { %p4590_p1 = scmp.ge.s32.totalorder %s4712_s21, 2  ;;  %s3818_s25 = sand.u32 1, %s4700_s18  }
 0x2d3   : > { %s3819_s26 = scalar_lea.sflag [#allocation4], %s3818_s25 }
 0x2d4   : > { %p4587_p2 = pnand %p4590_p1, %p4790_p6 }
 0x2d6   : > { %4695 = dma.done.wait (!%p4587_p2), %s3819_s26, 16  }
 0x2d7   : > { %4697 = vsyncadd (!%p4587_p2), %s3819_s26, 4294967280  ;;  %p15_p3 = scmp.ge.s32.totalorder %s4773_s24, 4   ;;  %s5463_s18 = smov %s4704_s19 }
 0x2d8   : > { %s5464_s19 = smov %s4708_s20  ;;  %s5465_s20 = smov %s4784_s27 }
 0x2d9   : > { %s5466_s21 = smov %s4773_s24  ;;  %17 = sbr.rel (!%p15_p3) target bundleno = 3 (0x3), region = 104 }
 0x2e0   :  { %3823 = vsyncpa [#allocation4], 1 }
 0x2e1   :  { %3825 = vsyncpa [#allocation4 + $0x1], 1 }

</bundles_post_ra>
